<compile_context>
chip_gen: v6e
topology: v6e:2x2x1
jax: 0.10.0
libtpu: 0.0.40
codegen_flags: <defaults>
</compile_context>

<pallas_src>
import functools

import numpy as np

import jax
import jax.numpy as jnp
from jax.experimental import pallas as pl
from jax.experimental.pallas import tpu as pltpu


# ----------------------------------------------------------------------------
# Network geometry
# ----------------------------------------------------------------------------
def _conv_out(h, k, s):
    return (h - k) // s + 1


def _net_dims(in_channels, spatial, n_actions, cnn_flatten_dim=512):
    K1, S1, C1 = 8, 4, 32
    K2, S2, C2 = 4, 2, 64
    K3, S3, C3 = 3, 1, 64
    H1 = _conv_out(spatial, K1, S1)
    H2 = _conv_out(H1, K2, S2)
    H3 = _conv_out(H2, K3, S3)
    assert H3 >= 1, "spatial too small for the nature CNN"
    # Stride-group decomposition for conv1 needs kernel == 2*stride and H % stride == 0.
    assert K1 == 2 * S1 and spatial % S1 == 0
    Hg = spatial // S1
    assert Hg == H1 + 1
    return dict(
        CIN=in_channels, SP=spatial,
        K1=K1, S1=S1, C1=C1, K2=K2, S2=S2, C2=C2, K3=K3, S3=S3, C3=C3,
        Hg=Hg, F0=S1 * Hg * S1 * in_channels,
        H1=H1, L1=H1 * C1,          # square images: W1out == H1, etc.
        H2=H2, L2=H2 * C2,
        H3=H3, L3=H3 * C3,
        HID=cnn_flatten_dim,
        NACT=n_actions,
        NPAD=max(128, ((n_actions + 127) // 128) * 128),
    )


# ----------------------------------------------------------------------------
# Parameters: PyTorch-layout init (OIHW convs, (in, out) fcs).
# ----------------------------------------------------------------------------
def init_params(key, in_channels, spatial, n_actions, cnn_flatten_dim=512):
    h1 = _conv_out(spatial, 8, 4)
    h2 = _conv_out(h1, 4, 2)
    h3 = _conv_out(h2, 3, 1)
    flat_dim = 64 * h3 * h3
    ks = jax.random.split(key, 10)

    def nrm(k, shape, scale=0.05):
        return (scale * jax.random.normal(k, shape)).astype(jnp.float32)

    return {
        "conv1_w": nrm(ks[0], (32, in_channels, 8, 8)),
        "conv1_b": nrm(ks[1], (32,)),
        "conv2_w": nrm(ks[2], (64, 32, 4, 4)),
        "conv2_b": nrm(ks[3], (64,)),
        "conv3_w": nrm(ks[4], (64, 64, 3, 3)),
        "conv3_b": nrm(ks[5], (64,)),
        "fc1_w": nrm(ks[6], (flat_dim, cnn_flatten_dim)),
        "fc1_b": nrm(ks[7], (cnn_flatten_dim,)),
        "fc2_w": nrm(ks[8], (cnn_flatten_dim, n_actions)),
        "fc2_b": nrm(ks[9], (n_actions,)),
    }


# ----------------------------------------------------------------------------
# One-time TPU re-layout: width-Toeplitz-expanded conv weights so every conv is
# a 2-D matmul on rows=(b, out_row), lanes=(out_col, channel).
# ----------------------------------------------------------------------------
def prepare_tpu_params(params, d):
    f32 = np.float32
    W1 = np.asarray(params["conv1_w"], f32)          # (32, Cin, 8, 8)
    W2 = np.asarray(params["conv2_w"], f32)          # (64, 32, 4, 4)
    W3 = np.asarray(params["conv3_w"], f32)          # (64, 64, 3, 3)

    S1, Cin, Hg = d["S1"], d["CIN"], d["Hg"]
    C1, C2, C3 = d["C1"], d["C2"], d["C3"]
    W1o, W2o, W3o = d["H1"], d["H2"], d["H3"]
    K2, S2, K3, S3 = d["K2"], d["S2"], d["K3"], d["S3"]

    # conv1: T1[I, (dh, wg, dw, ci), (ow, co)] = W1[co, ci, S1*I+dh, S1*(wg-ow)+dw]
    t1 = np.zeros((2, S1, Hg, S1, Cin, W1o, C1), f32)
    ow = np.arange(W1o)
    for I in range(2):
        for jg in range(2):
            rhs = np.transpose(
                W1[:, :, S1 * I:S1 * I + S1, S1 * jg:S1 * jg + S1], (2, 3, 1, 0))
            t1[I, :, ow + jg, :, :, ow, :] = rhs[None]        # (dh, dw, ci, co)
    t1 = t1.reshape(2, d["F0"], d["L1"])

    # conv2: T2[i, (x1, c1), (ow2, c2)] = W2[c2, c1, i, x1 - S2*ow2]
    t2 = np.zeros((K2, W1o, C1, W2o, C2), f32)
    ow2 = np.arange(W2o)
    for j in range(K2):
        rhs = np.transpose(W2[:, :, :, j], (2, 1, 0))          # (i, c1, c2)
        t2[:, S2 * ow2 + j, :, ow2, :] = rhs[None]
    t2 = t2.reshape(K2, W1o * C1, W2o * C2)

    # conv3: T3[i, (x2, c2), (ow3, c3)] = W3[c3, c2, i, x2 - S3*ow3]
    t3 = np.zeros((K3, W2o, C2, W3o, C3), f32)
    ow3 = np.arange(W3o)
    for j in range(K3):
        rhs = np.transpose(W3[:, :, :, j], (2, 1, 0))          # (i, c2, c3)
        t3[:, S3 * ow3 + j, :, ow3, :] = rhs[None]
    t3 = t3.reshape(K3, W2o * C2, W3o * C3)

    # fc1 rows permuted from NCHW flatten (c3, oh3, ow3) into per-oh3 (ow3, c3)
    # blocks so the flatten is folded into the fc1 accumulation.
    HID = d["HID"]
    fc1 = np.asarray(params["fc1_w"], f32).reshape(C3, d["H3"], W3o, HID)
    fc1 = np.transpose(fc1, (1, 2, 0, 3)).reshape(d["H3"], W3o * C3, HID)

    NPAD, NACT = d["NPAD"], d["NACT"]
    fc2 = np.zeros((HID, NPAD), f32)
    fc2[:, :NACT] = np.asarray(params["fc2_w"], f32)
    fc2b = np.zeros((NPAD,), f32)
    fc2b[:NACT] = np.asarray(params["fc2_b"], f32)

    b1 = np.tile(np.asarray(params["conv1_b"], f32), W1o).reshape(1, d["L1"])
    b2 = np.tile(np.asarray(params["conv2_b"], f32), W2o).reshape(1, d["L2"])
    b3 = np.tile(np.asarray(params["conv3_b"], f32), W3o).reshape(1, d["L3"])

    return {
        "t1": jnp.asarray(t1, jnp.bfloat16), "b1": jnp.asarray(b1, jnp.float32),
        "t2": jnp.asarray(t2, jnp.bfloat16), "b2": jnp.asarray(b2, jnp.float32),
        "t3": jnp.asarray(t3, jnp.bfloat16), "b3": jnp.asarray(b3, jnp.float32),
        "fc1_w": jnp.asarray(fc1, jnp.bfloat16),
        "fc1_b": jnp.asarray(params["fc1_b"], jnp.float32).reshape(1, HID),
        "fc2_w": jnp.asarray(fc2, jnp.bfloat16),
        "fc2_b": jnp.asarray(fc2b, jnp.float32).reshape(1, NPAD),
    }


# ----------------------------------------------------------------------------
# Fused kernel: whole QNetwork forward for one batch tile, all in VMEM.
# ----------------------------------------------------------------------------
def _fused_qnet_kernel(xs_ref, t1_ref, b1_ref, t2_ref, b2_ref, t3_ref, b3_ref,
                       fc1w_ref, fc1b_ref, fc2w_ref, fc2b_ref, out_ref, *, d):
    tb = xs_ref.shape[0]
    H1, L1, F0 = d["H1"], d["L1"], d["F0"]
    H2, L2, K2, S2 = d["H2"], d["L2"], d["K2"], d["S2"]
    H3, L3, K3, S3 = d["H3"], d["L3"], d["K3"], d["S3"]

    # ---- conv1: 2 stride-group matmuls covering all output rows at once ----
    if H1 % 8 == 0 or tb == 1:
        acc1 = jnp.zeros((tb * H1, L1), jnp.float32)
        for I in range(2):
            lhs = xs_ref[:, I:I + H1, :].reshape(tb * H1, F0)
            acc1 = acc1 + jnp.dot(lhs, t1_ref[I],
                                  preferred_element_type=jnp.float32)
        a1 = jnp.maximum(acc1 + b1_ref[...], 0.0).astype(jnp.bfloat16)
        a1 = a1.reshape(tb, H1, L1)
        a1_rows = [a1[:, r, :] for r in range(H1)]
    else:  # per-output-row fallback (layout-safe for any H1)
        a1_rows = []
        for r in range(H1):
            acc = jnp.zeros((tb, L1), jnp.float32)
            for I in range(2):
                acc = acc + jnp.dot(xs_ref[:, r + I, :], t1_ref[I],
                                    preferred_element_type=jnp.float32)
            a1_rows.append(
                jnp.maximum(acc + b1_ref[...], 0.0).astype(jnp.bfloat16))

    # ---- conv2: per output row, width-Toeplitz matmul per kernel row ----
    a2_rows = []
    for oh in range(H2):
        acc = jnp.zeros((tb, L2), jnp.float32)
        for i in range(K2):
            acc = acc + jnp.dot(a1_rows[S2 * oh + i], t2_ref[i],
                                preferred_element_type=jnp.float32)
        a2_rows.append(jnp.maximum(acc + b2_ref[...], 0.0).astype(jnp.bfloat16))

    # ---- conv3 ----
    a3_rows = []
    for oh in range(H3):
        acc = jnp.zeros((tb, L3), jnp.float32)
        for i in range(K3):
            acc = acc + jnp.dot(a2_rows[S3 * oh + i], t3_ref[i],
                                preferred_element_type=jnp.float32)
        a3_rows.append(jnp.maximum(acc + b3_ref[...], 0.0).astype(jnp.bfloat16))

    # ---- fc1 (+ReLU): NCHW flatten folded into per-row fc1 weight blocks ----
    h = jnp.zeros((tb, fc1w_ref.shape[2]), jnp.float32)
    for oh in range(H3):
        h = h + jnp.dot(a3_rows[oh], fc1w_ref[oh],
                        preferred_element_type=jnp.float32)
    h = jnp.maximum(h + fc1b_ref[...], 0.0).astype(jnp.bfloat16)

    # ---- fc2: lane-padded to 128 so the only HBM store is lane-dense ----
    q = jnp.dot(h, fc2w_ref[...], preferred_element_type=jnp.float32)
    out_ref[...] = q + fc2b_ref[...]


# ----------------------------------------------------------------------------
# Full forward (QNetwork.forward semantics).
# ----------------------------------------------------------------------------
def qnetwork_forward(tpu_params, obs_nchw, d):
    B = obs_nchw.shape[0]
    S1, Hg, Cin = d["S1"], d["Hg"], d["CIN"]

    # Single fused XLA layout pass over obs:
    # obs[b, ci, S1*hg+dh, S1*wg+dw] -> xs[b, hg, (dh, wg, dw, ci)], cast to bf16.
    x = obs_nchw.reshape(B, Cin, Hg, S1, Hg, S1)
    xs = jnp.transpose(x, (0, 2, 3, 4, 5, 1)).reshape(B, Hg, d["F0"])
    xs = xs.astype(jnp.bfloat16)

    # Batch tiling: tb=8 when the batch allows it (grid >= 2 so v7x's two
    # TensorCores split batches, and the (8,128) output-block rule is met);
    # otherwise the whole batch is one tile (block == full array dims).
    if B > 8 and B % 8 == 0:
        tb = 8
    else:
        tb = B
    grid = (B // tb,)

    flops = 2 * B * (2 * d["H1"] * d["F0"] * d["L1"]
                     + d["H2"] * d["K2"] * d["L1"] * d["L2"]
                     + d["H3"] * d["K3"] * d["L2"] * d["L3"]
                     + d["H3"] * d["L3"] * d["HID"]
                     + d["HID"] * d["NPAD"])
    w_keys = ("t1", "b1", "t2", "b2", "t3", "b3", "fc1_w", "fc1_b", "fc2_w", "fc2_b")
    w_bytes = sum(int(tpu_params[k].size) * tpu_params[k].dtype.itemsize
                  for k in w_keys)
    bytes_accessed = int(xs.size) * 2 + w_bytes + B * d["NPAD"] * 4

    q = pl.pallas_call(
        functools.partial(_fused_qnet_kernel, d=d),
        out_shape=jax.ShapeDtypeStruct((B, d["NPAD"]), jnp.float32),
        grid_spec=pltpu.PrefetchScalarGridSpec(
            num_scalar_prefetch=0,
            grid=grid,
            in_specs=[
                pl.BlockSpec((tb, Hg, d["F0"]), lambda i: (i, 0, 0)),
                pl.BlockSpec(tpu_params["t1"].shape, lambda i: (0, 0, 0)),
                pl.BlockSpec(tpu_params["b1"].shape, lambda i: (0, 0)),
                pl.BlockSpec(tpu_params["t2"].shape, lambda i: (0, 0, 0)),
                pl.BlockSpec(tpu_params["b2"].shape, lambda i: (0, 0)),
                pl.BlockSpec(tpu_params["t3"].shape, lambda i: (0, 0, 0)),
                pl.BlockSpec(tpu_params["b3"].shape, lambda i: (0, 0)),
                pl.BlockSpec(tpu_params["fc1_w"].shape, lambda i: (0, 0, 0)),
                pl.BlockSpec(tpu_params["fc1_b"].shape, lambda i: (0, 0)),
                pl.BlockSpec(tpu_params["fc2_w"].shape, lambda i: (0, 0)),
                pl.BlockSpec(tpu_params["fc2_b"].shape, lambda i: (0, 0)),
            ],
            out_specs=pl.BlockSpec((tb, d["NPAD"]), lambda i: (i, 0)),
        ),
        compiler_params=pltpu.CompilerParams(
            dimension_semantics=("parallel",),
            vmem_limit_bytes=32 * 1024 * 1024,
        ),
        cost_estimate=pl.CostEstimate(
            flops=flops, transcendentals=0, bytes_accessed=bytes_accessed),
    )(xs,
      tpu_params["t1"], tpu_params["b1"],
      tpu_params["t2"], tpu_params["b2"],
      tpu_params["t3"], tpu_params["b3"],
      tpu_params["fc1_w"], tpu_params["fc1_b"],
      tpu_params["fc2_w"], tpu_params["fc2_b"])
    return q[:, :d["NACT"]]


# ----------------------------------------------------------------------------
# Pure-JAX references (PyTorch semantics).  quantize_bf16=True mirrors the
# kernel's bf16 input/weight/activation quantization (f32 accumulation).
# ----------------------------------------------------------------------------
def _ref_forward(params, obs, *, quantize_bf16=False):
    if quantize_bf16:
        q = lambda a: a.astype(jnp.bfloat16).astype(jnp.float32)
    else:
        q = lambda a: a

    def conv(x, w, b, s):
        y = jax.lax.conv_general_dilated(
            q(x), q(w), window_strides=(s, s), padding="VALID",
            dimension_numbers=("NCHW", "OIHW", "NCHW"))
        return jax.nn.relu(y + b[None, :, None, None])

    x = conv(obs, params["conv1_w"], params["conv1_b"], 4)
    x = conv(x, params["conv2_w"], params["conv2_b"], 2)
    x = conv(x, params["conv3_w"], params["conv3_b"], 1)
    x = x.reshape(x.shape[0], -1)
    h = jax.nn.relu(q(x) @ q(params["fc1_w"]) + params["fc1_b"])
    return q(h) @ q(params["fc2_w"]) + params["fc2_b"]


if __name__ == "__main__":
    key = jax.random.PRNGKey(0)
    k_obs, k_par = jax.random.split(key)

    B, C, H = 2, 4, 36            # 36 -> 8 -> 3 -> 1 through the nature CNN
    N_ACTIONS = 6

    obs = jax.random.uniform(k_obs, (B, C, H, H), dtype=jnp.float32)
    params = init_params(k_par, C, H, N_ACTIONS)
    dims = _net_dims(C, H, N_ACTIONS)
    tpu_params = prepare_tpu_params(params, dims)

    fwd = jax.jit(functools.partial(qnetwork_forward, d=dims))
    q_out = jax.block_until_ready(fwd(tpu_params, obs))
    assert q_out.shape == (B, N_ACTIONS), q_out.shape

    # Tight check against the bf16-quantization-matched reference.
    q_ref_bf16 = _ref_forward(params, obs, quantize_bf16=True)
    assert jnp.allclose(q_out, q_ref_bf16, atol=5e-3, rtol=5e-3), float(
        jnp.max(jnp.abs(q_out - q_ref_bf16)))

    # Loose check against the full-f32 PyTorch-semantics reference.
    q_ref_f32 = _ref_forward(params, obs, quantize_bf16=False)
    assert jnp.allclose(q_out, q_ref_f32, atol=5e-2, rtol=5e-2), float(
        jnp.max(jnp.abs(q_out - q_ref_f32)))

    print("KERNEL_OK")
</pallas_src>

<mosaic_0001>
module attributes {stable_mosaic.version = 11 : i64} {
  func.func @_fused_qnet_kernel(%arg0: i32, %arg1: memref<2x9x576xbf16, #tpu.memory_space<vmem>>, %arg2: memref<2x576x256xbf16, #tpu.memory_space<vmem>>, %arg3: memref<1x256xf32, #tpu.memory_space<vmem>>, %arg4: memref<4x256x192xbf16, #tpu.memory_space<vmem>>, %arg5: memref<1x192xf32, #tpu.memory_space<vmem>>, %arg6: memref<3x192x64xbf16, #tpu.memory_space<vmem>>, %arg7: memref<1x64xf32, #tpu.memory_space<vmem>>, %arg8: memref<1x64x512xbf16, #tpu.memory_space<vmem>>, %arg9: memref<1x512xf32, #tpu.memory_space<vmem>>, %arg10: memref<512x128xbf16, #tpu.memory_space<vmem>>, %arg11: memref<1x128xf32, #tpu.memory_space<vmem>>, %arg12: memref<2x128xf32, #tpu.memory_space<vmem>>) attributes {dimension_semantics = [#tpu.dimension_semantics<parallel>], iteration_bounds = array<i64: 1>, scalar_prefetch = 0 : i64, scratch_operands = 0 : i64, tpu.core_type = #tpu.core_type<tc>, window_params = [{transform_indices = @transform_0, window_bounds = array<i64: 2, 9, 576>}, {pipeline_mode = #tpu.pipeline_mode<synchronous>, transform_indices = @transform_1, window_bounds = array<i64: 2, 576, 256>}, {pipeline_mode = #tpu.pipeline_mode<synchronous>, transform_indices = @transform_2, window_bounds = array<i64: 1, 256>}, {pipeline_mode = #tpu.pipeline_mode<synchronous>, transform_indices = @transform_3, window_bounds = array<i64: 4, 256, 192>}, {pipeline_mode = #tpu.pipeline_mode<synchronous>, transform_indices = @transform_4, window_bounds = array<i64: 1, 192>}, {pipeline_mode = #tpu.pipeline_mode<synchronous>, transform_indices = @transform_5, window_bounds = array<i64: 3, 192, 64>}, {pipeline_mode = #tpu.pipeline_mode<synchronous>, transform_indices = @transform_6, window_bounds = array<i64: 1, 64>}, {pipeline_mode = #tpu.pipeline_mode<synchronous>, transform_indices = @transform_7, window_bounds = array<i64: 1, 64, 512>}, {pipeline_mode = #tpu.pipeline_mode<synchronous>, transform_indices = @transform_8, window_bounds = array<i64: 1, 512>}, {pipeline_mode = #tpu.pipeline_mode<synchronous>, transform_indices = @transform_9, window_bounds = array<i64: 512, 128>}, {pipeline_mode = #tpu.pipeline_mode<synchronous>, transform_indices = @transform_10, window_bounds = array<i64: 1, 128>}, {transform_indices = @transform_11, window_bounds = array<i64: 2, 128>}]} {
    %cst = arith.constant 0.000000e+00 : f32
    %0 = vector.broadcast %cst : f32 to vector<16x256xf32>
    %c0 = arith.constant 0 : index
    %c0_0 = arith.constant 0 : index
    %c0_1 = arith.constant 0 : index
    %1 = vector.load %arg1[%c0, %c0_0, %c0_1] : memref<2x9x576xbf16, #tpu.memory_space<vmem>>, vector<2x8x576xbf16>
    %2 = vector.shape_cast %1 : vector<2x8x576xbf16> to vector<16x576xbf16>
    %c0_2 = arith.constant 0 : index
    %c0_3 = arith.constant 0 : index
    %c0_4 = arith.constant 0 : index
    %3 = vector.load %arg2[%c0_2, %c0_3, %c0_4] : memref<2x576x256xbf16, #tpu.memory_space<vmem>>, vector<1x576x256xbf16>
    %4 = vector.shape_cast %3 : vector<1x576x256xbf16> to vector<576x256xbf16>
    %cst_5 = arith.constant dense<0.000000e+00> : vector<16x256xf32>
    %5 = tpu.matmul %2, %4, %cst_5 {dimension_numbers = #tpu.dot_dimension_numbers<[1], [0], [0], [1], [0, 0, 1, 1], [], []>} : vector<16x576xbf16>, vector<576x256xbf16>, vector<16x256xf32> -> vector<16x256xf32>
    %6 = arith.addf %0, %5 : vector<16x256xf32>
    %c0_6 = arith.constant 0 : index
    %c1 = arith.constant 1 : index
    %c0_7 = arith.constant 0 : index
    %7 = vector.load %arg1[%c0_6, %c1, %c0_7] : memref<2x9x576xbf16, #tpu.memory_space<vmem>>, vector<2x8x576xbf16>
    %8 = vector.shape_cast %7 : vector<2x8x576xbf16> to vector<16x576xbf16>
    %c1_8 = arith.constant 1 : index
    %c0_9 = arith.constant 0 : index
    %c0_10 = arith.constant 0 : index
    %9 = vector.load %arg2[%c1_8, %c0_9, %c0_10] : memref<2x576x256xbf16, #tpu.memory_space<vmem>>, vector<1x576x256xbf16>
    %10 = vector.shape_cast %9 : vector<1x576x256xbf16> to vector<576x256xbf16>
    %cst_11 = arith.constant dense<0.000000e+00> : vector<16x256xf32>
    %11 = tpu.matmul %8, %10, %cst_11 {dimension_numbers = #tpu.dot_dimension_numbers<[1], [0], [0], [1], [0, 0, 1, 1], [], []>} : vector<16x576xbf16>, vector<576x256xbf16>, vector<16x256xf32> -> vector<16x256xf32>
    %12 = arith.addf %6, %11 : vector<16x256xf32>
    %c0_12 = arith.constant 0 : index
    %c0_13 = arith.constant 0 : index
    %13 = vector.load %arg3[%c0_12, %c0_13] : memref<1x256xf32, #tpu.memory_space<vmem>>, vector<1x256xf32>
    %14 = vector.broadcast %13 : vector<1x256xf32> to vector<16x256xf32>
    %15 = arith.addf %12, %14 : vector<16x256xf32>
    %cst_14 = arith.constant 0.000000e+00 : f32
    %16 = vector.broadcast %cst_14 : f32 to vector<16x256xf32>
    %17 = arith.maximumf %15, %16 : vector<16x256xf32>
    %18 = arith.truncf %17 : vector<16x256xf32> to vector<16x256xbf16>
    %19 = vector.shape_cast %18 : vector<16x256xbf16> to vector<2x8x256xbf16>
    %20 = vector.extract_strided_slice %19 {offsets = [0, 0, 0], sizes = [2, 1, 256], strides = [1, 1, 1]} : vector<2x8x256xbf16> to vector<2x1x256xbf16>
    %21 = vector.shape_cast %20 : vector<2x1x256xbf16> to vector<2x256xbf16>
    %22 = vector.extract_strided_slice %19 {offsets = [0, 1, 0], sizes = [2, 1, 256], strides = [1, 1, 1]} : vector<2x8x256xbf16> to vector<2x1x256xbf16>
    %23 = vector.shape_cast %22 : vector<2x1x256xbf16> to vector<2x256xbf16>
    %24 = vector.extract_strided_slice %19 {offsets = [0, 2, 0], sizes = [2, 1, 256], strides = [1, 1, 1]} : vector<2x8x256xbf16> to vector<2x1x256xbf16>
    %25 = vector.shape_cast %24 : vector<2x1x256xbf16> to vector<2x256xbf16>
    %26 = vector.extract_strided_slice %19 {offsets = [0, 3, 0], sizes = [2, 1, 256], strides = [1, 1, 1]} : vector<2x8x256xbf16> to vector<2x1x256xbf16>
    %27 = vector.shape_cast %26 : vector<2x1x256xbf16> to vector<2x256xbf16>
    %28 = vector.extract_strided_slice %19 {offsets = [0, 4, 0], sizes = [2, 1, 256], strides = [1, 1, 1]} : vector<2x8x256xbf16> to vector<2x1x256xbf16>
    %29 = vector.shape_cast %28 : vector<2x1x256xbf16> to vector<2x256xbf16>
    %30 = vector.extract_strided_slice %19 {offsets = [0, 5, 0], sizes = [2, 1, 256], strides = [1, 1, 1]} : vector<2x8x256xbf16> to vector<2x1x256xbf16>
    %31 = vector.shape_cast %30 : vector<2x1x256xbf16> to vector<2x256xbf16>
    %32 = vector.extract_strided_slice %19 {offsets = [0, 6, 0], sizes = [2, 1, 256], strides = [1, 1, 1]} : vector<2x8x256xbf16> to vector<2x1x256xbf16>
    %33 = vector.shape_cast %32 : vector<2x1x256xbf16> to vector<2x256xbf16>
    %34 = vector.extract_strided_slice %19 {offsets = [0, 7, 0], sizes = [2, 1, 256], strides = [1, 1, 1]} : vector<2x8x256xbf16> to vector<2x1x256xbf16>
    %35 = vector.shape_cast %34 : vector<2x1x256xbf16> to vector<2x256xbf16>
    %cst_15 = arith.constant 0.000000e+00 : f32
    %36 = vector.broadcast %cst_15 : f32 to vector<2x192xf32>
    %c0_16 = arith.constant 0 : index
    %c0_17 = arith.constant 0 : index
    %c0_18 = arith.constant 0 : index
    %37 = vector.load %arg4[%c0_16, %c0_17, %c0_18] : memref<4x256x192xbf16, #tpu.memory_space<vmem>>, vector<1x256x192xbf16>
    %38 = vector.shape_cast %37 : vector<1x256x192xbf16> to vector<256x192xbf16>
    %cst_19 = arith.constant dense<0.000000e+00> : vector<2x192xf32>
    %39 = tpu.matmul %21, %38, %cst_19 {dimension_numbers = #tpu.dot_dimension_numbers<[1], [0], [0], [1], [0, 0, 1, 1], [], []>} : vector<2x256xbf16>, vector<256x192xbf16>, vector<2x192xf32> -> vector<2x192xf32>
    %40 = arith.addf %36, %39 : vector<2x192xf32>
    %c1_20 = arith.constant 1 : index
    %c0_21 = arith.constant 0 : index
    %c0_22 = arith.constant 0 : index
    %41 = vector.load %arg4[%c1_20, %c0_21, %c0_22] : memref<4x256x192xbf16, #tpu.memory_space<vmem>>, vector<1x256x192xbf16>
    %42 = vector.shape_cast %41 : vector<1x256x192xbf16> to vector<256x192xbf16>
    %cst_23 = arith.constant dense<0.000000e+00> : vector<2x192xf32>
    %43 = tpu.matmul %23, %42, %cst_23 {dimension_numbers = #tpu.dot_dimension_numbers<[1], [0], [0], [1], [0, 0, 1, 1], [], []>} : vector<2x256xbf16>, vector<256x192xbf16>, vector<2x192xf32> -> vector<2x192xf32>
    %44 = arith.addf %40, %43 : vector<2x192xf32>
    %c2 = arith.constant 2 : index
    %c0_24 = arith.constant 0 : index
    %c0_25 = arith.constant 0 : index
    %45 = vector.load %arg4[%c2, %c0_24, %c0_25] : memref<4x256x192xbf16, #tpu.memory_space<vmem>>, vector<1x256x192xbf16>
    %46 = vector.shape_cast %45 : vector<1x256x192xbf16> to vector<256x192xbf16>
    %cst_26 = arith.constant dense<0.000000e+00> : vector<2x192xf32>
    %47 = tpu.matmul %25, %46, %cst_26 {dimension_numbers = #tpu.dot_dimension_numbers<[1], [0], [0], [1], [0, 0, 1, 1], [], []>} : vector<2x256xbf16>, vector<256x192xbf16>, vector<2x192xf32> -> vector<2x192xf32>
    %48 = arith.addf %44, %47 : vector<2x192xf32>
    %c3 = arith.constant 3 : index
    %c0_27 = arith.constant 0 : index
    %c0_28 = arith.constant 0 : index
    %49 = vector.load %arg4[%c3, %c0_27, %c0_28] : memref<4x256x192xbf16, #tpu.memory_space<vmem>>, vector<1x256x192xbf16>
    %50 = vector.shape_cast %49 : vector<1x256x192xbf16> to vector<256x192xbf16>
    %cst_29 = arith.constant dense<0.000000e+00> : vector<2x192xf32>
    %51 = tpu.matmul %27, %50, %cst_29 {dimension_numbers = #tpu.dot_dimension_numbers<[1], [0], [0], [1], [0, 0, 1, 1], [], []>} : vector<2x256xbf16>, vector<256x192xbf16>, vector<2x192xf32> -> vector<2x192xf32>
    %52 = arith.addf %48, %51 : vector<2x192xf32>
    %c0_30 = arith.constant 0 : index
    %c0_31 = arith.constant 0 : index
    %53 = vector.load %arg5[%c0_30, %c0_31] : memref<1x192xf32, #tpu.memory_space<vmem>>, vector<1x192xf32>
    %54 = vector.broadcast %53 : vector<1x192xf32> to vector<2x192xf32>
    %55 = arith.addf %52, %54 : vector<2x192xf32>
    %cst_32 = arith.constant 0.000000e+00 : f32
    %56 = vector.broadcast %cst_32 : f32 to vector<2x192xf32>
    %57 = arith.maximumf %55, %56 : vector<2x192xf32>
    %58 = arith.truncf %57 : vector<2x192xf32> to vector<2x192xbf16>
    %cst_33 = arith.constant 0.000000e+00 : f32
    %59 = vector.broadcast %cst_33 : f32 to vector<2x192xf32>
    %c0_34 = arith.constant 0 : index
    %c0_35 = arith.constant 0 : index
    %c0_36 = arith.constant 0 : index
    %60 = vector.load %arg4[%c0_34, %c0_35, %c0_36] : memref<4x256x192xbf16, #tpu.memory_space<vmem>>, vector<1x256x192xbf16>
    %61 = vector.shape_cast %60 : vector<1x256x192xbf16> to vector<256x192xbf16>
    %cst_37 = arith.constant dense<0.000000e+00> : vector<2x192xf32>
    %62 = tpu.matmul %25, %61, %cst_37 {dimension_numbers = #tpu.dot_dimension_numbers<[1], [0], [0], [1], [0, 0, 1, 1], [], []>} : vector<2x256xbf16>, vector<256x192xbf16>, vector<2x192xf32> -> vector<2x192xf32>
    %63 = arith.addf %59, %62 : vector<2x192xf32>
    %c1_38 = arith.constant 1 : index
    %c0_39 = arith.constant 0 : index
    %c0_40 = arith.constant 0 : index
    %64 = vector.load %arg4[%c1_38, %c0_39, %c0_40] : memref<4x256x192xbf16, #tpu.memory_space<vmem>>, vector<1x256x192xbf16>
    %65 = vector.shape_cast %64 : vector<1x256x192xbf16> to vector<256x192xbf16>
    %cst_41 = arith.constant dense<0.000000e+00> : vector<2x192xf32>
    %66 = tpu.matmul %27, %65, %cst_41 {dimension_numbers = #tpu.dot_dimension_numbers<[1], [0], [0], [1], [0, 0, 1, 1], [], []>} : vector<2x256xbf16>, vector<256x192xbf16>, vector<2x192xf32> -> vector<2x192xf32>
    %67 = arith.addf %63, %66 : vector<2x192xf32>
    %c2_42 = arith.constant 2 : index
    %c0_43 = arith.constant 0 : index
    %c0_44 = arith.constant 0 : index
    %68 = vector.load %arg4[%c2_42, %c0_43, %c0_44] : memref<4x256x192xbf16, #tpu.memory_space<vmem>>, vector<1x256x192xbf16>
    %69 = vector.shape_cast %68 : vector<1x256x192xbf16> to vector<256x192xbf16>
    %cst_45 = arith.constant dense<0.000000e+00> : vector<2x192xf32>
    %70 = tpu.matmul %29, %69, %cst_45 {dimension_numbers = #tpu.dot_dimension_numbers<[1], [0], [0], [1], [0, 0, 1, 1], [], []>} : vector<2x256xbf16>, vector<256x192xbf16>, vector<2x192xf32> -> vector<2x192xf32>
    %71 = arith.addf %67, %70 : vector<2x192xf32>
    %c3_46 = arith.constant 3 : index
    %c0_47 = arith.constant 0 : index
    %c0_48 = arith.constant 0 : index
    %72 = vector.load %arg4[%c3_46, %c0_47, %c0_48] : memref<4x256x192xbf16, #tpu.memory_space<vmem>>, vector<1x256x192xbf16>
    %73 = vector.shape_cast %72 : vector<1x256x192xbf16> to vector<256x192xbf16>
    %cst_49 = arith.constant dense<0.000000e+00> : vector<2x192xf32>
    %74 = tpu.matmul %31, %73, %cst_49 {dimension_numbers = #tpu.dot_dimension_numbers<[1], [0], [0], [1], [0, 0, 1, 1], [], []>} : vector<2x256xbf16>, vector<256x192xbf16>, vector<2x192xf32> -> vector<2x192xf32>
    %75 = arith.addf %71, %74 : vector<2x192xf32>
    %c0_50 = arith.constant 0 : index
    %c0_51 = arith.constant 0 : index
    %76 = vector.load %arg5[%c0_50, %c0_51] : memref<1x192xf32, #tpu.memory_space<vmem>>, vector<1x192xf32>
    %77 = vector.broadcast %76 : vector<1x192xf32> to vector<2x192xf32>
    %78 = arith.addf %75, %77 : vector<2x192xf32>
    %cst_52 = arith.constant 0.000000e+00 : f32
    %79 = vector.broadcast %cst_52 : f32 to vector<2x192xf32>
    %80 = arith.maximumf %78, %79 : vector<2x192xf32>
    %81 = arith.truncf %80 : vector<2x192xf32> to vector<2x192xbf16>
    %cst_53 = arith.constant 0.000000e+00 : f32
    %82 = vector.broadcast %cst_53 : f32 to vector<2x192xf32>
    %c0_54 = arith.constant 0 : index
    %c0_55 = arith.constant 0 : index
    %c0_56 = arith.constant 0 : index
    %83 = vector.load %arg4[%c0_54, %c0_55, %c0_56] : memref<4x256x192xbf16, #tpu.memory_space<vmem>>, vector<1x256x192xbf16>
    %84 = vector.shape_cast %83 : vector<1x256x192xbf16> to vector<256x192xbf16>
    %cst_57 = arith.constant dense<0.000000e+00> : vector<2x192xf32>
    %85 = tpu.matmul %29, %84, %cst_57 {dimension_numbers = #tpu.dot_dimension_numbers<[1], [0], [0], [1], [0, 0, 1, 1], [], []>} : vector<2x256xbf16>, vector<256x192xbf16>, vector<2x192xf32> -> vector<2x192xf32>
    %86 = arith.addf %82, %85 : vector<2x192xf32>
    %c1_58 = arith.constant 1 : index
    %c0_59 = arith.constant 0 : index
    %c0_60 = arith.constant 0 : index
    %87 = vector.load %arg4[%c1_58, %c0_59, %c0_60] : memref<4x256x192xbf16, #tpu.memory_space<vmem>>, vector<1x256x192xbf16>
    %88 = vector.shape_cast %87 : vector<1x256x192xbf16> to vector<256x192xbf16>
    %cst_61 = arith.constant dense<0.000000e+00> : vector<2x192xf32>
    %89 = tpu.matmul %31, %88, %cst_61 {dimension_numbers = #tpu.dot_dimension_numbers<[1], [0], [0], [1], [0, 0, 1, 1], [], []>} : vector<2x256xbf16>, vector<256x192xbf16>, vector<2x192xf32> -> vector<2x192xf32>
    %90 = arith.addf %86, %89 : vector<2x192xf32>
    %c2_62 = arith.constant 2 : index
    %c0_63 = arith.constant 0 : index
    %c0_64 = arith.constant 0 : index
    %91 = vector.load %arg4[%c2_62, %c0_63, %c0_64] : memref<4x256x192xbf16, #tpu.memory_space<vmem>>, vector<1x256x192xbf16>
    %92 = vector.shape_cast %91 : vector<1x256x192xbf16> to vector<256x192xbf16>
    %cst_65 = arith.constant dense<0.000000e+00> : vector<2x192xf32>
    %93 = tpu.matmul %33, %92, %cst_65 {dimension_numbers = #tpu.dot_dimension_numbers<[1], [0], [0], [1], [0, 0, 1, 1], [], []>} : vector<2x256xbf16>, vector<256x192xbf16>, vector<2x192xf32> -> vector<2x192xf32>
    %94 = arith.addf %90, %93 : vector<2x192xf32>
    %c3_66 = arith.constant 3 : index
    %c0_67 = arith.constant 0 : index
    %c0_68 = arith.constant 0 : index
    %95 = vector.load %arg4[%c3_66, %c0_67, %c0_68] : memref<4x256x192xbf16, #tpu.memory_space<vmem>>, vector<1x256x192xbf16>
    %96 = vector.shape_cast %95 : vector<1x256x192xbf16> to vector<256x192xbf16>
    %cst_69 = arith.constant dense<0.000000e+00> : vector<2x192xf32>
    %97 = tpu.matmul %35, %96, %cst_69 {dimension_numbers = #tpu.dot_dimension_numbers<[1], [0], [0], [1], [0, 0, 1, 1], [], []>} : vector<2x256xbf16>, vector<256x192xbf16>, vector<2x192xf32> -> vector<2x192xf32>
    %98 = arith.addf %94, %97 : vector<2x192xf32>
    %c0_70 = arith.constant 0 : index
    %c0_71 = arith.constant 0 : index
    %99 = vector.load %arg5[%c0_70, %c0_71] : memref<1x192xf32, #tpu.memory_space<vmem>>, vector<1x192xf32>
    %100 = vector.broadcast %99 : vector<1x192xf32> to vector<2x192xf32>
    %101 = arith.addf %98, %100 : vector<2x192xf32>
    %cst_72 = arith.constant 0.000000e+00 : f32
    %102 = vector.broadcast %cst_72 : f32 to vector<2x192xf32>
    %103 = arith.maximumf %101, %102 : vector<2x192xf32>
    %104 = arith.truncf %103 : vector<2x192xf32> to vector<2x192xbf16>
    %cst_73 = arith.constant 0.000000e+00 : f32
    %105 = vector.broadcast %cst_73 : f32 to vector<2x64xf32>
    %c0_74 = arith.constant 0 : index
    %c0_75 = arith.constant 0 : index
    %c0_76 = arith.constant 0 : index
    %106 = vector.load %arg6[%c0_74, %c0_75, %c0_76] : memref<3x192x64xbf16, #tpu.memory_space<vmem>>, vector<1x192x64xbf16>
    %107 = vector.shape_cast %106 : vector<1x192x64xbf16> to vector<192x64xbf16>
    %cst_77 = arith.constant dense<0.000000e+00> : vector<2x64xf32>
    %108 = tpu.matmul %58, %107, %cst_77 {dimension_numbers = #tpu.dot_dimension_numbers<[1], [0], [0], [1], [0, 0, 1, 1], [], []>} : vector<2x192xbf16>, vector<192x64xbf16>, vector<2x64xf32> -> vector<2x64xf32>
    %109 = arith.addf %105, %108 : vector<2x64xf32>
    %c1_78 = arith.constant 1 : index
    %c0_79 = arith.constant 0 : index
    %c0_80 = arith.constant 0 : index
    %110 = vector.load %arg6[%c1_78, %c0_79, %c0_80] : memref<3x192x64xbf16, #tpu.memory_space<vmem>>, vector<1x192x64xbf16>
    %111 = vector.shape_cast %110 : vector<1x192x64xbf16> to vector<192x64xbf16>
    %cst_81 = arith.constant dense<0.000000e+00> : vector<2x64xf32>
    %112 = tpu.matmul %81, %111, %cst_81 {dimension_numbers = #tpu.dot_dimension_numbers<[1], [0], [0], [1], [0, 0, 1, 1], [], []>} : vector<2x192xbf16>, vector<192x64xbf16>, vector<2x64xf32> -> vector<2x64xf32>
    %113 = arith.addf %109, %112 : vector<2x64xf32>
    %c2_82 = arith.constant 2 : index
    %c0_83 = arith.constant 0 : index
    %c0_84 = arith.constant 0 : index
    %114 = vector.load %arg6[%c2_82, %c0_83, %c0_84] : memref<3x192x64xbf16, #tpu.memory_space<vmem>>, vector<1x192x64xbf16>
    %115 = vector.shape_cast %114 : vector<1x192x64xbf16> to vector<192x64xbf16>
    %cst_85 = arith.constant dense<0.000000e+00> : vector<2x64xf32>
    %116 = tpu.matmul %104, %115, %cst_85 {dimension_numbers = #tpu.dot_dimension_numbers<[1], [0], [0], [1], [0, 0, 1, 1], [], []>} : vector<2x192xbf16>, vector<192x64xbf16>, vector<2x64xf32> -> vector<2x64xf32>
    %117 = arith.addf %113, %116 : vector<2x64xf32>
    %c0_86 = arith.constant 0 : index
    %c0_87 = arith.constant 0 : index
    %118 = vector.load %arg7[%c0_86, %c0_87] : memref<1x64xf32, #tpu.memory_space<vmem>>, vector<1x64xf32>
    %119 = vector.broadcast %118 : vector<1x64xf32> to vector<2x64xf32>
    %120 = arith.addf %117, %119 : vector<2x64xf32>
    %cst_88 = arith.constant 0.000000e+00 : f32
    %121 = vector.broadcast %cst_88 : f32 to vector<2x64xf32>
    %122 = arith.maximumf %120, %121 : vector<2x64xf32>
    %123 = arith.truncf %122 : vector<2x64xf32> to vector<2x64xbf16>
    %cst_89 = arith.constant 0.000000e+00 : f32
    %124 = vector.broadcast %cst_89 : f32 to vector<2x512xf32>
    %c0_90 = arith.constant 0 : index
    %c0_91 = arith.constant 0 : index
    %c0_92 = arith.constant 0 : index
    %125 = vector.load %arg8[%c0_90, %c0_91, %c0_92] : memref<1x64x512xbf16, #tpu.memory_space<vmem>>, vector<1x64x512xbf16>
    %126 = vector.shape_cast %125 : vector<1x64x512xbf16> to vector<64x512xbf16>
    %cst_93 = arith.constant dense<0.000000e+00> : vector<2x512xf32>
    %127 = tpu.matmul %123, %126, %cst_93 {dimension_numbers = #tpu.dot_dimension_numbers<[1], [0], [0], [1], [0, 0, 1, 1], [], []>} : vector<2x64xbf16>, vector<64x512xbf16>, vector<2x512xf32> -> vector<2x512xf32>
    %128 = arith.addf %124, %127 : vector<2x512xf32>
    %c0_94 = arith.constant 0 : index
    %c0_95 = arith.constant 0 : index
    %129 = vector.load %arg9[%c0_94, %c0_95] : memref<1x512xf32, #tpu.memory_space<vmem>>, vector<1x512xf32>
    %130 = vector.broadcast %129 : vector<1x512xf32> to vector<2x512xf32>
    %131 = arith.addf %128, %130 : vector<2x512xf32>
    %cst_96 = arith.constant 0.000000e+00 : f32
    %132 = vector.broadcast %cst_96 : f32 to vector<2x512xf32>
    %133 = arith.maximumf %131, %132 : vector<2x512xf32>
    %134 = arith.truncf %133 : vector<2x512xf32> to vector<2x512xbf16>
    %c0_97 = arith.constant 0 : index
    %c0_98 = arith.constant 0 : index
    %135 = vector.load %arg10[%c0_97, %c0_98] : memref<512x128xbf16, #tpu.memory_space<vmem>>, vector<512x128xbf16>
    %cst_99 = arith.constant dense<0.000000e+00> : vector<2x128xf32>
    %136 = tpu.matmul %134, %135, %cst_99 {dimension_numbers = #tpu.dot_dimension_numbers<[1], [0], [0], [1], [0, 0, 1, 1], [], []>} : vector<2x512xbf16>, vector<512x128xbf16>, vector<2x128xf32> -> vector<2x128xf32>
    %c0_100 = arith.constant 0 : index
    %c0_101 = arith.constant 0 : index
    %137 = vector.load %arg11[%c0_100, %c0_101] : memref<1x128xf32, #tpu.memory_space<vmem>>, vector<1x128xf32>
    %138 = vector.broadcast %137 : vector<1x128xf32> to vector<2x128xf32>
    %139 = arith.addf %136, %138 : vector<2x128xf32>
    %c0_102 = arith.constant 0 : index
    %c0_103 = arith.constant 0 : index
    %140 = vector.load %arg12[%c0_102, %c0_103] : memref<2x128xf32, #tpu.memory_space<vmem>>, vector<2x128xf32>
    tpu.vector_store %arg12[%c0_102, %c0_103], %139 {strides = array<i32>} : memref<2x128xf32, #tpu.memory_space<vmem>>, vector<2x128xf32>,
    return
  }
  func.func @transform_0(%arg0: i32) -> (i32, i32, i32) {
    %c0_i32 = arith.constant 0 : i32
    %c0_i32_0 = arith.constant 0 : i32
    %c0_i32_1 = arith.constant 0 : i32
    return %arg0, %c0_i32, %c0_i32_0 : i32, i32, i32
  }
  func.func @transform_1(%arg0: i32) -> (i32, i32, i32) {
    %c0_i32 = arith.constant 0 : i32
    %c0_i32_0 = arith.constant 0 : i32
    %c0_i32_1 = arith.constant 0 : i32
    %c0_i32_2 = arith.constant 0 : i32
    return %c0_i32, %c0_i32_0, %c0_i32_1 : i32, i32, i32
  }
  func.func @transform_2(%arg0: i32) -> (i32, i32) {
    %c0_i32 = arith.constant 0 : i32
    %c0_i32_0 = arith.constant 0 : i32
    %c0_i32_1 = arith.constant 0 : i32
    return %c0_i32, %c0_i32_0 : i32, i32
  }
  func.func @transform_3(%arg0: i32) -> (i32, i32, i32) {
    %c0_i32 = arith.constant 0 : i32
    %c0_i32_0 = arith.constant 0 : i32
    %c0_i32_1 = arith.constant 0 : i32
    %c0_i32_2 = arith.constant 0 : i32
    return %c0_i32, %c0_i32_0, %c0_i32_1 : i32, i32, i32
  }
  func.func @transform_4(%arg0: i32) -> (i32, i32) {
    %c0_i32 = arith.constant 0 : i32
    %c0_i32_0 = arith.constant 0 : i32
    %c0_i32_1 = arith.constant 0 : i32
    return %c0_i32, %c0_i32_0 : i32, i32
  }
  func.func @transform_5(%arg0: i32) -> (i32, i32, i32) {
    %c0_i32 = arith.constant 0 : i32
    %c0_i32_0 = arith.constant 0 : i32
    %c0_i32_1 = arith.constant 0 : i32
    %c0_i32_2 = arith.constant 0 : i32
    return %c0_i32, %c0_i32_0, %c0_i32_1 : i32, i32, i32
  }
  func.func @transform_6(%arg0: i32) -> (i32, i32) {
    %c0_i32 = arith.constant 0 : i32
    %c0_i32_0 = arith.constant 0 : i32
    %c0_i32_1 = arith.constant 0 : i32
    return %c0_i32, %c0_i32_0 : i32, i32
  }
  func.func @transform_7(%arg0: i32) -> (i32, i32, i32) {
    %c0_i32 = arith.constant 0 : i32
    %c0_i32_0 = arith.constant 0 : i32
    %c0_i32_1 = arith.constant 0 : i32
    %c0_i32_2 = arith.constant 0 : i32
    return %c0_i32, %c0_i32_0, %c0_i32_1 : i32, i32, i32
  }
  func.func @transform_8(%arg0: i32) -> (i32, i32) {
    %c0_i32 = arith.constant 0 : i32
    %c0_i32_0 = arith.constant 0 : i32
    %c0_i32_1 = arith.constant 0 : i32
    return %c0_i32, %c0_i32_0 : i32, i32
  }
  func.func @transform_9(%arg0: i32) -> (i32, i32) {
    %c0_i32 = arith.constant 0 : i32
    %c0_i32_0 = arith.constant 0 : i32
    %c0_i32_1 = arith.constant 0 : i32
    return %c0_i32, %c0_i32_0 : i32, i32
  }
  func.func @transform_10(%arg0: i32) -> (i32, i32) {
    %c0_i32 = arith.constant 0 : i32
    %c0_i32_0 = arith.constant 0 : i32
    %c0_i32_1 = arith.constant 0 : i32
    return %c0_i32, %c0_i32_0 : i32, i32
  }
  func.func @transform_11(%arg0: i32) -> (i32, i32) {
    %c0_i32 = arith.constant 0 : i32
    %c0_i32_0 = arith.constant 0 : i32
    return %arg0, %c0_i32 : i32, i32
  }
}

</mosaic_0001>

<bundles_post_ra>
// kernel: qnetwork_forward.1
= control target key start
LH: loop header
LB: loop body
LE: loop exit
PB: predicated region body
PF: predicated region fallthrough
CT: control target
= control target key end

     0   :  { %vm124_vm0 = vsmask.f32 3328  ;;  %vm125_vm1 = vsmask.f32 7440  ;;  %vm663_vm3 = vcmask 523264   ;;  %s7129_s0 = inlined_call_operand.vmem [shape: bf16[2,9,576], index: 0, kind: input, shape index: {}]   ;;  %s7130_s1 = inlined_call_operand.vmem [shape: bf16[2,576,256], index: 1, kind: input, shape index: {}]   ;;  %s7131_s2 = inlined_call_operand.vmem [shape: f32[1,256], index: 2, kind: input, shape index: {}]   ;;  %s7132_s3 = inlined_call_operand.vmem [shape: bf16[4,256,192], index: 3, kind: input, shape index: {}]   ;;  %s7133_s4 = inlined_call_operand.vmem [shape: f32[1,192], index: 4, kind: input, shape index: {}]   ;;  %s7134_s5 = inlined_call_operand.vmem [shape: bf16[3,192,64], index: 5, kind: input, shape index: {}]   ;;  %s7135_s6 = inlined_call_operand.vmem [shape: f32[1,64], index: 6, kind: input, shape index: {}]   ;;  %s7136_s7 = inlined_call_operand.vmem [shape: bf16[1,64,512], index: 7, kind: input, shape index: {}]   ;;  %s7137_s8 = inlined_call_operand.vmem [shape: f32[1,512], index: 8, kind: input, shape index: {}]   ;;  %s7138_s9 = inlined_call_operand.vmem [shape: bf16[512,128], index: 9, kind: input, shape index: {}]   ;;  %s7139_s10 = inlined_call_operand.vmem [shape: f32[1,128], index: 10, kind: input, shape index: {}]   ;;  %s7140_s11 = inlined_call_operand.hbm [shape: f32[2,128], index: 11, kind: output, shape index: {}]  }
   0x1   :  { %v4375_v0 = vld [vmem:[%s7130_s1 + $0x2b4] ss:$8 sps:$4 sm:$0xff]   ;;  %v4379_v2 = vld [vmem:[%s7130_s1 + $0x2b0] ss:$8 sps:$4 sm:$0xff]   ;;  %v4381_v4 = vld [vmem:[%s7130_s1 + $0x2a4] ss:$8 sps:$4 sm:$0xff]  }
   0x2   :  { %v4377_v1 = vld [vmem:[%s7130_s1 + $0x3b4] ss:$8 sps:$4 sm:$0xff]   ;;  %667 = vmatprep.subr.bf16.mxu0 %v4375_v0  ;;  %v4380_v3 = vld [vmem:[%s7130_s1 + $0x3b0] ss:$8 sps:$4 sm:$0xff]   ;;  %v4383_v5 = vld [vmem:[%s7130_s1 + $0x3a4] ss:$8 sps:$4 sm:$0xff]  }
   0x3   :  { %710 = vmatprep.subr.bf16.mxu1 %v4377_v1  ;;  %668 = vmatpush1.bf16.msra.mxu0 %v4379_v2  ;;  %v4385_v6 = vld [vmem:[%s7130_s1 + $0x2a0] ss:$8 sps:$4 sm:$0xff]   ;;  %v4387_v8 = vld [vmem:[%s7130_s1 + $0x294] ss:$8 sps:$4 sm:$0xff]   ;;  %v4391_v10 = vld [vmem:[%s7130_s1 + $0x290] ss:$8 sps:$4 sm:$0xff]  }
   0x4   :  { %711 = vmatpush1.bf16.msra.mxu1 %v4380_v3  ;;  %669 = vmatprep.subr.bf16.mxu0 %v4381_v4  ;;  %v4386_v7 = vld [vmem:[%s7130_s1 + $0x3a0] ss:$8 sps:$4 sm:$0xff]   ;;  %v4389_v9 = vld [vmem:[%s7130_s1 + $0x394] ss:$8 sps:$4 sm:$0xff]   ;;  %v4392_v11 = vld [vmem:[%s7130_s1 + $0x390] ss:$8 sps:$4 sm:$0xff]  }
   0x5   :  { %712 = vmatprep.subr.bf16.mxu1 %v4383_v5  ;;  %v4393_v12 = vld [vmem:[%s7130_s1 + $0x284] ss:$8 sps:$4 sm:$0xff]   ;;  %v4397_v14 = vld [vmem:[%s7130_s1 + $0x280] ss:$8 sps:$4 sm:$0xff]   ;;  %v4399_v16 = vld [vmem:[%s7130_s1 + $0x274] ss:$8 sps:$4 sm:$0xff]  }
   0x6   :  { %v4395_v13 = vld [vmem:[%s7130_s1 + $0x384] ss:$8 sps:$4 sm:$0xff]   ;;  %v4398_v15 = vld [vmem:[%s7130_s1 + $0x380] ss:$8 sps:$4 sm:$0xff]   ;;  %v4401_v17 = vld [vmem:[%s7130_s1 + $0x374] ss:$8 sps:$4 sm:$0xff]  }
   0x7   :  { %670 = vmatpush1.bf16.msra.mxu0 %v4385_v6  ;;  %v4403_v18 = vld [vmem:[%s7130_s1 + $0x270] ss:$8 sps:$4 sm:$0xff]   ;;  %v4405_v20 = vld [vmem:[%s7130_s1 + $0x264] ss:$8 sps:$4 sm:$0xff]   ;;  %v4409_v22 = vld [vmem:[%s7130_s1 + $0x260] ss:$8 sps:$4 sm:$0xff]  }
   0x8   :  { %713 = vmatpush1.bf16.msra.mxu1 %v4386_v7  ;;  %671 = vmatprep.subr.bf16.mxu0 %v4387_v8  ;;  %v4404_v19 = vld [vmem:[%s7130_s1 + $0x370] ss:$8 sps:$4 sm:$0xff]   ;;  %v4407_v21 = vld [vmem:[%s7130_s1 + $0x364] ss:$8 sps:$4 sm:$0xff]   ;;  %v4410_v23 = vld [vmem:[%s7130_s1 + $0x360] ss:$8 sps:$4 sm:$0xff]  }
   0x9   :  { %714 = vmatprep.subr.bf16.mxu1 %v4389_v9  ;;  %v4411_v24 = vld [vmem:[%s7130_s1 + $0x254] ss:$8 sps:$4 sm:$0xff]   ;;  %v4415_v26 = vld [vmem:[%s7130_s1 + $0x250] ss:$8 sps:$4 sm:$0xff]   ;;  %v4417_v28 = vld [vmem:[%s7130_s1 + $0x244] ss:$8 sps:$4 sm:$0xff]  }
   0xa   :  { %v4413_v25 = vld [vmem:[%s7130_s1 + $0x354] ss:$8 sps:$4 sm:$0xff]   ;;  %v4416_v27 = vld [vmem:[%s7130_s1 + $0x350] ss:$8 sps:$4 sm:$0xff]   ;;  %v4419_v29 = vld [vmem:[%s7130_s1 + $0x344] ss:$8 sps:$4 sm:$0xff]  }
   0xb   :  { %672 = vmatpush1.bf16.msra.mxu0 %v4391_v10  ;;  %v4421_v30 = vld [vmem:[%s7130_s1 + $0x240] ss:$8 sps:$4 sm:$0xff]   ;;  %v4423_v32 = vld [vmem:[%s7130_s1 + $0x334] ss:$8 sps:$4 sm:$0xff]   ;;  %v4427_v34 = vld [vmem:[%s7130_s1 + $0x330] ss:$8 sps:$4 sm:$0xff]  }
   0xc   :  { %715 = vmatpush1.bf16.msra.mxu1 %v4392_v11  ;;  %673 = vmatprep.subr.bf16.mxu0 %v4393_v12  ;;  %v4422_v31 = vld [vmem:[%s7130_s1 + $0x340] ss:$8 sps:$4 sm:$0xff]   ;;  %v4425_v33 = vld [vmem:[%s7130_s1 + $0x434] ss:$8 sps:$4 sm:$0xff]   ;;  %v4428_v35 = vld [vmem:[%s7130_s1 + $0x430] ss:$8 sps:$4 sm:$0xff]  }
   0xd   :  { %716 = vmatprep.subr.bf16.mxu1 %v4395_v13  ;;  %v4429_v36 = vld [vmem:[%s7130_s1 + $0x324] ss:$8 sps:$4 sm:$0xff]   ;;  %v4433_v38 = vld [vmem:[%s7130_s1 + $0x320] ss:$8 sps:$4 sm:$0xff]   ;;  %v4435_v40 = vld [vmem:[%s7130_s1 + $0x314] ss:$8 sps:$4 sm:$0xff]  }
   0xe   :  { %v4431_v37 = vld [vmem:[%s7130_s1 + $0x424] ss:$8 sps:$4 sm:$0xff]   ;;  %v4434_v39 = vld [vmem:[%s7130_s1 + $0x420] ss:$8 sps:$4 sm:$0xff]   ;;  %v4437_v41 = vld [vmem:[%s7130_s1 + $0x414] ss:$8 sps:$4 sm:$0xff]  }
   0xf   :  { %674 = vmatpush1.bf16.msra.mxu0 %v4397_v14  ;;  %v4439_v42 = vld [vmem:[%s7130_s1 + $0x310] ss:$8 sps:$4 sm:$0xff]   ;;  %v4441_v44 = vld [vmem:[%s7130_s1 + $0x304] ss:$8 sps:$4 sm:$0xff]   ;;  %v4445_v46 = vld [vmem:[%s7130_s1 + $0x300] ss:$8 sps:$4 sm:$0xff]  }
  0x10   :  { %717 = vmatpush1.bf16.msra.mxu1 %v4398_v15  ;;  %675 = vmatprep.subr.bf16.mxu0 %v4399_v16  ;;  %v4440_v43 = vld [vmem:[%s7130_s1 + $0x410] ss:$8 sps:$4 sm:$0xff]   ;;  %v4443_v45 = vld [vmem:[%s7130_s1 + $0x404] ss:$8 sps:$4 sm:$0xff]   ;;  %v4446_v47 = vld [vmem:[%s7130_s1 + $0x400] ss:$8 sps:$4 sm:$0xff]  }
  0x11   :  { %718 = vmatprep.subr.bf16.mxu1 %v4401_v17  ;;  %v5153_v48 = vld [vmem:[%s7129_s0] sm:$0xff]  ;;  %v4447_v49 = vld [vmem:[%s7130_s1 + $0x2f4] ss:$8 sps:$4 sm:$0xff]   ;;  %v5164_v51 = vld [vmem:[%s7129_s0 + $0x28] sm:$0xff] }
  0x12   :  { %v4449_v50 = vld [vmem:[%s7130_s1 + $0x3f4] ss:$8 sps:$4 sm:$0xff]   ;;  %v128_v54 = vshrl.u32 %v5153_v48, 16  ;;  %v131_v55 = vshll.u32 %v5153_v48, 16  ;;  %v170_v57 = vshrl.u32 %v5164_v51, 16  ;;  %v173_v58 = vshll.u32 %v5164_v51, 16  ;;  %vm5212_vm2 = vmor %vm124_vm0, %vm125_vm1 }
  0x13   :  { %676 = vmatpush1.bf16.msra.mxu0 %v4403_v18  ;;  %v118_v52 = vld [vmem:[%s7129_s0 + $0x14] sm:$0x11]  ;;  %v121_v53 = vld [vmem:[%s7129_s0 + $0x3c] sm:$0x11]  ;;  %v5179_v59 = vld [vmem:[%s7129_s0 + $0x8] sm:$0xff]  ;;  %v3880_v1 = vcombine.low %v5153_v48, %v5164_v51 }
  0x14   :  { %719 = vmatpush1.bf16.msra.mxu1 %v4404_v19  ;;  %677 = vmatprep.subr.bf16.mxu0 %v4405_v20  ;;  %v137_v56 = vshll.u32 %v118_v52, 16  ;;  %v5184_v60 = vld [vmem:[%s7129_s0 + $0x30] sm:$0xff]  ;;  %v130_v61 = vrot.slane %v128_v54, 4  ;;  %v179_v62 = vshll.u32 %v121_v53, 16  ;;  %v119_v63 = vld [vmem:[%s7129_s0 + $0x1c] sm:$0x11] }
  0x15   :  { %720 = vmatprep.subr.bf16.mxu1 %v4407_v21  ;;  %v122_v0 = vld [vmem:[%s7129_s0 + $0x44] sm:$0x11]  ;;  %v4451_v2 = vld [vmem:[%s7130_s1 + $0x2f0] ss:$8 sps:$4 sm:$0xff]   ;;  %v133_v3 = vrot.slane %v131_v55, 5  ;;  %v172_v5 = vrot.slane %v170_v57, 4 }
  0x16   :  { %v139_v4 = vrot.slane %v137_v56, 5  ;;  %v175_v6 = vrot.slane %v173_v58, 5  ;;  %v4452_v7 = vld [vmem:[%s7130_s1 + $0x3f0] ss:$8 sps:$4 sm:$0xff]   ;;  %v181_v8 = vrot.slane %v179_v62, 5  ;;  %v142_v9 = vshrl.u32 %v5179_v59, 16 }
  0x17   :  { %678 = vmatpush1.bf16.msra.mxu0 %v4409_v22  ;;  %v145_v10 = vshll.u32 %v5179_v59, 16  ;;  %v151_v11 = vshll.u32 %v119_v63, 16  ;;  %v4453_v12 = vld [vmem:[%s7130_s1 + $0x2e4] ss:$8 sps:$4 sm:$0xff]   ;;  %v134_v13 = vor.u32 %v133_v3, %v130_v61  ;;  %v184_v15 = vshrl.u32 %v5184_v60, 16 }
  0x18   :  { %721 = vmatpush1.bf16.msra.mxu1 %v4410_v23  ;;  %679 = vmatprep.subr.bf16.mxu0 %v4411_v24  ;;  %v176_v14 = vor.u32 %v175_v6, %v172_v5  ;;  %v187_v16 = vshll.u32 %v5184_v60, 16  ;;  %v4455_v17 = vld [vmem:[%s7130_s1 + $0x3e4] ss:$8 sps:$4 sm:$0xff]   ;;  %v144_v19 = vrot.slane %v142_v9, 4  ;;  %v193_v21 = vshll.u32 %v122_v0, 16 }
  0x19   :  { %722 = vmatprep.subr.bf16.mxu1 %v4413_v25  ;;  %v147_v20 = vrot.slane %v145_v10, 5  ;;  %v135_v22 = vrot.slane %v134_v13, 4  ;;  %v186_v24 = vrot.slane %v184_v15, 4  ;;  %v5264_v52 = vld [vmem:[%s7129_s0 + $0x38] sm:$0xf] }
  0x1a   :  { %v177_v23 = vrot.slane %v176_v14, 4  ;;  %v189_v25 = vrot.slane %v187_v16, 5  ;;  %v4473_v53 = vld [vmem:[%s7130_s1 + $0x474] ss:$8 sps:$4 sm:$0xff]   ;;  %v198_v56 = vshrl.u32 %v5264_v52, 16  ;;  %v201_v58 = vshll.u32 %v5264_v52, 16 }
  0x1b   :  { %680 = vmatpush1.bf16.msra.mxu0 %v4415_v26  ;;  %v4457_v26 = vld [vmem:[%s7130_s1 + $0x2e0] ss:$8 sps:$4 sm:$0xff]   ;;  %v4476_v57 = vld [vmem:[%s7130_s1 + $0x74] ss:$8 sps:$4 sm:$0xff]   ;;  %v4471_v62 = vld [vmem:[%s7130_s1 + $0x470] ss:$8 sps:$4 sm:$0xff]  }
  0x1c   :  { %723 = vmatpush1.bf16.msra.mxu1 %v4416_v27  ;;  %681 = vmatprep.subr.bf16.mxu0 %v4417_v28  ;;  %v148_v27 = vor.u32 %v147_v20, %v144_v19  ;;  %v153_v28 = vrot.slane %v151_v11, 5  ;;  %v4474_v63 = vld [vmem:[%s7130_s1 + $0x70] ss:$8 sps:$4 sm:$0xff]   ;;  %v4479_v3 = vld [vmem:[%s7130_s1 + $0x464] ss:$8 sps:$4 sm:$0xff]   ;;  %v3881_v11 = vcombine.high %v5153_v48, %v5164_v51 }
  0x1d   :  { %724 = vmatprep.subr.bf16.mxu1 %v4419_v29  ;;  %v3882_v29 = vcombine.low %v5179_v59, %v5184_v60  ;;  %v120_v9 = vld [vmem:[%s7129_s0 + $0x24] sm:$0x1]  ;;  %v123_v10 = vld [vmem:[%s7129_s0 + $0x4c] sm:$0x1]  ;;  %v4480_v13 = vld [vmem:[%s7130_s1 + $0x60] ss:$8 sps:$4 sm:$0xff]  }
  0x1e   :  { %v165_v15 = vshll.u32 %v120_v9, 16  ;;  %v4485_v19 = vld [vmem:[%s7130_s1 + $0x454] ss:$8 sps:$4 sm:$0xff]   ;;  %v4498_v18 = vld [vmem:[%s7130_s1 + $0x170] ss:$8 sps:$4 sm:$0xff]  }
  0x1f   :  { %682 = vmatpush1.bf16.msra.mxu0 %v4421_v30  ;;  %v4458_v30 = vld [vmem:[%s7130_s1 + $0x3e0] ss:$8 sps:$4 sm:$0xff]   ;;  %v4488_v20 = vld [vmem:[%s7130_s1 + $0x54] ss:$8 sps:$4 sm:$0xff]   ;;  %v4542_v9 = vld [vmem:[%s7130_s1 + $0x104] ss:$8 sps:$4 sm:$0xff]  }
  0x20   :  { %725 = vmatpush1.bf16.msra.mxu1 %v4422_v31  ;;  %683 = vmatprep.subr.bf16.mxu0 %v4423_v32  ;;  %v140_v31 = vsel %vm5212_vm2, %v135_v22, %v139_v4  ;;  %v182_v32 = vsel %vm5212_vm2, %v177_v23, %v181_v8  ;;  %v4482_v4 = vld [vmem:[%s7130_s1 + $0x64] ss:$8 sps:$4 sm:$0xff]   ;;  %v203_v8 = vrot.slane %v201_v58, 5  ;;  %v7141_v22 = vmov 0   ;;  %v4486_v23 = vld [vmem:[%s7130_s1 + $0x50] ss:$8 sps:$4 sm:$0xff]  }
  0x21   :  { %726 = vmatprep.subr.bf16.mxu1 %v4425_v33  ;;  %v190_v33 = vor.u32 %v189_v25, %v186_v24  ;;  %v3802_v0 = vcombine.low %v140_v31, %v182_v32  ;;  %v167_v25 = vrot.slane %v165_v15, 5  ;;  %v4519_v58 = vld [vmem:[%s7130_s1 + $0xf0] ss:$8 sps:$4 sm:$0xff]   ;;  %v4589_v51 = vld [vmem:[%s7130_s1 + $0x184] ss:$8 sps:$4 sm:$0xff]  }
  0x22   :  { %v4546_v15 = vld [vmem:[%s7130_s1 + $0x1f0] ss:$8 sps:$4 sm:$0xff]  }
  0x23   :  { %684 = vmatpush2.bf16.msra.mxu0 %v4427_v34  ;;  %v195_v34 = vrot.slane %v193_v21, 5  ;;  %v4483_v21 = vld [vmem:[%s7130_s1 + $0x450] ss:$8 sps:$4 sm:$0xff]  }
  0x24   :  { %727 = vmatpush2.bf16.msra.mxu1 %v4428_v35  ;;  %685 = vmatprep.subr.bf16.mxu0 %v4429_v36  ;;  %v4459_v35 = vld [vmem:[%s7130_s1 + $0x2d4] ss:$8 sps:$4 sm:$0xff]   ;;  %v4584_v48 = vld [vmem:[%s7130_s1 + $0x210] ss:$8 sps:$4 sm:$0xff]  }
  0x25   :  { %728 = vmatprep.subr.bf16.mxu1 %v4431_v37  ;;  %v4461_v36 = vld [vmem:[%s7130_s1 + $0x3d4] ss:$8 sps:$4 sm:$0xff]   ;;  %v3803_v37 = vcombine.high %v140_v31, %v182_v32  ;;  %v4489_v31 = vld [vmem:[%s7130_s1 + $0x440] ss:$8 sps:$4 sm:$0xff]  }
  0x26   :  { %v4492_v32 = vld [vmem:[%s7130_s1 + $0x40] ss:$8 sps:$4 sm:$0xff]  }
  0x27   :  { %686 = vmatpush2.bf16.msra.mxu0 %v4433_v38  ;;  %v149_v38 = vrot.slane %v148_v27, 4  ;;  %699 = vmatprep.mubr.bf16.mxu0 %v3803_v37 }
  0x28   :  { %729 = vmatpush2.bf16.msra.mxu1 %v4434_v39  ;;  %687 = vmatprep.subr.bf16.mxu0 %v4435_v40  ;;  %v191_v39 = vrot.slane %v190_v33, 4  ;;  %v4463_v40 = vld [vmem:[%s7130_s1 + $0x2d0] ss:$8 sps:$4 sm:$0xff]  }
  0x29   :  { %730 = vmatprep.subr.bf16.mxu1 %v4437_v41  ;;  %v154_v41 = vsel %vm5212_vm2, %v149_v38, %v153_v28  ;;  %v4491_v28 = vld [vmem:[%s7130_s1 + $0x444] ss:$8 sps:$4 sm:$0xff]   ;;  %v4495_v38 = vld [vmem:[%s7130_s1 + $0x30] ss:$8 sps:$4 sm:$0xff]  }
  0x2b   :  { %688 = vmatpush2.bf16.msra.mxu0 %v4439_v42  ;;  %v4464_v42 = vld [vmem:[%s7130_s1 + $0x3d0] ss:$8 sps:$4 sm:$0xff]  }
  0x2c   :  { %731 = vmatpush2.bf16.msra.mxu1 %v4440_v43  ;;  %689 = vmatprep.subr.bf16.mxu0 %v4441_v44  ;;  %v196_v43 = vsel %vm5212_vm2, %v191_v39, %v195_v34  ;;  %v4465_v44 = vld [vmem:[%s7130_s1 + $0x2c4] ss:$8 sps:$4 sm:$0xff]  }
  0x2d   :  { %732 = vmatprep.subr.bf16.mxu1 %v4443_v45  ;;  %v4467_v45 = vld [vmem:[%s7130_s1 + $0x3c4] ss:$8 sps:$4 sm:$0xff]  }
  0x2e   :  { %v4503_v39 = vld [vmem:[%s7130_s1 + $0x24] ss:$8 sps:$4 sm:$0xff]  }
  0x2f   :  { %690 = vmatpush2.bf16.msra.mxu0 %v4445_v46  ;;  %v3805_v46 = vcombine.high %v154_v41, %v196_v43 }
  0x30   :  { %733 = vmatpush2.bf16.msra.mxu1 %v4446_v47  ;;  %691 = vmatprep.subr.bf16.mxu0 %v4447_v49  ;;  %v4469_v47 = vld [vmem:[%s7130_s1 + $0x2c0] ss:$8 sps:$4 sm:$0xff]  }
  0x31   :  { %734 = vmatprep.subr.bf16.mxu1 %v4449_v50  ;;  %v4470_v49 = vld [vmem:[%s7130_s1 + $0x3c0] ss:$8 sps:$4 sm:$0xff]   ;;  %742 = vmatprep.mubr.bf16.mxu1 %v3805_v46  ;;  %v5259_v50 = vld [vmem:[%s7129_s0 + $0x10] sm:$0xf] }
  0x32   :  { %v156_v54 = vshrl.u32 %v5259_v50, 16  ;;  %v159_v55 = vshll.u32 %v5259_v50, 16  ;;  %v3884_v61 = vcombine.low %v5259_v50, %v5264_v52  ;;  %v4507_v46 = vld [vmem:[%s7130_s1 + $0x10] ss:$8 sps:$4 sm:$0xff]   ;;  %v4602_v50 = vld [vmem:[%s7132_s3 + $0x160] ss:$8 sps:$4 sm:$0xff]  }
  0x33   :  { %692 = vmatpush2.bf16.msra.mxu0 %v4451_v2  ;;  %v3804_v2 = vcombine.low %v154_v41, %v196_v43  ;;  %v3883_v41 = vcombine.high %v5179_v59, %v5184_v60  ;;  %v4504_v43 = vld [vmem:[%s7130_s1 + $0x160] ss:$8 sps:$4 sm:$0xff]   ;;  %v4601_v59 = vld [vmem:[%s7132_s3 + $0x74] ss:$8 sps:$4 sm:$0xff]   ;;  %v4604_v60 = vld [vmem:[%s7132_s3 + $0x164] ss:$8 sps:$4 sm:$0xff]  }
  0x34   :  { %735 = vmatpush2.bf16.msra.mxu1 %v4452_v7  ;;  %693 = vmatprep.subr.bf16.mxu0 %v4453_v12  ;;  %v158_v5 = vrot.slane %v156_v54, 4  ;;  %v161_v6 = vrot.slane %v159_v55, 5  ;;  %v200_v7 = vrot.slane %v198_v56, 4  ;;  %v4477_v12 = vld [vmem:[%s7130_s1 + $0x460] ss:$8 sps:$4 sm:$0xff]  }
  0x35   :  { %736 = vmatprep.subr.bf16.mxu1 %v4455_v17  ;;  %v207_v17 = vshll.u32 %v123_v10, 16  ;;  %v4513_v54 = vld [vmem:[%s7130_s1] ss:$8 sps:$4 sm:$0xff]   ;;  %v4521_v56 = vld [vmem:[%s7130_s1 + $0xf4] ss:$8 sps:$4 sm:$0xff]  }
  0x36   :  { %v162_v14 = vor.u32 %v161_v6, %v158_v5  ;;  %v204_v16 = vor.u32 %v203_v8, %v200_v7  ;;  %v4516_v55 = vld [vmem:[%s7130_s1 + $0x140] ss:$8 sps:$4 sm:$0xff]   ;;  %v4536_v5 = vld [vmem:[%s7130_s1 + $0x114] ss:$8 sps:$4 sm:$0xff]   ;;  %v4531_v6 = vld [vmem:[%s7130_s1 + $0xd0] ss:$8 sps:$4 sm:$0xff]  }
  0x37   :  { %694 = vmatpush2.bf16.msra.mxu0 %v4457_v26  ;;  %v209_v27 = vrot.slane %v207_v17, 5  ;;  %v4534_v7 = vld [vmem:[%s7130_s1 + $0x110] ss:$8 sps:$4 sm:$0xff]   ;;  %v4539_v8 = vld [vmem:[%s7130_s1 + $0xc4] ss:$8 sps:$4 sm:$0xff]  }
  0x38   :  { %737 = vmatpush2.bf16.msra.mxu1 %v4458_v30  ;;  %695 = vmatprep.subr.bf16.mxu0 %v4459_v35  ;;  %v163_v24 = vrot.slane %v162_v14, 4  ;;  %v205_v26 = vrot.slane %v204_v16, 4  ;;  %v4494_v30 = vld [vmem:[%s7130_s1 + $0x44] ss:$8 sps:$4 sm:$0xff]   ;;  %v4497_v35 = vld [vmem:[%s7130_s1 + $0x34] ss:$8 sps:$4 sm:$0xff]  }
  0x39   :  { %738 = vmatprep.subr.bf16.mxu1 %v4461_v36  ;;  %v4500_v36 = vld [vmem:[%s7130_s1 + $0x174] ss:$8 sps:$4 sm:$0xff]   ;;  %v4537_v10 = vld [vmem:[%s7130_s1 + $0xc0] ss:$8 sps:$4 sm:$0xff]   ;;  %v4543_v14 = vld [vmem:[%s7130_s1 + $0xb0] ss:$8 sps:$4 sm:$0xff]  }
  0x3a   :  { %v168_v33 = vsel %vm5212_vm2, %v163_v24, %v167_v25  ;;  %v210_v34 = vsel %vm5212_vm2, %v205_v26, %v209_v27  ;;  %v4551_v16 = vld [vmem:[%s7130_s1 + $0xa4] ss:$8 sps:$4 sm:$0xff]   ;;  %v4555_v24 = vld [vmem:[%s7130_s1 + $0x90] ss:$8 sps:$4 sm:$0xff]   ;;  %v4605_v52 = vld [vmem:[%s7132_s3 + $0x60] ss:$8 sps:$4 sm:$0xff]  }
  0x3b   :  { %696 = vmatpush2.bf16.msra.mxu0 %v4463_v40  ;;  %v3806_v37 = vcombine.low %v168_v33, %v210_v34  ;;  %v4506_v40 = vld [vmem:[%s7130_s1 + $0x164] ss:$8 sps:$4 sm:$0xff]   ;;  %v4558_v25 = vld [vmem:[%s7130_s1 + $0x1d0] ss:$8 sps:$4 sm:$0xff]  }
  0x3c   :  { %739 = vmatpush2.bf16.msra.mxu1 %v4464_v42  ;;  %697 = vmatprep.subr.bf16.mxu0 %v4465_v44  ;;  %v4501_v42 = vld [vmem:[%s7130_s1 + $0x20] ss:$8 sps:$4 sm:$0xff]   ;;  %v4509_v44 = vld [vmem:[%s7130_s1 + $0x14] ss:$8 sps:$4 sm:$0xff]   ;;  %v4554_v17 = vld [vmem:[%s7130_s1 + $0x1e4] ss:$8 sps:$4 sm:$0xff]  }
  0x3d   :  { %740 = vmatprep.subr.bf16.mxu1 %v4467_v45  ;;  %v4512_v45 = vld [vmem:[%s7130_s1 + $0x154] ss:$8 sps:$4 sm:$0xff]   ;;  %v4563_v26 = vld [vmem:[%s7130_s1 + $0x84] ss:$8 sps:$4 sm:$0xff]   ;;  %v4569_v33 = vld [vmem:[%s7130_s1 + $0x1b0] ss:$8 sps:$4 sm:$0xff]  }
  0x3e   :  { %v4566_v27 = vld [vmem:[%s7130_s1 + $0x1c4] ss:$8 sps:$4 sm:$0xff]   ;;  %v4572_v34 = vld [vmem:[%s7130_s1 + $0x230] ss:$8 sps:$4 sm:$0xff]  }
  0x3f   :  { %698 = vmatpush2.bf16.msra.mxu0 %v4469_v47  ;;  %v4510_v47 = vld [vmem:[%s7130_s1 + $0x150] ss:$8 sps:$4 sm:$0xff]  }
  0x40   :  { %741 = vmatpush2.bf16.msra.mxu1 %v4470_v49  ;;  %761 = vmatprep.subr.bf16.mxu0 %v4473_v53  ;;  %v4515_v49 = vld [vmem:[%s7130_s1 + $0x4] ss:$8 sps:$4 sm:$0xff]  }
  0x41   :  { %1184 = vmatprep.subr.bf16.mxu1 %v4476_v57  ;;  %v4518_v53 = vld [vmem:[%s7130_s1 + $0x144] ss:$8 sps:$4 sm:$0xff]   ;;  %v4524_v57 = vld [vmem:[%s7130_s1 + $0x134] ss:$8 sps:$4 sm:$0xff]  }
  0x42   :  { %700 = vmatmul.mubr.bf16.vlgmr.msra.gmra.mxu0 %v3802_v0  ;;  %v4530_v0 = vld [vmem:[%s7130_s1 + $0x124] ss:$8 sps:$4 sm:$0xff]  }
  0x43   :  { %743 = vmatmul.mubr.bf16.vlgmr.msra.gmra.mxu1 %v3804_v2  ;;  %762 = vmatpush1.bf16.msra.mxu0 %v4471_v62  ;;  %v4522_v62 = vld [vmem:[%s7130_s1 + $0x130] ss:$8 sps:$4 sm:$0xff]   ;;  %v4525_v2 = vld [vmem:[%s7130_s1 + $0xe0] ss:$8 sps:$4 sm:$0xff]  }
  0x44   :  { %1185 = vmatpush1.bf16.msra.mxu1 %v4474_v63  ;;  %763 = vmatprep.subr.bf16.mxu0 %v4479_v3  ;;  %v4527_v63 = vld [vmem:[%s7130_s1 + $0xe4] ss:$8 sps:$4 sm:$0xff]   ;;  %v4528_v3 = vld [vmem:[%s7130_s1 + $0x120] ss:$8 sps:$4 sm:$0xff]  }
  0x45   :  { %1186 = vmatprep.subr.bf16.mxu1 %v4482_v4  ;;  %785 = vmatprep.mubr.bf16.mxu0 %v7141_v22  ;;  %v4533_v4 = vld [vmem:[%s7130_s1 + $0xd4] ss:$8 sps:$4 sm:$0xff]  }
  0x46   :  { %1216 = vmatprep.mubr.bf16.mxu1 %v3881_v11  ;;  %v4540_v11 = vld [vmem:[%s7130_s1 + $0x100] ss:$8 sps:$4 sm:$0xff]  }
  0x47   :  { %764 = vmatpush1.bf16.msra.mxu0 %v4477_v12  ;;  %v4545_v12 = vld [vmem:[%s7130_s1 + $0xb4] ss:$8 sps:$4 sm:$0xff]  }
  0x48   :  { %1187 = vmatpush1.bf16.msra.mxu1 %v4480_v13  ;;  %765 = vmatprep.subr.bf16.mxu0 %v4485_v19  ;;  %v4548_v13 = vld [vmem:[%s7130_s1 + $0x1f4] ss:$8 sps:$4 sm:$0xff]   ;;  %v4549_v19 = vld [vmem:[%s7130_s1 + $0xa0] ss:$8 sps:$4 sm:$0xff]  }
  0x49   :  { %1188 = vmatprep.subr.bf16.mxu1 %v4488_v20  ;;  %v4552_v20 = vld [vmem:[%s7130_s1 + $0x1e0] ss:$8 sps:$4 sm:$0xff]  }
  0x4b   :  { %766 = vmatpush1.bf16.msra.mxu0 %v4483_v21  ;;  %v4557_v21 = vld [vmem:[%s7130_s1 + $0x94] ss:$8 sps:$4 sm:$0xff]  }
  0x4c   :  { %1189 = vmatpush1.bf16.msra.mxu1 %v4486_v23  ;;  %767 = vmatprep.subr.bf16.mxu0 %v4491_v28  ;;  %v4560_v23 = vld [vmem:[%s7130_s1 + $0x1d4] ss:$8 sps:$4 sm:$0xff]   ;;  %v4561_v28 = vld [vmem:[%s7130_s1 + $0x80] ss:$8 sps:$4 sm:$0xff]  }
  0x4d   :  { %1190 = vmatprep.subr.bf16.mxu1 %v4494_v30  ;;  %v4564_v30 = vld [vmem:[%s7130_s1 + $0x1c0] ss:$8 sps:$4 sm:$0xff]  }
  0x4f   :  { %768 = vmatpush1.bf16.msra.mxu0 %v4489_v31  ;;  %v4571_v31 = vld [vmem:[%s7130_s1 + $0x1b4] ss:$8 sps:$4 sm:$0xff]  }
  0x50   :  { %1191 = vmatpush1.bf16.msra.mxu1 %v4492_v32  ;;  %1227 = vmatprep.subr.bf16.mxu0 %v4500_v36  ;;  %v4574_v32 = vld [vmem:[%s7130_s1 + $0x234] ss:$8 sps:$4 sm:$0xff]   ;;  %v4580_v36 = vld [vmem:[%s7130_s1 + $0x224] ss:$8 sps:$4 sm:$0xff]  }
  0x51   :  { %1192 = vmatprep.subr.bf16.mxu1 %v4497_v35  ;;  %v4577_v35 = vld [vmem:[%s7130_s1 + $0x1a4] ss:$8 sps:$4 sm:$0xff]  }
  0x52   :  { %3879 = vmatmul.mubr.msk.bf16.vlgmr.msra.gmra.mxu0 %vm663_vm3, %v3806_v37  ;;  %v4575_v37 = vld [vmem:[%s7130_s1 + $0x1a0] ss:$8 sps:$4 sm:$0xff]  }
  0x53   :  { %1228 = vmatpush1.bf16.msra.mxu0 %v4498_v18  ;;  %1259 = vmatprep.mubr.bf16.mxu0 %v3883_v41  ;;  %v4583_v18 = vld [vmem:[%s7130_s1 + $0x194] ss:$8 sps:$4 sm:$0xff]   ;;  %v4587_v41 = vld [vmem:[%s7130_s1 + $0x180] ss:$8 sps:$4 sm:$0xff]  }
  0x54   :  { %1193 = vmatpush1.bf16.msra.mxu1 %v4495_v38  ;;  %1229 = vmatprep.subr.bf16.mxu0 %v4506_v40  ;;  %v4578_v38 = vld [vmem:[%s7130_s1 + $0x220] ss:$8 sps:$4 sm:$0xff]   ;;  %v4581_v40 = vld [vmem:[%s7130_s1 + $0x190] ss:$8 sps:$4 sm:$0xff]  }
  0x55   :  { %1194 = vmatprep.subr.bf16.mxu1 %v4503_v39  ;;  %v4586_v39 = vld [vmem:[%s7130_s1 + $0x214] ss:$8 sps:$4 sm:$0xff]  }
  0x57   :  { %1230 = vmatpush1.bf16.msra.mxu0 %v4504_v43  ;;  %v4596_v43 = vld [vmem:[%s7132_s3 + $0x170] ss:$8 sps:$4 sm:$0xff]  }
  0x58   :  { %1195 = vmatpush1.bf16.msra.mxu1 %v4501_v42  ;;  %1231 = vmatprep.subr.bf16.mxu0 %v4512_v45  ;;  %v4590_v42 = vld [vmem:[%s7130_s1 + $0x200] ss:$8 sps:$4 sm:$0xff]   ;;  %v4599_v45 = vld [vmem:[%s7132_s3 + $0x70] ss:$8 sps:$4 sm:$0xff]  }
  0x59   :  { %1196 = vmatprep.subr.bf16.mxu1 %v4509_v44  ;;  %v5545_v44 = vld [vmem:[%s7132_s3 + $0x174] ss:$8 sps:$4 sm:$0xff]  }
  0x5b   :  { %1232 = vmatpush1.bf16.msra.mxu0 %v4510_v47  ;;  %v5575_v47 = vld [vmem:[%s7132_s3 + $0x150] ss:$8 sps:$4 sm:$0xff]  }
  0x5c   :  { %1197 = vmatpush1.bf16.msra.mxu1 %v4507_v46  ;;  %1233 = vmatprep.subr.bf16.mxu0 %v4518_v53  ;;  %v4613_v46 = vld [vmem:[%s7132_s3 + $0x54] ss:$8 sps:$4 sm:$0xff]   ;;  %v5583_v53 = vld [vmem:[%s7132_s3 + $0x144] ss:$8 sps:$4 sm:$0xff]  }
  0x5d   :  { %1198 = vmatprep.subr.bf16.mxu1 %v4515_v49  ;;  %v4611_v49 = vld [vmem:[%s7132_s3 + $0x50] ss:$8 sps:$4 sm:$0xff]  }
  0x5f   :  { %1234 = vmatpush1.bf16.msra.mxu0 %v4516_v55  ;;  %v5593_v55 = vld [vmem:[%s7132_s3 + $0x140] ss:$8 sps:$4 sm:$0xff]  }
  0x60   :  { %1199 = vmatpush1.bf16.msra.mxu1 %v4513_v54  ;;  %1235 = vmatprep.subr.bf16.mxu0 %v4524_v57  ;;  %v5588_v54 = vld [vmem:[%s7132_s3 + $0x44] ss:$8 sps:$4 sm:$0xff]   ;;  %v5603_v57 = vld [vmem:[%s7132_s3 + $0x134] ss:$8 sps:$4 sm:$0xff]  }
  0x61   :  { %1200 = vmatprep.subr.bf16.mxu1 %v4521_v56  ;;  %v5598_v56 = vld [vmem:[%s7132_s3 + $0x40] ss:$8 sps:$4 sm:$0xff]  }
  0x63   :  { %1236 = vmatpush1.bf16.msra.mxu0 %v4522_v62  ;;  %v5616_v62 = vld [vmem:[%s7132_s3 + $0x130] ss:$8 sps:$4 sm:$0xff]  }
  0x64   :  { %1201 = vmatpush2.bf16.msra.mxu1 %v4519_v58  ;;  %1237 = vmatprep.subr.bf16.mxu0 %v4530_v0  ;;  %v5609_v58 = vld [vmem:[%s7132_s3 + $0x34] ss:$8 sps:$4 sm:$0xff]   ;;  %v5626_v0 = vld [vmem:[%s7132_s3 + $0x124] ss:$8 sps:$4 sm:$0xff]  }
  0x65   :  { %1202 = vmatprep.subr.bf16.mxu1 %v4527_v63  ;;  %v5621_v63 = vld [vmem:[%s7132_s3 + $0x30] ss:$8 sps:$4 sm:$0xff]  }
  0x67   :  { %1238 = vmatpush1.bf16.msra.mxu0 %v4528_v3  ;;  %v5640_v3 = vld [vmem:[%s7132_s3 + $0x120] ss:$8 sps:$4 sm:$0xff]  }
  0x68   :  { %1203 = vmatpush2.bf16.msra.mxu1 %v4525_v2  ;;  %1239 = vmatprep.subr.bf16.mxu0 %v4536_v5  ;;  %v5632_v2 = vld [vmem:[%s7132_s3 + $0x24] ss:$8 sps:$4 sm:$0xff]   ;;  %v5650_v5 = vld [vmem:[%s7132_s3 + $0x114] ss:$8 sps:$4 sm:$0xff]  }
  0x69   :  { %1204 = vmatprep.subr.bf16.mxu1 %v4533_v4  ;;  %v5645_v4 = vld [vmem:[%s7132_s3 + $0x20] ss:$8 sps:$4 sm:$0xff]  }
  0x6b   :  { %1240 = vmatpush1.bf16.msra.mxu0 %v4534_v7  ;;  %v5668_v7 = vld [vmem:[%s7132_s3 + $0x14] ss:$8 sps:$4 sm:$0xff]  }
  0x6c   :  { %1205 = vmatpush2.bf16.msra.mxu1 %v4531_v6  ;;  %1241 = vmatprep.subr.bf16.mxu0 %v4542_v9  ;;  %v5659_v6 = vld [vmem:[%s7132_s3 + $0x110] ss:$8 sps:$4 sm:$0xff]   ;;  %v5679_v9 = vld [vmem:[%s7132_s3 + $0x104] ss:$8 sps:$4 sm:$0xff]  }
  0x6d   :  { %1206 = vmatprep.subr.bf16.mxu1 %v4539_v8  ;;  %v5673_v8 = vld [vmem:[%s7132_s3 + $0x10] ss:$8 sps:$4 sm:$0xff]  }
  0x6f   :  { %1242 = vmatpush1.bf16.msra.mxu0 %v4540_v11  ;;  %v5691_v11 = vld [vmem:[%s7132_s3 + $0x4] ss:$8 sps:$4 sm:$0xff]  }
  0x70   :  { %1207 = vmatpush2.bf16.msra.mxu1 %v4537_v10  ;;  %1243 = vmatprep.subr.bf16.mxu0 %v4548_v13  ;;  %v5685_v10 = vld [vmem:[%s7132_s3 + $0x100] ss:$8 sps:$4 sm:$0xff]   ;;  %v5703_v13 = vld [vmem:[%s7132_s3 + $0x1f4] ss:$8 sps:$4 sm:$0xff]  }
  0x71   :  { %1208 = vmatprep.subr.bf16.mxu1 %v4545_v12  ;;  %v5697_v12 = vld [vmem:[%s7132_s3] ss:$8 sps:$4 sm:$0xff]  }
  0x73   :  { %1244 = vmatpush2.bf16.msra.mxu0 %v4546_v15  ;;  %v5715_v15 = vld [vmem:[%s7132_s3 + $0xf4] ss:$8 sps:$4 sm:$0xff]  }
  0x74   :  { %1209 = vmatpush2.bf16.msra.mxu1 %v4543_v14  ;;  %1245 = vmatprep.subr.bf16.mxu0 %v4554_v17  ;;  %v5709_v14 = vld [vmem:[%s7132_s3 + $0x1f0] ss:$8 sps:$4 sm:$0xff]   ;;  %v5726_v17 = vld [vmem:[%s7132_s3 + $0x1e0] ss:$8 sps:$4 sm:$0xff]  }
  0x75   :  { %1210 = vmatprep.subr.bf16.mxu1 %v4551_v16  ;;  %v5721_v16 = vld [vmem:[%s7132_s3 + $0xf0] ss:$8 sps:$4 sm:$0xff]  }
  0x77   :  { %1246 = vmatpush2.bf16.msra.mxu0 %v4552_v20  ;;  %v5737_v20 = vld [vmem:[%s7132_s3 + $0xe0] ss:$8 sps:$4 sm:$0xff]  }
  0x78   :  { %1211 = vmatpush2.bf16.msra.mxu1 %v4549_v19  ;;  %1247 = vmatprep.subr.bf16.mxu0 %v4560_v23  ;;  %v5731_v19 = vld [vmem:[%s7132_s3 + $0x1e4] ss:$8 sps:$4 sm:$0xff]   ;;  %7287 = vst [vmem:[#allocation5_spill] sm:$0xff] %v5737_v20  ;;  %v5749_v23 = vld [vmem:[%s7132_s3 + $0x1d0] ss:$8 sps:$4 sm:$0xff]  }
  0x79   :  { %1212 = vmatprep.subr.bf16.mxu1 %v4557_v21  ;;  %v5742_v21 = vld [vmem:[%s7132_s3 + $0xe4] ss:$8 sps:$4 sm:$0xff]   ;;  %7288 = vst [vmem:[#allocation6_spill] sm:$0xff] %v5749_v23 }
  0x7b   :  { %1248 = vmatpush2.bf16.msra.mxu0 %v4558_v25  ;;  %v5763_v25 = vld [vmem:[%s7132_s3 + $0xd4] ss:$8 sps:$4 sm:$0xff]  }
  0x7c   :  { %1213 = vmatpush2.bf16.msra.mxu1 %v4555_v24  ;;  %1249 = vmatprep.subr.bf16.mxu0 %v4566_v27  ;;  %v5754_v24 = vld [vmem:[%s7132_s3 + $0x1d4] ss:$8 sps:$4 sm:$0xff]   ;;  %7289 = vst [vmem:[#allocation7_spill] sm:$0xff] %v5763_v25  ;;  %v5775_v27 = vld [vmem:[%s7132_s3 + $0x1c4] ss:$8 sps:$4 sm:$0xff]  }
  0x7d   :  { %1214 = vmatprep.subr.bf16.mxu1 %v4563_v26  ;;  %v5769_v26 = vld [vmem:[%s7132_s3 + $0xd0] ss:$8 sps:$4 sm:$0xff]   ;;  %7291 = vst [vmem:[#allocation9_spill] sm:$0xff] %v5775_v27 }
  0x7e   :  { %7290 = vst [vmem:[#allocation8_spill] sm:$0xff] %v5769_v26 }
  0x7f   :  { %1250 = vmatpush2.bf16.msra.mxu0 %v4564_v30  ;;  %v5787_v30 = vld [vmem:[%s7132_s3 + $0xc4] ss:$8 sps:$4 sm:$0xff]  }
  0x80   :  { %1215 = vmatpush2.bf16.msra.mxu1 %v4561_v28  ;;  %1251 = vmatprep.subr.bf16.mxu0 %v4571_v31  ;;  %v5781_v28 = vld [vmem:[%s7132_s3 + $0x1c0] ss:$8 sps:$4 sm:$0xff]   ;;  %7293 = vst [vmem:[#allocation11_spill] sm:$0xff] %v5787_v30 }
  0x81   :  { %1278 = vmatprep.subr.bf16.mxu1 %v4574_v32  ;;  %7292 = vst [vmem:[#allocation10_spill] sm:$0xff] %v5781_v28  ;;  %v5793_v31 = vld [vmem:[%s7132_s3 + $0xc0] ss:$8 sps:$4 sm:$0xff]   ;;  %v5799_v32 = vld [vmem:[%s7132_s3 + $0x1b4] ss:$8 sps:$4 sm:$0xff]  }
  0x82   :  { %7294 = vst [vmem:[#allocation12_spill] sm:$0xff] %v5793_v31  ;;  %7295 = vst [vmem:[#allocation13_spill] sm:$0xff] %v5799_v32 }
  0x83   :  { %1217 = vmatmul.mubr.bf16.vlgmr.msra.gmra.mxu1 %v3880_v1  ;;  %1252 = vmatpush2.bf16.msra.mxu0 %v4569_v33  ;;  %v4592_v1 = vld [vmem:[%s7130_s1 + $0x204] ss:$8 sps:$4 sm:$0xff]  }
  0x84   :  { %1279 = vmatpush1.bf16.msra.mxu1 %v4572_v34  ;;  %1253 = vmatprep.subr.bf16.mxu0 %v4577_v35 }
  0x85   :  { %1280 = vmatprep.subr.bf16.mxu1 %v4580_v36  ;;  %1302 = vmatprep.mubr.bf16.mxu1 %v7141_v22 }
  0x87   :  { %1254 = vmatpush2.bf16.msra.mxu0 %v4575_v37 }
  0x88   :  { %1281 = vmatpush1.bf16.msra.mxu1 %v4578_v38  ;;  %1255 = vmatprep.subr.bf16.mxu0 %v4583_v18 }
  0x89   :  { %1282 = vmatprep.subr.bf16.mxu1 %v4586_v39 }
  0x8b   :  { %1256 = vmatpush2.bf16.msra.mxu0 %v4581_v40 }
  0x8c   :  { %1283 = vmatpush1.bf16.msra.mxu1 %v4584_v48  ;;  %1257 = vmatprep.subr.bf16.mxu0 %v4589_v51 }
  0x8d   :  { %1284 = vmatprep.subr.bf16.mxu1 %v4592_v1 }
  0x8f   :  { %1258 = vmatpush2.bf16.msra.mxu0 %v4587_v41 }
  0x90   :  { %1285 = vmatpush1.bf16.msra.mxu1 %v4590_v42  ;;  %1583 = vmatprep.subr.bf16.mxu0 %v5545_v44 }
  0x91   :  { %1792 = vmatprep.subr.bf16.mxu1 %v4601_v59 }
  0x92   :  { %1260 = vmatmul.mubr.bf16.vlgmr.msra.gmra.mxu0 %v3882_v29  ;;  %v4607_v29 = vld [vmem:[%s7132_s3 + $0x64] ss:$8 sps:$4 sm:$0xff]  }
  0x93   :  { %3957 = vmatmul.mubr.msk.bf16.vlgmr.msra.gmra.mxu1 %vm663_vm3, %v3884_v61  ;;  %1584 = vmatpush1.bf16.msra.mxu0 %v4596_v43  ;;  %v4610_v61 = vld [vmem:[%s7132_s3 + $0x154] ss:$8 sps:$4 sm:$0xff]  }
  0x94   :  { %1793 = vmatpush1.bf16.msra.mxu1 %v4599_v45  ;;  %1585 = vmatprep.subr.bf16.mxu0 %v4604_v60 }
  0x95   :  { %1794 = vmatprep.subr.bf16.mxu1 %v4607_v29 }
  0x97   :  { %1586 = vmatpush1.bf16.msra.mxu0 %v4602_v50 }
  0x98   :  { %1795 = vmatpush1.bf16.msra.mxu1 %v4605_v52  ;;  %1587 = vmatprep.subr.bf16.mxu0 %v4610_v61 }
  0x99   :  { %1796 = vmatprep.subr.bf16.mxu1 %v4613_v46 }
  0x9b   :  { %1588 = vmatpush1.bf16.msra.mxu0 %v5575_v47 }
  0x9c   :  { %1797 = vmatpush1.bf16.msra.mxu1 %v4611_v49  ;;  %1589 = vmatprep.subr.bf16.mxu0 %v5583_v53 }
  0x9d   :  { %1798 = vmatprep.subr.bf16.mxu1 %v5588_v54 }
  0x9f   :  { %1590 = vmatpush1.bf16.msra.mxu0 %v5593_v55 }
  0xa0   :  { %1799 = vmatpush1.bf16.msra.mxu1 %v5598_v56  ;;  %1591 = vmatprep.subr.bf16.mxu0 %v5603_v57 }
  0xa1   :  { %1800 = vmatprep.subr.bf16.mxu1 %v5609_v58 }
  0xa3   :  { %1592 = vmatpush1.bf16.msra.mxu0 %v5616_v62 }
  0xa4   :  { %1801 = vmatpush1.bf16.msra.mxu1 %v5621_v63  ;;  %1593 = vmatprep.subr.bf16.mxu0 %v5626_v0 }
  0xa5   :  { %1802 = vmatprep.subr.bf16.mxu1 %v5632_v2 }
  0xa7   :  { %1594 = vmatpush1.bf16.msra.mxu0 %v5640_v3 }
  0xa8   :  { %1803 = vmatpush1.bf16.msra.mxu1 %v5645_v4  ;;  %1595 = vmatprep.subr.bf16.mxu0 %v5650_v5 }
  0xa9   :  { %1804 = vmatprep.subr.bf16.mxu1 %v5668_v7 }
  0xab   :  { %1596 = vmatpush1.bf16.msra.mxu0 %v5659_v6 }
  0xac   :  { %1805 = vmatpush1.bf16.msra.mxu1 %v5673_v8  ;;  %1597 = vmatprep.subr.bf16.mxu0 %v5679_v9 }
  0xad   :  { %1806 = vmatprep.subr.bf16.mxu1 %v5691_v11 }
  0xaf   :  { %1598 = vmatpush1.bf16.msra.mxu0 %v5685_v10 }
  0xb0   :  { %1807 = vmatpush1.bf16.msra.mxu1 %v5697_v12  ;;  %1599 = vmatprep.subr.bf16.mxu0 %v5703_v13 }
  0xb1   :  { %1808 = vmatprep.subr.bf16.mxu1 %v5715_v15 }
  0xb3   :  { %1600 = vmatpush2.bf16.msra.mxu0 %v5709_v14 }
  0xb4   :  { %1809 = vmatpush2.bf16.msra.mxu1 %v5721_v16  ;;  %1601 = vmatprep.subr.bf16.mxu0 %v5731_v19 }
  0xb5   :  { %1810 = vmatprep.subr.bf16.mxu1 %v5742_v21 }
  0xb7   :  { %1602 = vmatpush2.bf16.msra.mxu0 %v5726_v17 }
  0xb8   :  { %1603 = vmatprep.subr.bf16.mxu0 %v5754_v24  ;;  %1811 = vmatpush2.bf16.msra.mxu1 %v5737_v20 }
  0xb9   :  { %1812 = vmatprep.subr.bf16.mxu1 %v5763_v25 }
  0xbb   :  { %1604 = vmatpush2.bf16.msra.mxu0 %v5749_v23 }
  0xbc   :  { %1813 = vmatpush2.bf16.msra.mxu1 %v5769_v26  ;;  %1605 = vmatprep.subr.bf16.mxu0 %v5775_v27 }
  0xbd   :  { %1814 = vmatprep.subr.bf16.mxu1 %v5787_v30 }
  0xbf   :  { %1606 = vmatpush2.bf16.msra.mxu0 %v5781_v28 }
  0xc0   :  { %16 = vsyncpa [#allocation3], 0  ;;  %1815 = vmatpush2.bf16.msra.mxu1 %v5793_v31  ;;  %v5805_v33 = vld [vmem:[%s7132_s3 + $0x1b0] ss:$8 sps:$4 sm:$0xff]   ;;  %1607 = vmatprep.subr.bf16.mxu0 %v5799_v32  ;;  %v5811_v34 = vld [vmem:[%s7132_s3 + $0xb4] ss:$8 sps:$4 sm:$0xff]  }
  0xc1   :  { %7296 = vst [vmem:[#allocation14_spill] sm:$0xff] %v5805_v33  ;;  %7297 = vst [vmem:[#allocation15_spill] sm:$0xff] %v5811_v34  ;;  %v5817_v35 = vld [vmem:[%s7132_s3 + $0xb0] ss:$8 sps:$4 sm:$0xff]   ;;  %1816 = vmatprep.subr.bf16.mxu1 %v5811_v34  ;;  %v5823_v36 = vld [vmem:[%s7132_s3 + $0x1a4] ss:$8 sps:$4 sm:$0xff]  }
  0xc2   :  { %7298 = vst [vmem:[#allocation16_spill] sm:$0xff] %v5817_v35  ;;  %7299 = vst [vmem:[#allocation17_spill] sm:$0xff] %v5823_v36  ;;  %v5829_v37 = vld [vmem:[%s7132_s3 + $0x1a0] ss:$8 sps:$4 sm:$0xff]   ;;  %v5835_v38 = vld [vmem:[%s7132_s3 + $0xa4] ss:$8 sps:$4 sm:$0xff]  }
  0xc3   :  { %1608 = vmatpush2.bf16.msra.mxu0 %v5805_v33  ;;  %7300 = vst [vmem:[#allocation18_spill] sm:$0xff] %v5829_v37  ;;  %7301 = vst [vmem:[#allocation19_spill] sm:$0xff] %v5835_v38  ;;  %v5841_v18 = vld [vmem:[%s7132_s3 + $0xa0] ss:$8 sps:$4 sm:$0xff]   ;;  %v5847_v39 = vld [vmem:[%s7132_s3 + $0x194] ss:$8 sps:$4 sm:$0xff]  }
  0xc4   :  { %1817 = vmatpush2.bf16.msra.mxu1 %v5817_v35  ;;  %1609 = vmatprep.subr.bf16.mxu0 %v5823_v36  ;;  %7302 = vst [vmem:[#allocation20_spill] sm:$0xff] %v5841_v18  ;;  %7303 = vst [vmem:[#allocation21_spill] sm:$0xff] %v5847_v39  ;;  %v5853_v40 = vld [vmem:[%s7132_s3 + $0x190] ss:$8 sps:$4 sm:$0xff]   ;;  %v5859_v48 = vld [vmem:[%s7132_s3 + $0x94] ss:$8 sps:$4 sm:$0xff]  }
  0xc5   :  { %1818 = vmatprep.subr.bf16.mxu1 %v5835_v38  ;;  %7304 = vst [vmem:[#allocation22_spill] sm:$0xff] %v5853_v40  ;;  %7305 = vst [vmem:[#allocation23_spill] sm:$0xff] %v5859_v48  ;;  %v5865_v51 = vld [vmem:[%s7132_s3 + $0x90] ss:$8 sps:$4 sm:$0xff]   ;;  %v5871_v1 = vld [vmem:[%s7132_s3 + $0x184] ss:$8 sps:$4 sm:$0xff]  }
  0xc6   :  { %7306 = vst [vmem:[#allocation24_spill] sm:$0xff] %v5865_v51  ;;  %7307 = vst [vmem:[#allocation25_spill] sm:$0xff] %v5871_v1  ;;  %v5877_v41 = vld [vmem:[%s7132_s3 + $0x180] ss:$8 sps:$4 sm:$0xff]   ;;  %v5887_v43 = vld [vmem:[%s7132_s3 + $0x84] ss:$8 sps:$4 sm:$0xff]  }
  0xc7   :  { %1610 = vmatpush2.bf16.msra.mxu0 %v5829_v37  ;;  %7308 = vst [vmem:[#allocation26_spill] sm:$0xff] %v5877_v41  ;;  %v5882_v42 = vld [vmem:[%s7132_s3 + $0x80] ss:$8 sps:$4 sm:$0xff]   ;;  %7310 = vst [vmem:[#allocation28_spill] sm:$0xff] %v5887_v43  ;;  %v5895_v45 = vld [vmem:[%s7132_s3 + $0x274] ss:$8 sps:$4 sm:$0xff]  }
  0xc8   :  { %1819 = vmatpush2.bf16.msra.mxu1 %v5841_v18  ;;  %1611 = vmatprep.subr.bf16.mxu0 %v5847_v39  ;;  %7309 = vst [vmem:[#allocation27_spill] sm:$0xff] %v5882_v42  ;;  %7311 = vst [vmem:[#allocation29_spill] sm:$0xff] %v5895_v45  ;;  %v5902_v59 = vld [vmem:[%s7132_s3 + $0x374] ss:$8 sps:$4 sm:$0xff]   ;;  %v1313_v38 = vld [vmem:[%s7131_s2] sm:$0x3] }
  0xc9   :  { %1820 = vmatprep.subr.bf16.mxu1 %v5859_v48  ;;  %7312 = vst [vmem:[#allocation30_spill] sm:$0xff] %v5902_v59  ;;  %vm1415_vm4 = vcmask 1041409   ;;  %s4945_s30 = smov [#allocation2]  }
  0xca   :  { %s3722_s12 = sshll.u32 %s4945_s30, 4  ;;  %s3723_s12 = int_to_ptr.vmem [resolvable:$true] %s3722_s12 }
  0xcb   :  { %1612 = vmatpush2.bf16.msra.mxu0 %v5853_v40  ;;  %s4922_s13 = scalar_lea.vmem %s3723_s12, 32  ;;  %p4927_p1 = scmp.lt.s32.totalorder %s3723_s12, %s3723_s12 }
  0xcc   :  { %1821 = vmatpush2.bf16.msra.mxu1 %v5865_v51  ;;  %1613 = vmatprep.subr.bf16.mxu0 %v5871_v1  ;;  %p4923_p0 = scmp.ne.s32.totalorder %s3723_s12, %s4922_s13  ;;  %p4928_p2 = scmp.lt.s32.totalorder %s4922_s13, %s4922_s13 }
  0xcd   :  { %1822 = vmatprep.subr.bf16.mxu1 %v5887_v43 }
  0xce   :  { %p4929_p3 = por %p4928_p2, %p4927_p1 }
  0xcf   :  { %1614 = vmatpush2.bf16.msra.mxu0 %v5877_v41 }
  0xd0   :  { %1823 = vmatpush2.bf16.msra.mxu1 %v5882_v42  ;;  %2036 = vmatprep.subr.bf16.mxu0 %v5895_v45  ;;  %v1315_v42 = vlaneseq  ;;  %p4930_p4 = pnand %p4929_p3, %p4923_p0 }
  0xd1   :  { %2282 = vmatprep.subr.bf16.mxu1 %v5902_v59 }
  0xd2   :  { %v5905_v1 = vshrl.u32 %v1315_v42, 7 }
  0xd4   :  { %7313 = vst [vmem:[#allocation31_spill] sm:$0xff] %v5905_v1  ;;  %v5908_v59 = vsub.s32 0, %v5905_v1  ;;  %v5914_v33 = vsub.s32 1, %v5905_v1 }
  0xd6   :  { %7314 = vst [vmem:[#allocation32_spill] sm:$0xff] %v5908_v59  ;;  %7315 = vst [vmem:[#allocation33_spill] sm:$0xff] %v5914_v33  ;;  %v1322_v26 = vrot.slane %v1313_v38, %v5914_v33  ;;  %v6128_v33 = vld [vmem:[%s7132_s3 + $0x314] ss:$8 sps:$4 sm:$0xff]  }
  0xd7   :  { %7328 = vst [vmem:[#allocation46_spill] sm:$0xff] %v6128_v33 }
 0x102   :  { %v701_v60 = vpop.f32.mrf.mxu0 }
 0x103   :  { %v744_v29 = vpop.f32.mrf.mxu1 }
 0x104   :  { %v703_v50 = vpop.f32.mrf.mxu0  ;;  %v745_v18 = vadd.f32 %v744_v29, %v701_v60  ;;  %v1318_v60 = vrot.slane %v1313_v38, %v5908_v59 }
 0x105   :  { %v746_v52 = vpop.f32.mrf.mxu1 }
 0x106   :  { %v705_v61 = vpop.f32.mrf.mxu0  ;;  %v747_v39 = vadd.f32 %v746_v52, %v703_v50 }
 0x107   :  { %v748_v46 = vpop.f32.mrf.mxu1 }
 0x108   :  { %v707_v49 = vpop.f32.mrf.mxu0  ;;  %v749_v34 = vadd.f32 %v748_v46, %v705_v61 }
 0x109   :  { %v750_v22 = vpop.f32.mrf.mxu1 }
 0x10a   :  { %v751_v29 = vadd.f32 %v750_v22, %v707_v49 }
 0x112   :  { %v787_v41 = vpop.f32.mrf.mxu0 }
 0x113   :  { %v788_v37 = vadd.f32 %v787_v41, %v745_v18 }
 0x114   :  { %v789_v51 = vpop.f32.mrf.mxu0 }
 0x115   :  { %v790_v42 = vadd.f32 %v789_v51, %v747_v39 }
 0x116   :  { %v791_v40 = vpop.f32.mrf.mxu0 }
 0x117   :  { %v792_v30 = vadd.f32 %v791_v40, %v749_v34 }
 0x118   :  { %v793_v35 = vpop.f32.mrf.mxu0 }
 0x119   :  { %v794_v27 = vadd.f32 %v793_v35, %v751_v29 }
 0x143   :  { %v1218_v43 = vpop.f32.mrf.mxu1 }
 0x144   :  { %v1219_v31 = vadd.f32 %v1218_v43, %v788_v37 }
 0x145   :  { %v1220_v45 = vpop.f32.mrf.mxu1 }
 0x146   :  { %v1221_v50 = vadd.f32 %v1220_v45, %v790_v42 }
 0x147   :  { %v1222_v48 = vpop.f32.mrf.mxu1 }
 0x148   :  { %v1223_v23 = vadd.f32 %v1222_v48, %v792_v30 }
 0x149   :  { %v1224_v36 = vpop.f32.mrf.mxu1 }
 0x14a   :  { %v1225_v39 = vadd.f32 %v1224_v36, %v794_v27 }
 0x152   :  { %v1261_v32 = vpop.f32.mrf.mxu0 }
 0x153   :  { %v1304_v28 = vpop.f32.mrf.mxu1  ;;  %v1262_v18 = vadd.f32 %v1261_v32, %v1219_v31 }
 0x154   :  { %v1263_v41 = vpop.f32.mrf.mxu0 }
 0x155   :  { %v1306_v52 = vpop.f32.mrf.mxu1  ;;  %v1305_v25 = vadd.f32 %v1304_v28, %v1262_v18  ;;  %v1264_v1 = vadd.f32 %v1263_v41, %v1221_v50 }
 0x156   :  { %v1265_v20 = vpop.f32.mrf.mxu0 }
 0x157   :  { %v1308_v61 = vpop.f32.mrf.mxu1  ;;  %v1325_v37 = vadd.f32 %v1318_v60, %v1305_v25  ;;  %v1307_v51 = vadd.f32 %v1306_v52, %v1264_v1  ;;  %v1266_v43 = vadd.f32 %v1265_v20, %v1223_v23 }
 0x158   :  { %v1267_v46 = vpop.f32.mrf.mxu0 }
 0x159   :  { %v1329_v59 = vmax.f32 %v1325_v37, 0.0  ;;  %v1326_v22 = vadd.f32 %v1322_v26, %v1307_v51  ;;  %v1309_v34 = vadd.f32 %v1308_v61, %v1266_v43  ;;  %v1268_v40 = vadd.f32 %v1267_v46, %v1225_v39  ;;  %v1310_v31 = vpop.f32.mrf.mxu1 }
 0x15b   :  { %v4325_v32 = vpack.c.bf16 %v1329_v59, %v1329_v59  ;;  %v1330_v45 = vmax.f32 %v1326_v22, 0.0  ;;  %v1327_v49 = vadd.f32 %v1318_v60, %v1309_v34  ;;  %v1311_v38 = vadd.f32 %v1310_v31, %v1268_v40 }
 0x15d   :  { %v5918_v35 = vunpack.c.l.b16 %v4325_v32  ;;  %v4326_v28 = vpack.c.bf16 %v1330_v45, %v1330_v45  ;;  %v1331_v30 = vmax.f32 %v1327_v49, 0.0  ;;  %v1328_v48 = vadd.f32 %v1322_v26, %v1311_v38  ;;  %v5944_v32 = vld [vmem:[%s7132_s3 + $0x270] ss:$8 sps:$4 sm:$0xff]  }
 0x15f   :  { %v5920_v42 = vunpack.c.l.b16 %v4326_v28  ;;  %v4327_v25 = vpack.c.bf16 %v1331_v30, %v1331_v30  ;;  %v1332_v27 = vmax.f32 %v1328_v48, 0.0  ;;  %v1414_v20 = vrot.slane %v5918_v35, 1 }
 0x160   :  { %v1866_v1 = vrot.slane %v5918_v35, 2  ;;  %v2112_v59 = vrot.slane %v5918_v35, 3  ;;  %v2425_v26 = vrot.slane %v5918_v35, 4  ;;  %v2478_v50 = vrot.slane %v5918_v35, 5 }
 0x161   :  { %v5923_v23 = vunpack.c.l.b16 %v4327_v25  ;;  %v4328_v36 = vpack.c.bf16 %v1332_v27, %v1332_v27  ;;  %v1417_v60 = vrot.slane %v5920_v42, 1  ;;  %v1869_v29 = vrot.slane %v5920_v42, 2 }
 0x162   :  { %v2115_v52 = vrot.slane %v5920_v42, 3  ;;  %v2428_v51 = vrot.slane %v5920_v42, 4 }
 0x163   :  { %v1413_v18 = vunpack.c.l.b16 %v4328_v36  ;;  %v1624_v41 = vrot.slane %v5923_v23, 7  ;;  %v1867_v61 = vrot.slane %v5923_v23, 1  ;;  %v1416_v39 = vsel %vm1415_vm4, %v5923_v23, %v1414_v20  ;;  %v5962_v36 = vld [vmem:[%s7132_s3 + $0x370] ss:$8 sps:$4 sm:$0xff]  }
 0x164   :  { %v2113_v37 = vrot.slane %v5923_v23, 2  ;;  %v2426_v43 = vrot.slane %v5923_v23, 3  ;;  %v2479_v40 = vrot.slane %v5923_v23, 4  ;;  %v1419_v28 = vpack.c.b16 %v1416_v39, %v1416_v39 }
 0x165   :  { %v1418_v46 = vsel %vm1415_vm4, %v1413_v18, %v1417_v60  ;;  %v1626_v22 = vrot.slane %v1413_v18, 7  ;;  %v1870_v34 = vrot.slane %v1413_v18, 1  ;;  %v1625_v45 = vsel %vm1415_vm4, %v1624_v41, %v5918_v35  ;;  %v5974_v41 = vld [vmem:[%s7132_s3 + $0x364] ss:$8 sps:$4 sm:$0xff]  }
 0x166   :  { %v1420_v31 = vpack.c.b16 %v1418_v46, %v1418_v46  ;;  %v2116_v49 = vrot.slane %v1413_v18, 2  ;;  %v5949_v38 = vsel %vm1415_vm4, %v1867_v61, %v1866_v1  ;;  %v5955_v25 = vsel %vm1415_vm4, %v2113_v37, %v2112_v59  ;;  %v5967_v1 = vld [vmem:[%s7132_s3 + $0x264] ss:$8 sps:$4 sm:$0xff]  }
 0x167   :  { %v1627_v30 = vsel %vm1415_vm4, %v1626_v22, %v5920_v42  ;;  %v1871_v48 = vsel %vm1415_vm4, %v1870_v34, %v1869_v29  ;;  %v2481_v29 = vrot.slane %v5920_v42, 5  ;;  %v1628_v59 = vpack.c.b16 %v1625_v45, %v1625_v45 }
 0x168   :  { %1615 = vmatprep.mubr.bf16.mxu0 %v1420_v31  ;;  %v1629_v27 = vpack.c.b16 %v1627_v30, %v1627_v30  ;;  %v5957_v20 = vpack.c.b16 %v1871_v48, %v1871_v48  ;;  %v2117_v60 = vsel %vm1415_vm4, %v2116_v49, %v2115_v52  ;;  %v2429_v61 = vrot.slane %v1413_v18, 3  ;;  %v5983_v52 = vld [vmem:[%s7132_s3 + $0x260] ss:$8 sps:$4 sm:$0xff]   ;;  %v6030_v48 = vld [vmem:[%s7132_s3 + $0x250] ss:$8 sps:$4 sm:$0xff]  }
 0x169   :  { %1616 = vmatmul.mubr.bf16.vlgmr.msra.gmra.mxu0 %v1419_v28  ;;  %v2482_v39 = vrot.slane %v1413_v18, 4  ;;  %v5977_v37 = vsel %vm1415_vm4, %v2426_v43, %v2425_v26  ;;  %v5985_v46 = vpack.c.b16 %v2117_v60, %v2117_v60  ;;  %v5988_v22 = vsel %vm1415_vm4, %v2479_v40, %v2478_v50  ;;  %v5995_v26 = vld [vmem:[%s7132_s3 + $0x254] ss:$8 sps:$4 sm:$0xff]   ;;  %v6009_v49 = vld [vmem:[%s7132_s3 + $0x360] ss:$8 sps:$4 sm:$0xff]  }
 0x16a   :  { %7316 = vst [vmem:[#allocation34_spill] sm:$0xff] %v5977_v37  ;;  %2037 = vmatpush1.bf16.msra.mxu0 %v5944_v32  ;;  %1824 = vmatprep.mubr.bf16.mxu1 %v1629_v27  ;;  %7317 = vst [vmem:[#allocation35_spill] sm:$0xff] %v5988_v22  ;;  %v2622_v34 = vrot.slane %v5920_v42, 6  ;;  %v2623_v31 = vrot.slane %v1413_v18, 5  ;;  %v5998_v43 = vsel %vm1415_vm4, %v2429_v61, %v2428_v51  ;;  %v2675_v50 = vrot.slane %v5920_v42, 7 }
 0x16b   :  { %2068 = vmatprep.mubr.bf16.mxu0 %v5957_v20  ;;  %1825 = vmatmul.mubr.bf16.vlgmr.msra.gmra.mxu1 %v1628_v59  ;;  %v6001_v45 = vsel %vm1415_vm4, %v2482_v39, %v2481_v29  ;;  %v2676_v40 = vrot.slane %v1413_v18, 6  ;;  %v6019_v42 = vld [vmem:[%s7132_s3 + $0x354] ss:$8 sps:$4 sm:$0xff]   ;;  %v2619_v51 = vrot.slane %v5918_v35, 6  ;;  %v2620_v30 = vrot.slane %v5923_v23, 5 }
 0x16c   :  { %2283 = vmatpush1.bf16.msra.mxu1 %v5962_v36  ;;  %2038 = vmatprep.subr.bf16.mxu0 %v5967_v1  ;;  %v6012_v28 = vsel %vm1415_vm4, %v2623_v31, %v2622_v34  ;;  %v2672_v27 = vrot.slane %v5918_v35, 7  ;;  %v2673_v60 = vrot.slane %v5923_v23, 6  ;;  %v6038_v29 = vld [vmem:[%s7132_s3 + $0x244] ss:$8 sps:$4 sm:$0xff]   ;;  %v6047_v61 = vld [vmem:[%s7132_s3 + $0x350] ss:$8 sps:$4 sm:$0xff]  }
 0x16d   :  { %7318 = vst [vmem:[#allocation36_spill] sm:$0xff] %v6012_v28  ;;  %2314 = vmatprep.mubr.bf16.mxu1 %v5985_v46  ;;  %2284 = vmatprep.subr.bf16.mxu1 %v5974_v41  ;;  %v6022_v18 = vsel %vm1415_vm4, %v2676_v40, %v2675_v50  ;;  %v6041_v59 = vsel %vm1415_vm4, %v2620_v30, %v2619_v51  ;;  %v6056_v23 = vld [vmem:[%s7132_s3 + $0x344] ss:$8 sps:$4 sm:$0xff]   ;;  %v6062_v39 = vld [vmem:[%s7132_s3 + $0x240] ss:$8 sps:$4 sm:$0xff]  }
 0x16e   :  { %7319 = vst [vmem:[#allocation37_spill] sm:$0xff] %v6022_v18  ;;  %2039 = vmatpush1.bf16.msra.mxu0 %v5983_v52  ;;  %7320 = vst [vmem:[#allocation38_spill] sm:$0xff] %v6041_v59  ;;  %v6050_v35 = vsel %vm1415_vm4, %v2673_v60, %v2672_v27  ;;  %v6068_v34 = vld [vmem:[%s7132_s3 + $0x234] ss:$8 sps:$4 sm:$0xff]   ;;  %v6074_v31 = vld [vmem:[%s7132_s3 + $0x340] ss:$8 sps:$4 sm:$0xff]  }
 0x16f   :  { %2040 = vmatprep.subr.bf16.mxu0 %v5995_v26  ;;  %7321 = vst [vmem:[#allocation39_spill] sm:$0xff] %v6050_v35  ;;  %v6080_v50 = vld [vmem:[%s7132_s3 + $0x334] ss:$8 sps:$4 sm:$0xff]   ;;  %v6086_v40 = vld [vmem:[%s7132_s3 + $0x230] ss:$8 sps:$4 sm:$0xff]  }
 0x170   :  { %2285 = vmatpush1.bf16.msra.mxu1 %v6009_v49  ;;  %v6092_v51 = vld [vmem:[%s7132_s3 + $0x224] ss:$8 sps:$4 sm:$0xff]   ;;  %v6098_v30 = vld [vmem:[%s7132_s3 + $0x330] ss:$8 sps:$4 sm:$0xff]   ;;  %v6110_v60 = vld [vmem:[%s7132_s3 + $0x220] ss:$8 sps:$4 sm:$0xff]  }
 0x171   :  { %2286 = vmatprep.subr.bf16.mxu1 %v6019_v42  ;;  %7322 = vst [vmem:[#allocation40_spill] sm:$0xff] %v6092_v51  ;;  %7323 = vst [vmem:[#allocation41_spill] sm:$0xff] %v6098_v30  ;;  %v6104_v27 = vld [vmem:[%s7132_s3 + $0x324] ss:$8 sps:$4 sm:$0xff]   ;;  %v6116_v35 = vld [vmem:[%s7132_s3 + $0x214] ss:$8 sps:$4 sm:$0xff]  }
 0x172   :  { %2041 = vmatpush1.bf16.msra.mxu0 %v6030_v48  ;;  %7324 = vst [vmem:[#allocation42_spill] sm:$0xff] %v6104_v27  ;;  %7325 = vst [vmem:[#allocation43_spill] sm:$0xff] %v6110_v60  ;;  %v6122_v59 = vld [vmem:[%s7132_s3 + $0x320] ss:$8 sps:$4 sm:$0xff]   ;;  %v6134_v18 = vld [vmem:[%s7132_s3 + $0x210] ss:$8 sps:$4 sm:$0xff]  }
 0x173   :  { %2042 = vmatprep.subr.bf16.mxu0 %v6038_v29  ;;  %7326 = vst [vmem:[#allocation44_spill] sm:$0xff] %v6116_v35  ;;  %7327 = vst [vmem:[#allocation45_spill] sm:$0xff] %v6122_v59  ;;  %v6140_v28 = vld [vmem:[%s7132_s3 + $0x204] ss:$8 sps:$4 sm:$0xff]   ;;  %v6146_v22 = vld [vmem:[%s7132_s3 + $0x310] ss:$8 sps:$4 sm:$0xff]  }
 0x174   :  { %2287 = vmatpush1.bf16.msra.mxu1 %v6047_v61  ;;  %7329 = vst [vmem:[#allocation47_spill] sm:$0xff] %v6134_v18  ;;  %7330 = vst [vmem:[#allocation48_spill] sm:$0xff] %v6140_v28  ;;  %v6152_v37 = vld [vmem:[%s7132_s3 + $0x304] ss:$8 sps:$4 sm:$0xff]  }
 0x175   :  { %2288 = vmatprep.subr.bf16.mxu1 %v6056_v23  ;;  %7331 = vst [vmem:[#allocation49_spill] sm:$0xff] %v6146_v22  ;;  %7332 = vst [vmem:[#allocation50_spill] sm:$0xff] %v6152_v37 }
 0x176   :  { %2043 = vmatpush1.bf16.msra.mxu0 %v6062_v39 }
 0x177   :  { %2044 = vmatprep.subr.bf16.mxu0 %v6068_v34 }
 0x178   :  { %2289 = vmatpush1.bf16.msra.mxu1 %v6074_v31 }
 0x179   :  { %2290 = vmatprep.subr.bf16.mxu1 %v6080_v50 }
 0x17a   :  { %2045 = vmatpush1.bf16.msra.mxu0 %v6086_v40 }
 0x17b   :  { %2046 = vmatprep.subr.bf16.mxu0 %v6092_v51 }
 0x17c   :  { %2291 = vmatpush1.bf16.msra.mxu1 %v6098_v30 }
 0x17d   :  { %2292 = vmatprep.subr.bf16.mxu1 %v6104_v27 }
 0x17e   :  { %2047 = vmatpush1.bf16.msra.mxu0 %v6110_v60 }
 0x17f   :  { %2048 = vmatprep.subr.bf16.mxu0 %v6116_v35  ;;  %v6158_v35 = vld [vmem:[%s7132_s3 + $0x200] ss:$8 sps:$4 sm:$0xff]  }
 0x180   :  { %2293 = vmatpush1.bf16.msra.mxu1 %v6122_v59  ;;  %7333 = vst [vmem:[#allocation51_spill] sm:$0xff] %v6158_v35  ;;  %v6164_v59 = vld [vmem:[%s7132_s3 + $0x2f4] ss:$8 sps:$4 sm:$0xff]  }
 0x181   :  { %2294 = vmatprep.subr.bf16.mxu1 %v6128_v33  ;;  %7334 = vst [vmem:[#allocation52_spill] sm:$0xff] %v6164_v59  ;;  %v6170_v33 = vld [vmem:[%s7132_s3 + $0x300] ss:$8 sps:$4 sm:$0xff]  }
 0x182   :  { %2049 = vmatpush1.bf16.msra.mxu0 %v6134_v18  ;;  %7335 = vst [vmem:[#allocation53_spill] sm:$0xff] %v6170_v33  ;;  %v6176_v18 = vld [vmem:[%s7132_s3 + $0x3f4] ss:$8 sps:$4 sm:$0xff]  }
 0x183   :  { %2050 = vmatprep.subr.bf16.mxu0 %v6140_v28  ;;  %7336 = vst [vmem:[#allocation54_spill] sm:$0xff] %v6176_v18  ;;  %v6182_v28 = vld [vmem:[%s7132_s3 + $0x2f0] ss:$8 sps:$4 sm:$0xff]  }
 0x184   :  { %2295 = vmatpush1.bf16.msra.mxu1 %v6146_v22  ;;  %7337 = vst [vmem:[#allocation55_spill] sm:$0xff] %v6182_v28  ;;  %v6188_v22 = vld [vmem:[%s7132_s3 + $0x2e4] ss:$8 sps:$4 sm:$0xff]  }
 0x185   :  { %2296 = vmatprep.subr.bf16.mxu1 %v6152_v37  ;;  %7338 = vst [vmem:[#allocation56_spill] sm:$0xff] %v6188_v22  ;;  %v6194_v37 = vld [vmem:[%s7132_s3 + $0x3f0] ss:$8 sps:$4 sm:$0xff]  }
 0x186   :  { %2051 = vmatpush1.bf16.msra.mxu0 %v6158_v35  ;;  %7339 = vst [vmem:[#allocation57_spill] sm:$0xff] %v6194_v37  ;;  %v6200_v35 = vld [vmem:[%s7132_s3 + $0x3e4] ss:$8 sps:$4 sm:$0xff]  }
 0x187   :  { %2052 = vmatprep.subr.bf16.mxu0 %v6164_v59  ;;  %7340 = vst [vmem:[#allocation58_spill] sm:$0xff] %v6200_v35  ;;  %v6206_v59 = vld [vmem:[%s7132_s3 + $0x2e0] ss:$8 sps:$4 sm:$0xff]  }
 0x188   :  { %2297 = vmatpush1.bf16.msra.mxu1 %v6170_v33  ;;  %7341 = vst [vmem:[#allocation59_spill] sm:$0xff] %v6206_v59  ;;  %v6212_v33 = vld [vmem:[%s7132_s3 + $0x2d4] ss:$8 sps:$4 sm:$0xff]  }
 0x189   :  { %2298 = vmatprep.subr.bf16.mxu1 %v6176_v18  ;;  %7342 = vst [vmem:[#allocation60_spill] sm:$0xff] %v6212_v33  ;;  %v6218_v18 = vld [vmem:[%s7132_s3 + $0x3e0] ss:$8 sps:$4 sm:$0xff]  }
 0x18a   :  { %2053 = vmatpush2.bf16.msra.mxu0 %v6182_v28  ;;  %7343 = vst [vmem:[#allocation61_spill] sm:$0xff] %v6218_v18  ;;  %v6224_v28 = vld [vmem:[%s7132_s3 + $0x3d4] ss:$8 sps:$4 sm:$0xff]  }
 0x18b   :  { %2054 = vmatprep.subr.bf16.mxu0 %v6188_v22  ;;  %7344 = vst [vmem:[#allocation62_spill] sm:$0xff] %v6224_v28  ;;  %v6230_v22 = vld [vmem:[%s7132_s3 + $0x2d0] ss:$8 sps:$4 sm:$0xff]  }
 0x18c   :  { %2299 = vmatpush2.bf16.msra.mxu1 %v6194_v37  ;;  %7345 = vst [vmem:[#allocation63_spill] sm:$0xff] %v6230_v22  ;;  %v6236_v37 = vld [vmem:[%s7132_s3 + $0x2c4] ss:$8 sps:$4 sm:$0xff]  }
 0x18d   :  { %2300 = vmatprep.subr.bf16.mxu1 %v6200_v35  ;;  %7346 = vst [vmem:[#allocation64_spill] sm:$0xff] %v6236_v37  ;;  %v6242_v35 = vld [vmem:[%s7132_s3 + $0x3d0] ss:$8 sps:$4 sm:$0xff]  }
 0x18e   :  { %2055 = vmatpush2.bf16.msra.mxu0 %v6206_v59  ;;  %7347 = vst [vmem:[#allocation65_spill] sm:$0xff] %v6242_v35  ;;  %v6248_v59 = vld [vmem:[%s7132_s3 + $0x3c4] ss:$8 sps:$4 sm:$0xff]  }
 0x18f   :  { %2056 = vmatprep.subr.bf16.mxu0 %v6212_v33  ;;  %7348 = vst [vmem:[#allocation66_spill] sm:$0xff] %v6248_v59  ;;  %v6254_v33 = vld [vmem:[%s7132_s3 + $0x2c0] ss:$8 sps:$4 sm:$0xff]  }
 0x190   :  { %2301 = vmatpush2.bf16.msra.mxu1 %v6218_v18  ;;  %7349 = vst [vmem:[#allocation67_spill] sm:$0xff] %v6254_v33  ;;  %v6260_v18 = vld [vmem:[%s7132_s3 + $0x2b4] ss:$8 sps:$4 sm:$0xff]  }
 0x191   :  { %2302 = vmatprep.subr.bf16.mxu1 %v6224_v28  ;;  %7350 = vst [vmem:[#allocation68_spill] sm:$0xff] %v6260_v18  ;;  %v6266_v28 = vld [vmem:[%s7132_s3 + $0x3c0] ss:$8 sps:$4 sm:$0xff]  }
 0x192   :  { %2057 = vmatpush2.bf16.msra.mxu0 %v6230_v22  ;;  %7351 = vst [vmem:[#allocation69_spill] sm:$0xff] %v6266_v28  ;;  %v6272_v22 = vld [vmem:[%s7132_s3 + $0x3b4] ss:$8 sps:$4 sm:$0xff]  }
 0x193   :  { %2058 = vmatprep.subr.bf16.mxu0 %v6236_v37  ;;  %7352 = vst [vmem:[#allocation70_spill] sm:$0xff] %v6272_v22  ;;  %v6278_v37 = vld [vmem:[%s7132_s3 + $0x2b0] ss:$8 sps:$4 sm:$0xff]  }
 0x194   :  { %2303 = vmatpush2.bf16.msra.mxu1 %v6242_v35  ;;  %7353 = vst [vmem:[#allocation71_spill] sm:$0xff] %v6278_v37  ;;  %v6284_v35 = vld [vmem:[%s7132_s3 + $0x2a4] ss:$8 sps:$4 sm:$0xff]  }
 0x195   :  { %2304 = vmatprep.subr.bf16.mxu1 %v6248_v59  ;;  %7354 = vst [vmem:[#allocation72_spill] sm:$0xff] %v6284_v35  ;;  %v6290_v59 = vld [vmem:[%s7132_s3 + $0x3b0] ss:$8 sps:$4 sm:$0xff]  }
 0x196   :  { %2059 = vmatpush2.bf16.msra.mxu0 %v6254_v33  ;;  %7355 = vst [vmem:[#allocation73_spill] sm:$0xff] %v6290_v59  ;;  %v6296_v33 = vld [vmem:[%s7132_s3 + $0x3a4] ss:$8 sps:$4 sm:$0xff]  }
 0x197   :  { %2060 = vmatprep.subr.bf16.mxu0 %v6260_v18  ;;  %7356 = vst [vmem:[#allocation74_spill] sm:$0xff] %v6296_v33  ;;  %v6302_v18 = vld [vmem:[%s7132_s3 + $0x2a0] ss:$8 sps:$4 sm:$0xff]  }
 0x198   :  { %2305 = vmatpush2.bf16.msra.mxu1 %v6266_v28  ;;  %7357 = vst [vmem:[#allocation75_spill] sm:$0xff] %v6302_v18  ;;  %v6308_v28 = vld [vmem:[%s7132_s3 + $0x294] ss:$8 sps:$4 sm:$0xff]  }
 0x199   :  { %2306 = vmatprep.subr.bf16.mxu1 %v6272_v22  ;;  %7358 = vst [vmem:[#allocation76_spill] sm:$0xff] %v6308_v28  ;;  %v6314_v22 = vld [vmem:[%s7132_s3 + $0x3a0] ss:$8 sps:$4 sm:$0xff]  }
 0x19a   :  { %2061 = vmatpush2.bf16.msra.mxu0 %v6278_v37  ;;  %7359 = vst [vmem:[#allocation77_spill] sm:$0xff] %v6314_v22  ;;  %v6320_v37 = vld [vmem:[%s7132_s3 + $0x394] ss:$8 sps:$4 sm:$0xff]  }
 0x19b   :  { %2062 = vmatprep.subr.bf16.mxu0 %v6284_v35  ;;  %7360 = vst [vmem:[#allocation78_spill] sm:$0xff] %v6320_v37  ;;  %v6326_v35 = vld [vmem:[%s7132_s3 + $0x290] ss:$8 sps:$4 sm:$0xff]  }
 0x19c   :  { %2307 = vmatpush2.bf16.msra.mxu1 %v6290_v59  ;;  %7361 = vst [vmem:[#allocation79_spill] sm:$0xff] %v6326_v35  ;;  %v6332_v59 = vld [vmem:[%s7132_s3 + $0x284] ss:$8 sps:$4 sm:$0xff]  }
 0x19d   :  { %2308 = vmatprep.subr.bf16.mxu1 %v6296_v33  ;;  %7362 = vst [vmem:[#allocation80_spill] sm:$0xff] %v6332_v59  ;;  %v6338_v33 = vld [vmem:[%s7132_s3 + $0x390] ss:$8 sps:$4 sm:$0xff]  }
 0x19e   :  { %2063 = vmatpush2.bf16.msra.mxu0 %v6302_v18  ;;  %7363 = vst [vmem:[#allocation81_spill] sm:$0xff] %v6338_v33  ;;  %v6344_v18 = vld [vmem:[%s7132_s3 + $0x384] ss:$8 sps:$4 sm:$0xff]  }
 0x19f   :  { %2064 = vmatprep.subr.bf16.mxu0 %v6308_v28  ;;  %7364 = vst [vmem:[#allocation82_spill] sm:$0xff] %v6344_v18  ;;  %v6350_v28 = vld [vmem:[%s7132_s3 + $0x280] ss:$8 sps:$4 sm:$0xff]  }
 0x1a0   :  { %2309 = vmatpush2.bf16.msra.mxu1 %v6314_v22  ;;  %7365 = vst [vmem:[#allocation83_spill] sm:$0xff] %v6350_v28 }
 0x1a1   :  { %2310 = vmatprep.subr.bf16.mxu1 %v6320_v37  ;;  %v6357_v37 = vld [vmem:[%s7132_s3 + $0x380] ss:$8 sps:$4 sm:$0xff]  }
 0x1a2   :  { %2065 = vmatpush2.bf16.msra.mxu0 %v6326_v35  ;;  %7366 = vst [vmem:[#allocation84_spill] sm:$0xff] %v6357_v37  ;;  %v6363_v35 = vpack.c.b16 %v5949_v38, %v5949_v38  ;;  %v6381_v38 = vld [vmem:[%s7132_s3 + $0x170] ss:$8 sps:$4 sm:$0xff]  }
 0x1a3   :  { %2066 = vmatprep.subr.bf16.mxu0 %v6332_v59 }
 0x1a4   :  { %2311 = vmatpush2.bf16.msra.mxu1 %v6338_v33  ;;  %v6370_v33 = vpack.c.b16 %v5955_v25, %v5955_v25  ;;  %v6395_v25 = vld [vmem:[%s7132_s3 + $0x70] ss:$8 sps:$4 sm:$0xff]  }
 0x1a5   :  { %2312 = vmatprep.subr.bf16.mxu1 %v6344_v18  ;;  %v6375_v18 = vld [vmem:[%s7132_s3 + $0x74] ss:$8 sps:$4 sm:$0xff]   ;;  %7368 = vst [vmem:[#allocation86_spill] sm:$0xff] %v6395_v25 }
 0x1a6   :  { %2067 = vmatpush2.bf16.msra.mxu0 %v6350_v28 }
 0x1a7   :  { %2343 = vmatprep.subr.bf16.mxu0 %v5545_v44  ;;  %v6389_v44 = vld [vmem:[%s7132_s3 + $0x164] ss:$8 sps:$4 sm:$0xff]  }
 0x1a8   :  { %2313 = vmatpush2.bf16.msra.mxu1 %v6357_v37  ;;  %7367 = vst [vmem:[#allocation85_spill] sm:$0xff] %v6389_v44 }
 0x1a9   :  { %2069 = vmatmul.mubr.bf16.vlgmr.msra.gmra.mxu0 %v6363_v35  ;;  %2384 = vmatprep.subr.bf16.mxu1 %v6375_v18 }
 0x1aa   :  { %2344 = vmatpush1.bf16.msra.mxu0 %v6381_v38  ;;  %2375 = vmatprep.mubr.bf16.mxu0 %v5985_v46  ;;  %v6402_v46 = vld [vmem:[%s7132_s3 + $0x64] ss:$8 sps:$4 sm:$0xff]  }
 0x1ab   :  { %2315 = vmatmul.mubr.bf16.vlgmr.msra.gmra.mxu1 %v6370_v33  ;;  %2345 = vmatprep.subr.bf16.mxu0 %v6389_v44  ;;  %7369 = vst [vmem:[#allocation87_spill] sm:$0xff] %v6402_v46  ;;  %v6408_v44 = vld [vmem:[%s7132_s3 + $0x160] ss:$8 sps:$4 sm:$0xff]  }
 0x1ac   :  { %2385 = vmatpush1.bf16.msra.mxu1 %v6395_v25  ;;  %2416 = vmatprep.mubr.bf16.mxu1 %v5957_v20  ;;  %v6414_v25 = vld [vmem:[%s7132_s3 + $0x154] ss:$8 sps:$4 sm:$0xff]   ;;  %v6420_v20 = vld [vmem:[%s7132_s3 + $0x60] ss:$8 sps:$4 sm:$0xff]  }
 0x1ad   :  { %2386 = vmatprep.subr.bf16.mxu1 %v6402_v46  ;;  %7370 = vst [vmem:[#allocation88_spill] sm:$0xff] %v6414_v25  ;;  %v6426_v46 = vld [vmem:[%s7132_s3 + $0x54] ss:$8 sps:$4 sm:$0xff]  }
 0x1ae   :  { %2346 = vmatpush1.bf16.msra.mxu0 %v6408_v44 }
 0x1af   :  { %2347 = vmatprep.subr.bf16.mxu0 %v6414_v25  ;;  %v6434_v25 = vld [vmem:[%s7132_s3 + $0x50] ss:$8 sps:$4 sm:$0xff]  }
 0x1b0   :  { %2387 = vmatpush1.bf16.msra.mxu1 %v6420_v20 }
 0x1b1   :  { %2388 = vmatprep.subr.bf16.mxu1 %v6426_v46 }
 0x1b2   :  { %2348 = vmatpush1.bf16.msra.mxu0 %v5575_v47  ;;  %v7371_v47 = vld [vmem:[#allocation5_spill] sm:$0xff] }
 0x1b3   :  { %2349 = vmatprep.subr.bf16.mxu0 %v5583_v53  ;;  %v7372_v53 = vld [vmem:[#allocation7_spill] sm:$0xff] }
 0x1b4   :  { %2389 = vmatpush1.bf16.msra.mxu1 %v6434_v25 }
 0x1b5   :  { %2390 = vmatprep.subr.bf16.mxu1 %v5588_v54  ;;  %v7373_v54 = vld [vmem:[#allocation6_spill] sm:$0xff] }
 0x1b6   :  { %2350 = vmatpush1.bf16.msra.mxu0 %v5593_v55  ;;  %v7374_v55 = vld [vmem:[#allocation9_spill] sm:$0xff] }
 0x1b7   :  { %2351 = vmatprep.subr.bf16.mxu0 %v5603_v57  ;;  %v7376_v57 = vld [vmem:[#allocation11_spill] sm:$0xff] }
 0x1b8   :  { %2391 = vmatpush1.bf16.msra.mxu1 %v5598_v56  ;;  %v7375_v56 = vld [vmem:[#allocation8_spill] sm:$0xff] }
 0x1b9   :  { %2392 = vmatprep.subr.bf16.mxu1 %v5609_v58  ;;  %v7377_v58 = vld [vmem:[#allocation10_spill] sm:$0xff] }
 0x1ba   :  { %2352 = vmatpush1.bf16.msra.mxu0 %v5616_v62  ;;  %v7378_v62 = vld [vmem:[#allocation13_spill] sm:$0xff] }
 0x1bb   :  { %2353 = vmatprep.subr.bf16.mxu0 %v5626_v0  ;;  %v7380_v0 = vld [vmem:[#allocation15_spill] sm:$0xff] }
 0x1bc   :  { %2393 = vmatpush1.bf16.msra.mxu1 %v5621_v63  ;;  %v7379_v63 = vld [vmem:[#allocation12_spill] sm:$0xff] }
 0x1bd   :  { %2394 = vmatprep.subr.bf16.mxu1 %v5632_v2  ;;  %v7381_v2 = vld [vmem:[#allocation14_spill] sm:$0xff] }
 0x1be   :  { %2354 = vmatpush1.bf16.msra.mxu0 %v5640_v3  ;;  %v7382_v3 = vld [vmem:[#allocation17_spill] sm:$0xff] }
 0x1bf   :  { %2355 = vmatprep.subr.bf16.mxu0 %v5650_v5  ;;  %v7384_v5 = vld [vmem:[#allocation19_spill] sm:$0xff] }
 0x1c0   :  { %2395 = vmatpush1.bf16.msra.mxu1 %v5645_v4  ;;  %v7383_v4 = vld [vmem:[#allocation16_spill] sm:$0xff] }
 0x1c1   :  { %2396 = vmatprep.subr.bf16.mxu1 %v5668_v7  ;;  %v7386_v7 = vld [vmem:[#allocation21_spill] sm:$0xff] }
 0x1c2   :  { %2356 = vmatpush1.bf16.msra.mxu0 %v5659_v6  ;;  %v7385_v6 = vld [vmem:[#allocation18_spill] sm:$0xff] }
 0x1c3   :  { %2357 = vmatprep.subr.bf16.mxu0 %v5679_v9  ;;  %v7388_v9 = vld [vmem:[#allocation23_spill] sm:$0xff] }
 0x1c4   :  { %2397 = vmatpush1.bf16.msra.mxu1 %v5673_v8  ;;  %v7387_v8 = vld [vmem:[#allocation20_spill] sm:$0xff] }
 0x1c5   :  { %2398 = vmatprep.subr.bf16.mxu1 %v5691_v11  ;;  %v7390_v11 = vld [vmem:[#allocation25_spill] sm:$0xff] }
 0x1c6   :  { %2358 = vmatpush1.bf16.msra.mxu0 %v5685_v10  ;;  %v7389_v10 = vld [vmem:[#allocation22_spill] sm:$0xff] }
 0x1c7   :  { %2359 = vmatprep.subr.bf16.mxu0 %v5703_v13  ;;  %v7392_v13 = vld [vmem:[#allocation28_spill] sm:$0xff] }
 0x1c8   :  { %2399 = vmatpush1.bf16.msra.mxu1 %v5697_v12  ;;  %v7391_v12 = vld [vmem:[#allocation24_spill] sm:$0xff] }
 0x1c9   :  { %2400 = vmatprep.subr.bf16.mxu1 %v5715_v15  ;;  %v7394_v15 = vld [vmem:[#allocation29_spill] sm:$0xff] }
 0x1ca   :  { %2360 = vmatpush2.bf16.msra.mxu0 %v5709_v14  ;;  %v7393_v14 = vld [vmem:[#allocation26_spill] sm:$0xff] }
 0x1cb   :  { %2361 = vmatprep.subr.bf16.mxu0 %v5731_v19  ;;  %v7396_v19 = vld [vmem:[#allocation30_spill] sm:$0xff] }
 0x1cc   :  { %2401 = vmatpush2.bf16.msra.mxu1 %v5721_v16  ;;  %v7395_v16 = vld [vmem:[#allocation27_spill] sm:$0xff] }
 0x1cd   :  { %2402 = vmatprep.subr.bf16.mxu1 %v5742_v21  ;;  %v6499_v21 = vpack.c.b16 %v6001_v45, %v6001_v45  ;;  %v7400_v45 = vld [vmem:[#allocation47_spill] sm:$0xff] }
 0x1ce   :  { %2362 = vmatpush2.bf16.msra.mxu0 %v5726_v17  ;;  %v6491_v17 = vpack.c.b16 %v5998_v43, %v5998_v43  ;;  %v7399_v43 = vld [vmem:[#allocation46_spill] sm:$0xff] }
 0x1cf   :  { %2363 = vmatprep.subr.bf16.mxu0 %v5754_v24  ;;  %v7397_v24 = vld [vmem:[#allocation44_spill] sm:$0xff] }
 0x1d0   :  { %2403 = vmatpush2.bf16.msra.mxu1 %v7371_v47  ;;  %v7402_v47 = vld [vmem:[#allocation49_spill] sm:$0xff] }
 0x1d1   :  { %2404 = vmatprep.subr.bf16.mxu1 %v7372_v53 }
 0x1d2   :  { %2364 = vmatpush2.bf16.msra.mxu0 %v7373_v54  ;;  %v7403_v54 = vld [vmem:[#allocation50_spill] sm:$0xff] }
 0x1d3   :  { %2365 = vmatprep.subr.bf16.mxu0 %v7374_v55 }
 0x1d4   :  { %2405 = vmatpush2.bf16.msra.mxu1 %v7375_v56 }
 0x1d5   :  { %2406 = vmatprep.subr.bf16.mxu1 %v7376_v57 }
 0x1d6   :  { %2366 = vmatpush2.bf16.msra.mxu0 %v7377_v58 }
 0x1d7   :  { %2367 = vmatprep.subr.bf16.mxu0 %v7378_v62 }
 0x1d8   :  { %2407 = vmatpush2.bf16.msra.mxu1 %v7379_v63 }
 0x1d9   :  { %2408 = vmatprep.subr.bf16.mxu1 %v7380_v0 }
 0x1da   :  { %2368 = vmatpush2.bf16.msra.mxu0 %v7381_v2 }
 0x1db   :  { %2369 = vmatprep.subr.bf16.mxu0 %v7382_v3 }
 0x1dc   :  { %2409 = vmatpush2.bf16.msra.mxu1 %v7383_v4 }
 0x1dd   :  { %2410 = vmatprep.subr.bf16.mxu1 %v7384_v5 }
 0x1de   :  { %2370 = vmatpush2.bf16.msra.mxu0 %v7385_v6 }
 0x1df   :  { %2371 = vmatprep.subr.bf16.mxu0 %v7386_v7 }
 0x1e0   :  { %2411 = vmatpush2.bf16.msra.mxu1 %v7387_v8 }
 0x1e1   :  { %2412 = vmatprep.subr.bf16.mxu1 %v7388_v9 }
 0x1e2   :  { %2372 = vmatpush2.bf16.msra.mxu0 %v7389_v10 }
 0x1e3   :  { %2373 = vmatprep.subr.bf16.mxu0 %v7390_v11 }
 0x1e4   :  { %2413 = vmatpush2.bf16.msra.mxu1 %v7391_v12 }
 0x1e5   :  { %2414 = vmatprep.subr.bf16.mxu1 %v7392_v13 }
 0x1e6   :  { %2374 = vmatpush2.bf16.msra.mxu0 %v7393_v14 }
 0x1e7   :  { %2435 = vmatprep.subr.bf16.mxu0 %v7394_v15 }
 0x1e8   :  { %2415 = vmatpush2.bf16.msra.mxu1 %v7395_v16 }
 0x1e9   :  { %2376 = vmatmul.mubr.bf16.vlgmr.msra.gmra.mxu0 %v6370_v33  ;;  %2488 = vmatprep.subr.bf16.mxu1 %v7396_v19  ;;  %v7398_v33 = vld [vmem:[#allocation45_spill] sm:$0xff] }
 0x1ea   :  { %2436 = vmatpush1.bf16.msra.mxu0 %v5944_v32  ;;  %2467 = vmatprep.mubr.bf16.mxu0 %v6491_v17 }
 0x1eb   :  { %2417 = vmatmul.mubr.bf16.vlgmr.msra.gmra.mxu1 %v6363_v35  ;;  %2437 = vmatprep.subr.bf16.mxu0 %v5967_v1  ;;  %v7401_v35 = vld [vmem:[#allocation48_spill] sm:$0xff] }
 0x1ec   :  { %2489 = vmatpush1.bf16.msra.mxu1 %v5962_v36  ;;  %2520 = vmatprep.mubr.bf16.mxu1 %v6499_v21 }
 0x1ed   :  { %2490 = vmatprep.subr.bf16.mxu1 %v5974_v41 }
 0x1ee   :  { %2438 = vmatpush1.bf16.msra.mxu0 %v5983_v52 }
 0x1ef   :  { %2439 = vmatprep.subr.bf16.mxu0 %v5995_v26 }
 0x1f0   :  { %2491 = vmatpush1.bf16.msra.mxu1 %v6009_v49 }
 0x1f1   :  { %2492 = vmatprep.subr.bf16.mxu1 %v6019_v42 }
 0x1f2   :  { %2440 = vmatpush1.bf16.msra.mxu0 %v6030_v48 }
 0x1f3   :  { %2441 = vmatprep.subr.bf16.mxu0 %v6038_v29 }
 0x1f4   :  { %2493 = vmatpush1.bf16.msra.mxu1 %v6047_v61 }
 0x1f5   :  { %2494 = vmatprep.subr.bf16.mxu1 %v6056_v23 }
 0x1f6   :  { %2442 = vmatpush1.bf16.msra.mxu0 %v6062_v39 }
 0x1f7   :  { %2443 = vmatprep.subr.bf16.mxu0 %v6068_v34 }
 0x1f8   :  { %2495 = vmatpush1.bf16.msra.mxu1 %v6074_v31 }
 0x1f9   :  { %2496 = vmatprep.subr.bf16.mxu1 %v6080_v50 }
 0x1fa   :  { %2444 = vmatpush1.bf16.msra.mxu0 %v6086_v40 }
 0x1fb   :  { %2445 = vmatprep.subr.bf16.mxu0 %v6092_v51  ;;  %v7404_v51 = vld [vmem:[#allocation51_spill] sm:$0xff] }
 0x1fc   :  { %2497 = vmatpush1.bf16.msra.mxu1 %v6098_v30  ;;  %v7405_v30 = vld [vmem:[#allocation52_spill] sm:$0xff] }
 0x1fd   :  { %2498 = vmatprep.subr.bf16.mxu1 %v6104_v27  ;;  %v7406_v27 = vld [vmem:[#allocation53_spill] sm:$0xff] }
 0x1fe   :  { %2446 = vmatpush1.bf16.msra.mxu0 %v6110_v60  ;;  %v7407_v60 = vld [vmem:[#allocation54_spill] sm:$0xff] }
 0x1ff   :  { %2447 = vmatprep.subr.bf16.mxu0 %v7397_v24  ;;  %v7408_v24 = vld [vmem:[#allocation55_spill] sm:$0xff] }
 0x200   :  { %2499 = vmatpush1.bf16.msra.mxu1 %v7398_v33  ;;  %v7409_v33 = vld [vmem:[#allocation56_spill] sm:$0xff] }
 0x201   :  { %2500 = vmatprep.subr.bf16.mxu1 %v7399_v43  ;;  %v7410_v43 = vld [vmem:[#allocation57_spill] sm:$0xff] }
 0x202   :  { %2448 = vmatpush1.bf16.msra.mxu0 %v7400_v45  ;;  %v7411_v45 = vld [vmem:[#allocation58_spill] sm:$0xff] }
 0x203   :  { %2449 = vmatprep.subr.bf16.mxu0 %v7401_v35  ;;  %v7412_v35 = vld [vmem:[#allocation59_spill] sm:$0xff] }
 0x204   :  { %2501 = vmatpush1.bf16.msra.mxu1 %v7402_v47  ;;  %v7413_v47 = vld [vmem:[#allocation60_spill] sm:$0xff] }
 0x205   :  { %2502 = vmatprep.subr.bf16.mxu1 %v7403_v54  ;;  %v7414_v54 = vld [vmem:[#allocation61_spill] sm:$0xff] }
 0x206   :  { %2450 = vmatpush1.bf16.msra.mxu0 %v7404_v51  ;;  %v7415_v51 = vld [vmem:[#allocation62_spill] sm:$0xff] }
 0x207   :  { %2451 = vmatprep.subr.bf16.mxu0 %v7405_v30  ;;  %v7416_v30 = vld [vmem:[#allocation63_spill] sm:$0xff] }
 0x208   :  { %2503 = vmatpush1.bf16.msra.mxu1 %v7406_v27  ;;  %v7417_v27 = vld [vmem:[#allocation64_spill] sm:$0xff] }
 0x209   :  { %2504 = vmatprep.subr.bf16.mxu1 %v7407_v60  ;;  %v7418_v60 = vld [vmem:[#allocation65_spill] sm:$0xff] }
 0x20a   :  { %2452 = vmatpush2.bf16.msra.mxu0 %v7408_v24  ;;  %v7419_v24 = vld [vmem:[#allocation66_spill] sm:$0xff] }
 0x20b   :  { %2453 = vmatprep.subr.bf16.mxu0 %v7409_v33  ;;  %v7420_v33 = vld [vmem:[#allocation67_spill] sm:$0xff] }
 0x20c   :  { %2505 = vmatpush2.bf16.msra.mxu1 %v7410_v43  ;;  %v7421_v43 = vld [vmem:[#allocation68_spill] sm:$0xff] }
 0x20d   :  { %2506 = vmatprep.subr.bf16.mxu1 %v7411_v45  ;;  %v7422_v45 = vld [vmem:[#allocation69_spill] sm:$0xff] }
 0x20e   :  { %2454 = vmatpush2.bf16.msra.mxu0 %v7412_v35  ;;  %v7423_v35 = vld [vmem:[#allocation70_spill] sm:$0xff] }
 0x20f   :  { %2455 = vmatprep.subr.bf16.mxu0 %v7413_v47  ;;  %v7424_v47 = vld [vmem:[#allocation71_spill] sm:$0xff] }
 0x210   :  { %2507 = vmatpush2.bf16.msra.mxu1 %v7414_v54  ;;  %v7425_v54 = vld [vmem:[#allocation72_spill] sm:$0xff] }
 0x211   :  { %2508 = vmatprep.subr.bf16.mxu1 %v7415_v51  ;;  %v7426_v51 = vld [vmem:[#allocation73_spill] sm:$0xff] }
 0x212   :  { %2456 = vmatpush2.bf16.msra.mxu0 %v7416_v30  ;;  %v7427_v30 = vld [vmem:[#allocation74_spill] sm:$0xff] }
 0x213   :  { %2457 = vmatprep.subr.bf16.mxu0 %v7417_v27  ;;  %v7428_v27 = vld [vmem:[#allocation75_spill] sm:$0xff] }
 0x214   :  { %2509 = vmatpush2.bf16.msra.mxu1 %v7418_v60  ;;  %v7429_v60 = vld [vmem:[#allocation76_spill] sm:$0xff] }
 0x215   :  { %2510 = vmatprep.subr.bf16.mxu1 %v7419_v24 }
 0x216   :  { %2458 = vmatpush2.bf16.msra.mxu0 %v7420_v33  ;;  %v7430_v33 = vld [vmem:[#allocation78_spill] sm:$0xff] }
 0x217   :  { %2459 = vmatprep.subr.bf16.mxu0 %v7421_v43  ;;  %v7431_v43 = vld [vmem:[#allocation79_spill] sm:$0xff] }
 0x218   :  { %2511 = vmatpush2.bf16.msra.mxu1 %v7422_v45 }
 0x219   :  { %2512 = vmatprep.subr.bf16.mxu1 %v7423_v35  ;;  %v7432_v35 = vld [vmem:[#allocation81_spill] sm:$0xff] }
 0x21a   :  { %2460 = vmatpush2.bf16.msra.mxu0 %v7424_v47  ;;  %v7433_v47 = vld [vmem:[#allocation82_spill] sm:$0xff] }
 0x21b   :  { %2461 = vmatprep.subr.bf16.mxu0 %v7425_v54 }
 0x21c   :  { %2513 = vmatpush2.bf16.msra.mxu1 %v7426_v51  ;;  %v7434_v51 = vld [vmem:[#allocation34_spill] sm:$0xff] }
 0x21d   :  { %2514 = vmatprep.subr.bf16.mxu1 %v7427_v30  ;;  %v6565_v30 = vpack.c.b16 %v7434_v51, %v7434_v51 }
 0x21e   :  { %2462 = vmatpush2.bf16.msra.mxu0 %v7428_v27  ;;  %v7439_v27 = vld [vmem:[#allocation88_spill] sm:$0xff] }
 0x21f   :  { %2463 = vmatprep.subr.bf16.mxu0 %v7429_v60  ;;  %v7438_v60 = vld [vmem:[#allocation87_spill] sm:$0xff] }
 0x220   :  { %2515 = vmatpush2.bf16.msra.mxu1 %v6314_v22  ;;  %v4890_v22 = vld [vmem:[%s7132_s3 + $0x174] ss:$8 sps:$4 sm:$0xff]  }
 0x221   :  { %2516 = vmatprep.subr.bf16.mxu1 %v7430_v33 }
 0x222   :  { %2464 = vmatpush2.bf16.msra.mxu0 %v7431_v43  ;;  %v7435_v43 = vld [vmem:[#allocation35_spill] sm:$0xff] }
 0x223   :  { %2465 = vmatprep.subr.bf16.mxu0 %v6332_v59 }
 0x224   :  { %2517 = vmatpush2.bf16.msra.mxu1 %v7432_v35  ;;  %v6574_v35 = vpack.c.b16 %v7435_v43, %v7435_v43 }
 0x225   :  { %2518 = vmatprep.subr.bf16.mxu1 %v7433_v47  ;;  %v7437_v47 = vld [vmem:[#allocation86_spill] sm:$0xff] }
 0x226   :  { %2466 = vmatpush2.bf16.msra.mxu0 %v6350_v28 }
 0x227   :  { %2537 = vmatprep.subr.bf16.mxu0 %v4890_v22  ;;  %v7436_v22 = vld [vmem:[#allocation85_spill] sm:$0xff] }
 0x228   :  { %2519 = vmatpush2.bf16.msra.mxu1 %v6357_v37 }
 0x229   :  { %2468 = vmatmul.mubr.bf16.vlgmr.msra.gmra.mxu0 %v6565_v30  ;;  %v1617_v59 = vpop.f32.mrf.mxu0  ;;  %2578 = vmatprep.subr.bf16.mxu1 %v6375_v18 }
 0x22a   :  { %2538 = vmatpush1.bf16.msra.mxu0 %v6381_v38  ;;  %2569 = vmatprep.mubr.bf16.mxu0 %v6499_v21 }
 0x22b   :  { %2521 = vmatmul.mubr.bf16.vlgmr.msra.gmra.mxu1 %v6574_v35  ;;  %v1619_v51 = vpop.f32.mrf.mxu0  ;;  %v1826_v28 = vpop.f32.mrf.mxu1  ;;  %2539 = vmatprep.subr.bf16.mxu0 %v7436_v22  ;;  %v4902_v22 = vld [vmem:[%s7132_s3 + $0x120] ss:$8 sps:$4 sm:$0xff]  }
 0x22c   :  { %v6581_v37 = vadd.f32 %v1826_v28, %v1617_v59  ;;  %2579 = vmatpush1.bf16.msra.mxu1 %v7437_v47  ;;  %2610 = vmatprep.mubr.bf16.mxu1 %v6491_v17  ;;  %v4891_v59 = vld [vmem:[%s7132_s3 + $0x150] ss:$8 sps:$4 sm:$0xff]  }
 0x22d   :  { %v1621_v43 = vpop.f32.mrf.mxu0  ;;  %v1828_v33 = vpop.f32.mrf.mxu1  ;;  %2580 = vmatprep.subr.bf16.mxu1 %v7438_v60  ;;  %v4892_v60 = vld [vmem:[%s7132_s3 + $0x144] ss:$8 sps:$4 sm:$0xff]   ;;  %v4898_v17 = vld [vmem:[%s7132_s3 + $0x130] ss:$8 sps:$4 sm:$0xff]  }
 0x22e   :  { %v6586_v18 = vadd.f32 %v1828_v33, %v1619_v51  ;;  %2540 = vmatpush1.bf16.msra.mxu0 %v6408_v44  ;;  %v4894_v44 = vld [vmem:[%s7132_s3 + $0x140] ss:$8 sps:$4 sm:$0xff]   ;;  %v4899_v33 = vld [vmem:[%s7132_s3 + $0x124] ss:$8 sps:$4 sm:$0xff]   ;;  %v4900_v47 = vld [vmem:[%s7132_s3 + $0x30] ss:$8 sps:$4 sm:$0xff]  }
 0x22f   :  { %v1622_v38 = vpop.f32.mrf.mxu0  ;;  %v1830_v21 = vpop.f32.mrf.mxu1  ;;  %2541 = vmatprep.subr.bf16.mxu0 %v7439_v27  ;;  %v4893_v27 = vld [vmem:[%s7132_s3 + $0x44] ss:$8 sps:$4 sm:$0xff]   ;;  %v4903_v43 = vld [vmem:[%s7132_s3 + $0x114] ss:$8 sps:$4 sm:$0xff]  }
 0x230   :  { %2581 = vmatpush1.bf16.msra.mxu1 %v6420_v20  ;;  %v4896_v20 = vld [vmem:[%s7132_s3 + $0x40] ss:$8 sps:$4 sm:$0xff]   ;;  %v4901_v51 = vld [vmem:[%s7132_s3 + $0x24] ss:$8 sps:$4 sm:$0xff]   ;;  %v4905_v21 = vld [vmem:[%s7132_s3 + $0x14] ss:$8 sps:$4 sm:$0xff]  }
 0x231   :  { %v1831_v28 = vpop.f32.mrf.mxu1  ;;  %2582 = vmatprep.subr.bf16.mxu1 %v6426_v46  ;;  %v4895_v46 = vld [vmem:[%s7132_s3 + $0x134] ss:$8 sps:$4 sm:$0xff]   ;;  %v4904_v38 = vld [vmem:[%s7132_s3 + $0x20] ss:$8 sps:$4 sm:$0xff]  }
 0x232   :  { %2542 = vmatpush1.bf16.msra.mxu0 %v4891_v59  ;;  %v4906_v28 = vld [vmem:[%s7132_s3 + $0x110] ss:$8 sps:$4 sm:$0xff]   ;;  %v4907_v59 = vld [vmem:[%s7132_s3 + $0x104] ss:$8 sps:$4 sm:$0xff]  }
 0x233   :  { %2543 = vmatprep.subr.bf16.mxu0 %v4892_v60  ;;  %v4908_v60 = vld [vmem:[%s7132_s3 + $0x10] ss:$8 sps:$4 sm:$0xff]  }
 0x234   :  { %2583 = vmatpush1.bf16.msra.mxu1 %v6434_v25  ;;  %v4897_v25 = vld [vmem:[%s7132_s3 + $0x34] ss:$8 sps:$4 sm:$0xff]  }
 0x235   :  { %2584 = vmatprep.subr.bf16.mxu1 %v4893_v27  ;;  %v4909_v27 = vld [vmem:[%s7132_s3 + $0x4] ss:$8 sps:$4 sm:$0xff]  }
 0x236   :  { %2544 = vmatpush1.bf16.msra.mxu0 %v4894_v44  ;;  %v4910_v44 = vld [vmem:[%s7132_s3 + $0x100] ss:$8 sps:$4 sm:$0xff]  }
 0x237   :  { %2545 = vmatprep.subr.bf16.mxu0 %v4895_v46  ;;  %v4911_v46 = vld [vmem:[%s7132_s3 + $0x1f4] ss:$8 sps:$4 sm:$0xff]  }
 0x238   :  { %2585 = vmatpush1.bf16.msra.mxu1 %v4896_v20  ;;  %v4912_v20 = vld [vmem:[%s7132_s3] ss:$8 sps:$4 sm:$0xff]  }
 0x239   :  { %2586 = vmatprep.subr.bf16.mxu1 %v4897_v25  ;;  %v4913_v25 = vld [vmem:[%s7132_s3 + $0xf4] ss:$8 sps:$4 sm:$0xff]  }
 0x23a   :  { %2546 = vmatpush1.bf16.msra.mxu0 %v4898_v17  ;;  %v4914_v17 = vld [vmem:[%s7132_s3 + $0x1f0] ss:$8 sps:$4 sm:$0xff]  }
 0x23b   :  { %2547 = vmatprep.subr.bf16.mxu0 %v4899_v33  ;;  %v4915_v33 = vld [vmem:[%s7132_s3 + $0x1e4] ss:$8 sps:$4 sm:$0xff]  }
 0x23c   :  { %2587 = vmatpush1.bf16.msra.mxu1 %v4900_v47  ;;  %v4916_v47 = vld [vmem:[%s7132_s3 + $0xf0] ss:$8 sps:$4 sm:$0xff]  }
 0x23d   :  { %2588 = vmatprep.subr.bf16.mxu1 %v4901_v51  ;;  %v4917_v51 = vld [vmem:[%s7132_s3 + $0xe4] ss:$8 sps:$4 sm:$0xff]  }
 0x23e   :  { %2548 = vmatpush1.bf16.msra.mxu0 %v4902_v22  ;;  %v4918_v22 = vld [vmem:[%s7132_s3 + $0x1e0] ss:$8 sps:$4 sm:$0xff]  }
 0x23f   :  { %2549 = vmatprep.subr.bf16.mxu0 %v4903_v43  ;;  %v4919_v43 = vld [vmem:[%s7132_s3 + $0x1d4] ss:$8 sps:$4 sm:$0xff]  }
 0x240   :  { %2589 = vmatpush1.bf16.msra.mxu1 %v4904_v38  ;;  %v4920_v38 = vld [vmem:[%s7132_s3 + $0xe0] ss:$8 sps:$4 sm:$0xff]  }
 0x241   :  { %2590 = vmatprep.subr.bf16.mxu1 %v4905_v21  ;;  %v4921_v21 = vld [vmem:[%s7132_s3 + $0x1d0] ss:$8 sps:$4 sm:$0xff]  }
 0x242   :  { %2550 = vmatpush1.bf16.msra.mxu0 %v4906_v28  ;;  %v7471_v28 = vld [vmem:[#allocation71_spill] sm:$0xff] }
 0x243   :  { %2551 = vmatprep.subr.bf16.mxu0 %v4907_v59  ;;  %v7472_v59 = vld [vmem:[#allocation73_spill] sm:$0xff] }
 0x244   :  { %2591 = vmatpush1.bf16.msra.mxu1 %v4908_v60  ;;  %v7473_v60 = vld [vmem:[#allocation74_spill] sm:$0xff] }
 0x245   :  { %2592 = vmatprep.subr.bf16.mxu1 %v4909_v27 }
 0x246   :  { %2552 = vmatpush1.bf16.msra.mxu0 %v4910_v44  ;;  %v7474_v44 = vld [vmem:[#allocation33_spill] sm:$0xff] }
 0x247   :  { %2553 = vmatprep.subr.bf16.mxu0 %v4911_v46  ;;  %v7475_v46 = vld [vmem:[#allocation75_spill] sm:$0xff] }
 0x248   :  { %2593 = vmatpush1.bf16.msra.mxu1 %v4912_v20  ;;  %v7477_v20 = vld [vmem:[#allocation77_spill] sm:$0xff] }
 0x249   :  { %2594 = vmatprep.subr.bf16.mxu1 %v4913_v25 }
 0x24a   :  { %2554 = vmatpush2.bf16.msra.mxu0 %v4914_v17  ;;  %v7479_v17 = vld [vmem:[#allocation79_spill] sm:$0xff] }
 0x24b   :  { %2555 = vmatprep.subr.bf16.mxu0 %v4915_v33  ;;  %v7480_v33 = vld [vmem:[#allocation80_spill] sm:$0xff] }
 0x24c   :  { %2595 = vmatpush2.bf16.msra.mxu1 %v4916_v47  ;;  %v7481_v47 = vld [vmem:[#allocation81_spill] sm:$0xff] }
 0x24d   :  { %2596 = vmatprep.subr.bf16.mxu1 %v4917_v51  ;;  %v7482_v51 = vld [vmem:[#allocation82_spill] sm:$0xff] }
 0x24e   :  { %2556 = vmatpush2.bf16.msra.mxu0 %v4918_v22 }
 0x24f   :  { %2557 = vmatprep.subr.bf16.mxu0 %v4919_v43  ;;  %v7483_v43 = vld [vmem:[#allocation83_spill] sm:$0xff] }
 0x250   :  { %2597 = vmatpush2.bf16.msra.mxu1 %v4920_v38  ;;  %v4795_v38 = vld [vmem:[%s7134_s5 + $0x98] sm:$0xff]  }
 0x251   :  { %2598 = vmatprep.subr.bf16.mxu1 %v7372_v53  ;;  %v7440_v53 = vld [vmem:[#allocation36_spill] sm:$0xff] }
 0x252   :  { %2558 = vmatpush2.bf16.msra.mxu0 %v4921_v21  ;;  %v7484_v21 = vld [vmem:[#allocation38_spill] sm:$0xff] }
 0x253   :  { %2559 = vmatprep.subr.bf16.mxu0 %v7374_v55  ;;  %v2626_v55 = vpack.c.b16 %v7440_v53, %v7440_v53  ;;  %v2625_v53 = vpack.c.b16 %v7484_v21, %v7484_v21  ;;  %v4812_v21 = vld [vmem:[%s7134_s5 + $0xf8] sm:$0xff]  }
 0x254   :  { %2599 = vmatpush2.bf16.msra.mxu1 %v7375_v56 }
 0x255   :  { %2600 = vmatprep.subr.bf16.mxu1 %v7376_v57 }
 0x256   :  { %2560 = vmatpush2.bf16.msra.mxu0 %v7377_v58  ;;  %v7441_v58 = vld [vmem:[#allocation37_spill] sm:$0xff] }
 0x257   :  { %2561 = vmatprep.subr.bf16.mxu0 %v7378_v62  ;;  %v2679_v62 = vpack.c.b16 %v7441_v58, %v7441_v58 }
 0x258   :  { %2601 = vmatpush2.bf16.msra.mxu1 %v7379_v63 }
 0x259   :  { %2602 = vmatprep.subr.bf16.mxu1 %v7380_v0 }
 0x25a   :  { %2562 = vmatpush2.bf16.msra.mxu0 %v7381_v2 }
 0x25b   :  { %2563 = vmatprep.subr.bf16.mxu0 %v7382_v3 }
 0x25c   :  { %2603 = vmatpush2.bf16.msra.mxu1 %v7383_v4 }
 0x25d   :  { %2604 = vmatprep.subr.bf16.mxu1 %v7384_v5  ;;  %v7458_v5 = vld [vmem:[#allocation56_spill] sm:$0xff] }
 0x25e   :  { %2564 = vmatpush2.bf16.msra.mxu0 %v7385_v6  ;;  %v7459_v6 = vld [vmem:[#allocation57_spill] sm:$0xff] }
 0x25f   :  { %2565 = vmatprep.subr.bf16.mxu0 %v7386_v7  ;;  %v7460_v7 = vld [vmem:[#allocation58_spill] sm:$0xff] }
 0x260   :  { %2605 = vmatpush2.bf16.msra.mxu1 %v7387_v8  ;;  %v7461_v8 = vld [vmem:[#allocation59_spill] sm:$0xff] }
 0x261   :  { %2606 = vmatprep.subr.bf16.mxu1 %v7388_v9  ;;  %v7462_v9 = vld [vmem:[#allocation60_spill] sm:$0xff] }
 0x262   :  { %2566 = vmatpush2.bf16.msra.mxu0 %v7389_v10  ;;  %v7463_v10 = vld [vmem:[#allocation61_spill] sm:$0xff] }
 0x263   :  { %2567 = vmatprep.subr.bf16.mxu0 %v7390_v11  ;;  %v7464_v11 = vld [vmem:[#allocation62_spill] sm:$0xff] }
 0x264   :  { %2607 = vmatpush2.bf16.msra.mxu1 %v7391_v12  ;;  %v7465_v12 = vld [vmem:[#allocation63_spill] sm:$0xff] }
 0x265   :  { %2608 = vmatprep.subr.bf16.mxu1 %v7392_v13  ;;  %v7466_v13 = vld [vmem:[#allocation64_spill] sm:$0xff] }
 0x266   :  { %2568 = vmatpush2.bf16.msra.mxu0 %v7393_v14  ;;  %v7467_v14 = vld [vmem:[#allocation65_spill] sm:$0xff] }
 0x267   :  { %2629 = vmatprep.subr.bf16.mxu0 %v7394_v15  ;;  %v7468_v15 = vld [vmem:[#allocation67_spill] sm:$0xff] }
 0x268   :  { %2609 = vmatpush2.bf16.msra.mxu1 %v7395_v16  ;;  %v7469_v16 = vld [vmem:[#allocation68_spill] sm:$0xff] }
 0x269   :  { %v2070_v56 = vpop.f32.mrf.mxu0  ;;  %2570 = vmatmul.mubr.bf16.vlgmr.msra.gmra.mxu0 %v6574_v35  ;;  %2682 = vmatprep.subr.bf16.mxu1 %v7396_v19  ;;  %v7470_v19 = vld [vmem:[#allocation70_spill] sm:$0xff] }
 0x26a   :  { %v2077_v57 = vadd.f32 %v2070_v56, %v6581_v37  ;;  %2630 = vmatpush1.bf16.msra.mxu0 %v5944_v32  ;;  %2661 = vmatprep.mubr.bf16.mxu0 %v2626_v55  ;;  %v7485_v55 = vmov 0   ;;  %v7486_v56 = vld [vmem:[#allocation84_spill] sm:$0xff] }
 0x26b   :  { %v2072_v63 = vpop.f32.mrf.mxu0  ;;  %v2316_v0 = vpop.f32.mrf.mxu1  ;;  %2611 = vmatmul.mubr.bf16.vlgmr.msra.gmra.mxu1 %v6565_v30  ;;  %2631 = vmatprep.subr.bf16.mxu0 %v5967_v1  ;;  %v7443_v1 = vld [vmem:[#allocation41_spill] sm:$0xff] }
 0x26c   :  { %v6719_v2 = vadd.f32 %v2316_v0, %v2077_v57  ;;  %2683 = vmatpush1.bf16.msra.mxu1 %v5962_v36  ;;  %2714 = vmatprep.mubr.bf16.mxu1 %v2679_v62  ;;  %v7442_v36 = vld [vmem:[#allocation40_spill] sm:$0xff]  ;;  %v2078_v35 = vadd.f32 %v2072_v63, %v6586_v18  ;;  %v7487_v62 = vld [vmem:[#allocation39_spill] sm:$0xff] }
 0x26d   :  { %v2074_v3 = vpop.f32.mrf.mxu0  ;;  %v2318_v4 = vpop.f32.mrf.mxu1  ;;  %2684 = vmatprep.subr.bf16.mxu1 %v5974_v41  ;;  %v7444_v41 = vld [vmem:[#allocation42_spill] sm:$0xff]  ;;  %v7476_v18 = vld [vmem:[#allocation76_spill] sm:$0xff]  ;;  %v2678_v63 = vpack.c.b16 %v7487_v62, %v7487_v62 }
 0x26e   :  { %2632 = vmatpush1.bf16.msra.mxu0 %v5983_v52  ;;  %v7445_v52 = vld [vmem:[#allocation43_spill] sm:$0xff]  ;;  %v2324_v27 = vadd.f32 %v2318_v4, %v2078_v35 }
 0x26f   :  { %v2075_v32 = vpop.f32.mrf.mxu0  ;;  %v2320_v37 = vpop.f32.mrf.mxu1  ;;  %2633 = vmatprep.subr.bf16.mxu0 %v5995_v26  ;;  %v7446_v26 = vld [vmem:[#allocation44_spill] sm:$0xff]  ;;  %v4797_v3 = vld [vmem:[%s7134_s5 + $0x90] sm:$0xff]  }
 0x270   :  { %2685 = vmatpush1.bf16.msra.mxu1 %v6009_v49  ;;  %v7447_v49 = vld [vmem:[#allocation45_spill] sm:$0xff]  ;;  %v4788_v57 = vld [vmem:[%s7134_s5 + $0x38] sm:$0xff]   ;;  %v4789_v37 = vld [vmem:[%s7134_s5 + $0x30] sm:$0xff]  }
 0x271   :  { %v2321_v30 = vpop.f32.mrf.mxu1  ;;  %2686 = vmatprep.subr.bf16.mxu1 %v6019_v42  ;;  %v7448_v42 = vld [vmem:[#allocation46_spill] sm:$0xff]  ;;  %v4816_v62 = vld [vmem:[%s7134_s5 + $0xd8] sm:$0xff]  }
 0x272   :  { %2634 = vmatpush1.bf16.msra.mxu0 %v6030_v48  ;;  %v7449_v48 = vld [vmem:[#allocation47_spill] sm:$0xff] }
 0x273   :  { %2635 = vmatprep.subr.bf16.mxu0 %v6038_v29  ;;  %v7450_v29 = vld [vmem:[#allocation48_spill] sm:$0xff] }
 0x274   :  { %2687 = vmatpush1.bf16.msra.mxu1 %v6047_v61  ;;  %v7451_v61 = vld [vmem:[#allocation49_spill] sm:$0xff] }
 0x275   :  { %2688 = vmatprep.subr.bf16.mxu1 %v6056_v23  ;;  %v7452_v23 = vld [vmem:[#allocation50_spill] sm:$0xff] }
 0x276   :  { %2636 = vmatpush1.bf16.msra.mxu0 %v6062_v39  ;;  %v7453_v39 = vld [vmem:[#allocation51_spill] sm:$0xff] }
 0x277   :  { %2637 = vmatprep.subr.bf16.mxu0 %v6068_v34  ;;  %v7454_v34 = vld [vmem:[#allocation52_spill] sm:$0xff] }
 0x278   :  { %2689 = vmatpush1.bf16.msra.mxu1 %v6074_v31  ;;  %v7455_v31 = vld [vmem:[#allocation53_spill] sm:$0xff] }
 0x279   :  { %2690 = vmatprep.subr.bf16.mxu1 %v6080_v50  ;;  %v7456_v50 = vld [vmem:[#allocation54_spill] sm:$0xff] }
 0x27a   :  { %2638 = vmatpush1.bf16.msra.mxu0 %v6086_v40  ;;  %v7457_v40 = vld [vmem:[#allocation55_spill] sm:$0xff] }
 0x27b   :  { %2639 = vmatprep.subr.bf16.mxu0 %v7442_v36 }
 0x27c   :  { %2691 = vmatpush1.bf16.msra.mxu1 %v7443_v1  ;;  %v4799_v1 = vld [vmem:[%s7134_s5 + $0x88] sm:$0xff]  }
 0x27d   :  { %2692 = vmatprep.subr.bf16.mxu1 %v7444_v41 }
 0x27e   :  { %2640 = vmatpush1.bf16.msra.mxu0 %v7445_v52 }
 0x27f   :  { %2641 = vmatprep.subr.bf16.mxu0 %v7446_v26  ;;  %v4790_v26 = vld [vmem:[%s7134_s5 + $0x28] sm:$0xff]  }
 0x280   :  { %2693 = vmatpush1.bf16.msra.mxu1 %v7447_v49 }
 0x281   :  { %2694 = vmatprep.subr.bf16.mxu1 %v7448_v42  ;;  %v4801_v42 = vld [vmem:[%s7134_s5 + $0x80] sm:$0xff]  }
 0x282   :  { %2642 = vmatpush1.bf16.msra.mxu0 %v7449_v48  ;;  %v4791_v48 = vld [vmem:[%s7134_s5 + $0x20] sm:$0xff]  }
 0x283   :  { %2643 = vmatprep.subr.bf16.mxu0 %v7450_v29  ;;  %v4803_v29 = vld [vmem:[%s7134_s5 + $0x78] sm:$0xff]  }
 0x284   :  { %2695 = vmatpush1.bf16.msra.mxu1 %v7451_v61  ;;  %v4792_v61 = vld [vmem:[%s7134_s5 + $0x18] sm:$0xff]  }
 0x285   :  { %2696 = vmatprep.subr.bf16.mxu1 %v7452_v23  ;;  %v4805_v23 = vld [vmem:[%s7134_s5 + $0x70] sm:$0xff]  }
 0x286   :  { %2644 = vmatpush1.bf16.msra.mxu0 %v7453_v39  ;;  %v4793_v39 = vld [vmem:[%s7134_s5 + $0x10] sm:$0xff]  }
 0x287   :  { %2645 = vmatprep.subr.bf16.mxu0 %v7454_v34  ;;  %v4806_v34 = vld [vmem:[%s7134_s5 + $0x68] sm:$0xff]  }
 0x288   :  { %2697 = vmatpush1.bf16.msra.mxu1 %v7455_v31  ;;  %v4794_v31 = vld [vmem:[%s7134_s5 + $0x8] sm:$0xff]  }
 0x289   :  { %2698 = vmatprep.subr.bf16.mxu1 %v7456_v50  ;;  %v4807_v50 = vld [vmem:[%s7134_s5 + $0x60] sm:$0xff]  }
 0x28a   :  { %2646 = vmatpush2.bf16.msra.mxu0 %v7457_v40  ;;  %v4796_v40 = vld [vmem:[%s7134_s5] sm:$0xff]  }
 0x28b   :  { %2647 = vmatprep.subr.bf16.mxu0 %v7458_v5  ;;  %v4808_v5 = vld [vmem:[%s7134_s5 + $0xb8] sm:$0xff]  }
 0x28c   :  { %2699 = vmatpush2.bf16.msra.mxu1 %v7459_v6  ;;  %v4798_v6 = vld [vmem:[%s7134_s5 + $0x58] sm:$0xff]  }
 0x28d   :  { %2700 = vmatprep.subr.bf16.mxu1 %v7460_v7  ;;  %v4809_v7 = vld [vmem:[%s7134_s5 + $0xb0] sm:$0xff]  }
 0x28e   :  { %2648 = vmatpush2.bf16.msra.mxu0 %v7461_v8  ;;  %v4800_v8 = vld [vmem:[%s7134_s5 + $0x50] sm:$0xff]  }
 0x28f   :  { %2649 = vmatprep.subr.bf16.mxu0 %v7462_v9  ;;  %v7488_v9 = vld [vmem:[#allocation32_spill] sm:$0xff] }
 0x290   :  { %2701 = vmatpush2.bf16.msra.mxu1 %v7463_v10 }
 0x291   :  { %2702 = vmatprep.subr.bf16.mxu1 %v7464_v11  ;;  %v4810_v11 = vld [vmem:[%s7134_s5 + $0xa8] sm:$0xff]  }
 0x292   :  { %2650 = vmatpush2.bf16.msra.mxu0 %v7465_v12  ;;  %v4802_v12 = vld [vmem:[%s7134_s5 + $0x48] sm:$0xff]  }
 0x293   :  { %2651 = vmatprep.subr.bf16.mxu0 %v7466_v13 }
 0x294   :  { %2703 = vmatpush2.bf16.msra.mxu1 %v7467_v14  ;;  %v4811_v14 = vld [vmem:[%s7134_s5 + $0xa0] sm:$0xff]  }
 0x295   :  { %2704 = vmatprep.subr.bf16.mxu1 %v7419_v24  ;;  %v6774_v24 = vld [vmem:[%s7133_s4] sm:$0x3] }
 0x296   :  { %2652 = vmatpush2.bf16.msra.mxu0 %v7468_v15  ;;  %v6886_v10 = vrot.slane %v6774_v24, %v7488_v9  ;;  %v4804_v15 = vld [vmem:[%s7134_s5 + $0x40] sm:$0xff]  }
 0x297   :  { %2653 = vmatprep.subr.bf16.mxu0 %v7469_v16 }
 0x298   :  { %2705 = vmatpush2.bf16.msra.mxu1 %v7422_v45  ;;  %v6779_v45 = vrot.slane %v6774_v24, %v7474_v44  ;;  %v2337_v13 = vadd.f32 %v6886_v10, %v6719_v2 }
 0x299   :  { %2706 = vmatprep.subr.bf16.mxu1 %v7470_v19 }
 0x29a   :  { %2654 = vmatpush2.bf16.msra.mxu0 %v7471_v28  ;;  %v2338_v25 = vadd.f32 %v6779_v45, %v2324_v27  ;;  %v2339_v16 = vmax.f32 %v2337_v13, 0.0 }
 0x29b   :  { %2655 = vmatprep.subr.bf16.mxu0 %v7425_v54  ;;  %v7478_v54 = vld [vmem:[#allocation78_spill] sm:$0xff] }
 0x29c   :  { %2707 = vmatpush2.bf16.msra.mxu1 %v7472_v59  ;;  %v2340_v22 = vmax.f32 %v2338_v25, 0.0  ;;  %v2341_v2 = vpack.c.bf16 %v2339_v16, %v2339_v16 }
 0x29d   :  { %2708 = vmatprep.subr.bf16.mxu1 %v7473_v60 }
 0x29e   :  { %2656 = vmatpush2.bf16.msra.mxu0 %v7475_v46  ;;  %v2342_v0 = vpack.c.bf16 %v2340_v22, %v2340_v22 }
 0x29f   :  { %2657 = vmatprep.subr.bf16.mxu0 %v7476_v18 }
 0x2a0   :  { %2709 = vmatpush2.bf16.msra.mxu1 %v7477_v20 }
 0x2a1   :  { %2710 = vmatprep.subr.bf16.mxu1 %v7478_v54 }
 0x2a2   :  { %2658 = vmatpush2.bf16.msra.mxu0 %v7479_v17 }
 0x2a3   :  { %2659 = vmatprep.subr.bf16.mxu0 %v7480_v33 }
 0x2a4   :  { %2711 = vmatpush2.bf16.msra.mxu1 %v7481_v47 }
 0x2a5   :  { %2712 = vmatprep.subr.bf16.mxu1 %v7482_v51 }
 0x2a6   :  { %2660 = vmatpush2.bf16.msra.mxu0 %v7483_v43 }
 0x2a7   :  { %2855 = vmatprep.subr.bf16.mxu0 %v7485_v55 }
 0x2a8   :  { %2713 = vmatpush2.bf16.msra.mxu1 %v7486_v56  ;;  %v4813_v56 = vld [vmem:[%s7134_s5 + $0xf0] sm:$0xff]  }
 0x2a9   :  { %v6801_v58 = vpop.f32.mrf.mxu0  ;;  %2662 = vmatmul.mubr.bf16.vlgmr.msra.gmra.mxu0 %v2625_v53  ;;  %2970 = vmatprep.subr.bf16.mxu1 %v7485_v55 }
 0x2aa   :  { %2856 = vmatpush1.bf16.msra.mxu0 %v4795_v38 }
 0x2ab   :  { %v6809_v4 = vpop.f32.mrf.mxu0  ;;  %v6811_v32 = vpop.f32.mrf.mxu1  ;;  %2715 = vmatmul.mubr.bf16.vlgmr.msra.gmra.mxu1 %v2678_v63  ;;  %2857 = vmatprep.subr.bf16.mxu0 %v7485_v55  ;;  %v4817_v63 = vld [vmem:[%s7134_s5 + $0xd0] sm:$0xff]  }
 0x2ac   :  { %2971 = vmatpush1.bf16.msra.mxu1 %v4788_v57  ;;  %4235 = vmatprep.mubr.msk.bf16.mxu1 %vm663_vm3, %v2342_v0  ;;  %v2419_v19 = vadd.f32 %v6811_v32, %v6801_v58  ;;  %v4814_v57 = vld [vmem:[%s7134_s5 + $0xe8] sm:$0xff]   ;;  %v4815_v58 = vld [vmem:[%s7134_s5 + $0xe0] sm:$0xff]   ;;  %v4821_v32 = vld [vmem:[%s7134_s5 + $0x110] sm:$0xff]  }
 0x2ad   :  { %v2381_v30 = vpop.f32.mrf.mxu0  ;;  %v6818_v36 = vpop.f32.mrf.mxu1  ;;  %2972 = vmatprep.subr.bf16.mxu1 %v7485_v55  ;;  %v4818_v0 = vld [vmem:[%s7134_s5 + $0xc8] sm:$0xff]  }
 0x2ae   :  { %2858 = vmatpush1.bf16.msra.mxu0 %v4797_v3  ;;  %v2421_v28 = vadd.f32 %v6818_v36, %v6809_v4  ;;  %v4819_v3 = vld [vmem:[%s7134_s5 + $0xc0] sm:$0xff]   ;;  %v4820_v4 = vld [vmem:[%s7134_s5 + $0x118] sm:$0xff]  }
 0x2af   :  { %v2382_v41 = vpop.f32.mrf.mxu0  ;;  %v2422_v52 = vpop.f32.mrf.mxu1  ;;  %2859 = vmatprep.subr.bf16.mxu0 %v7485_v55  ;;  %v4823_v30 = vld [vmem:[%s7134_s5 + $0x100] sm:$0xff]  }
 0x2b0   :  { %2973 = vmatpush1.bf16.msra.mxu1 %v4789_v37  ;;  %v4822_v37 = vld [vmem:[%s7134_s5 + $0x108] sm:$0xff]  }
 0x2b1   :  { %v2423_v49 = vpop.f32.mrf.mxu1  ;;  %2974 = vmatprep.subr.bf16.mxu1 %v7485_v55 }
 0x2b2   :  { %2860 = vmatpush1.bf16.msra.mxu0 %v4799_v1 }
 0x2b3   :  { %2861 = vmatprep.subr.bf16.mxu0 %v7485_v55 }
 0x2b4   :  { %2975 = vmatpush1.bf16.msra.mxu1 %v4790_v26 }
 0x2b5   :  { %2976 = vmatprep.subr.bf16.mxu1 %v7485_v55 }
 0x2b6   :  { %2862 = vmatpush1.bf16.msra.mxu0 %v4801_v42 }
 0x2b7   :  { %2863 = vmatprep.subr.bf16.mxu0 %v7485_v55 }
 0x2b8   :  { %2977 = vmatpush1.bf16.msra.mxu1 %v4791_v48 }
 0x2b9   :  { %2978 = vmatprep.subr.bf16.mxu1 %v7485_v55 }
 0x2ba   :  { %2864 = vmatpush1.bf16.msra.mxu0 %v4803_v29  ;;  %v4824_v29 = vld [vmem:[%s7136_s7 + $0x60] ss:$16 sps:$4 sm:$0xff]  }
 0x2bb   :  { %2865 = vmatprep.subr.bf16.mxu0 %v7485_v55 }
 0x2bc   :  { %2979 = vmatpush1.bf16.msra.mxu1 %v4792_v61  ;;  %v4826_v61 = vld [vmem:[%s7136_s7 + $0x64] ss:$16 sps:$4 sm:$0xff]  }
 0x2bd   :  { %2980 = vmatprep.subr.bf16.mxu1 %v7485_v55 }
 0x2be   :  { %2866 = vmatpush1.bf16.msra.mxu0 %v4805_v23  ;;  %v4829_v23 = vld [vmem:[%s7136_s7 + $0x44] ss:$16 sps:$4 sm:$0xff]  }
 0x2bf   :  { %2867 = vmatprep.subr.bf16.mxu0 %v7485_v55 }
 0x2c0   :  { %2981 = vmatpush1.bf16.msra.mxu1 %v4793_v39  ;;  %v4827_v39 = vld [vmem:[%s7136_s7 + $0x40] ss:$16 sps:$4 sm:$0xff]  }
 0x2c1   :  { %2982 = vmatprep.subr.bf16.mxu1 %v7485_v55 }
 0x2c2   :  { %2868 = vmatpush1.bf16.msra.mxu0 %v4806_v34 }
 0x2c3   :  { %2869 = vmatprep.subr.bf16.mxu0 %v7485_v55 }
 0x2c4   :  { %2983 = vmatpush1.bf16.msra.mxu1 %v4794_v31 }
 0x2c5   :  { %2984 = vmatprep.subr.bf16.mxu1 %v7485_v55 }
 0x2c6   :  { %2870 = vmatpush1.bf16.msra.mxu0 %v4807_v50 }
 0x2c7   :  { %2879 = vmatprep.subr.bf16.mxu0 %v7485_v55 }
 0x2c8   :  { %2985 = vmatpush1.bf16.msra.mxu1 %v4796_v40 }
 0x2c9   :  { %2994 = vmatprep.subr.bf16.mxu1 %v7485_v55 }
 0x2ca   :  { %2880 = vmatpush2.bf16.msra.mxu0 %v4808_v5 }
 0x2cb   :  { %2881 = vmatprep.subr.bf16.mxu0 %v7485_v55 }
 0x2cc   :  { %2995 = vmatpush2.bf16.msra.mxu1 %v4798_v6 }
 0x2cd   :  { %2996 = vmatprep.subr.bf16.mxu1 %v7485_v55 }
 0x2ce   :  { %2882 = vmatpush2.bf16.msra.mxu0 %v4809_v7 }
 0x2cf   :  { %2883 = vmatprep.subr.bf16.mxu0 %v7485_v55 }
 0x2d0   :  { %2997 = vmatpush2.bf16.msra.mxu1 %v4800_v8 }
 0x2d1   :  { %2998 = vmatprep.subr.bf16.mxu1 %v7485_v55 }
 0x2d2   :  { %2884 = vmatpush2.bf16.msra.mxu0 %v4810_v11 }
 0x2d3   :  { %2885 = vmatprep.subr.bf16.mxu0 %v7485_v55 }
 0x2d4   :  { %2999 = vmatpush2.bf16.msra.mxu1 %v4802_v12 }
 0x2d5   :  { %3000 = vmatprep.subr.bf16.mxu1 %v7485_v55 }
 0x2d6   :  { %2886 = vmatpush2.bf16.msra.mxu0 %v4811_v14 }
 0x2d7   :  { %3110 = vmatprep.subr.bf16.mxu0 %v7485_v55 }
 0x2d8   :  { %3001 = vmatpush2.bf16.msra.mxu1 %v4804_v15 }
 0x2d9   :  { %3290 = vmatprep.subr.bf16.mxu1 %v4826_v61  ;;  %v4853_v61 = vld [vmem:[%s7138_s9 + $0x28] sm:$0xff]  }
 0x2db   :  { %3003 = vmatmul.mubr.bf16.vlgmr.msra.gmra.mxu1 %v2341_v2 }
 0x2dc   :  { %3314 = vmatprep.mubr.bf16.mxu1 %v7485_v55  ;;  %3291 = vmatpush1.bf16.msra.mxu1 %v4824_v29  ;;  %v4852_v29 = vld [vmem:[%s7138_s9 + $0x68] sm:$0xff]  }
 0x2dd   :  { %3292 = vmatprep.subr.bf16.mxu1 %v4829_v23  ;;  %v4854_v23 = vld [vmem:[%s7138_s9 + $0x60] sm:$0xff]  }
 0x2e0   :  { %3293 = vmatpush1.bf16.msra.mxu1 %v4827_v39  ;;  %v4855_v39 = vld [vmem:[%s7138_s9 + $0x20] sm:$0xff]  }
 0x2e9   :  { %v2469_v35 = vpop.f32.mrf.mxu0 }
 0x2ea   :  { %v2476_v59 = vadd.f32 %v2469_v35, %v2419_v19 }
 0x2eb   :  { %v2471_v24 = vpop.f32.mrf.mxu0  ;;  %v2522_v60 = vpop.f32.mrf.mxu1 }
 0x2ec   :  { %v2477_v27 = vadd.f32 %v2471_v24, %v2421_v28  ;;  %v2529_v46 = vadd.f32 %v2522_v60, %v2476_v59 }
 0x2ed   :  { %v2473_v18 = vpop.f32.mrf.mxu0  ;;  %v2524_v20 = vpop.f32.mrf.mxu1 }
 0x2ee   :  { %v2531_v54 = vadd.f32 %v2529_v46, %v6886_v10  ;;  %v2530_v25 = vadd.f32 %v2524_v20, %v2477_v27 }
 0x2ef   :  { %v2474_v17 = vpop.f32.mrf.mxu0  ;;  %v2526_v33 = vpop.f32.mrf.mxu1 }
 0x2f0   :  { %v2532_v47 = vadd.f32 %v2530_v25, %v6779_v45  ;;  %v2533_v51 = vmax.f32 %v2531_v54, 0.0  ;;  %v4832_v33 = vld [vmem:[%s7136_s7 + $0x24] ss:$16 sps:$4 sm:$0xff]  }
 0x2f1   :  { %v2527_v22 = vpop.f32.mrf.mxu1  ;;  %3294 = vmatprep.subr.bf16.mxu1 %v4832_v33 }
 0x2f2   :  { %v2534_v43 = vmax.f32 %v2532_v47, 0.0  ;;  %v2535_v53 = vpack.c.bf16 %v2533_v51, %v2533_v51  ;;  %v4835_v47 = vld [vmem:[%s7136_s7 + $0x4] ss:$16 sps:$4 sm:$0xff]   ;;  %v4833_v51 = vld [vmem:[%s7136_s7] ss:$16 sps:$4 sm:$0xff]  }
 0x2f3   :  { %v4838_v22 = vld [vmem:[%s7136_s7 + $0x6c] ss:$16 sps:$4 sm:$0xff]  }
 0x2f4   :  { %v2536_v38 = vpack.c.bf16 %v2534_v43, %v2534_v43  ;;  %v4856_v43 = vld [vmem:[%s7138_s9 + $0xf8] sm:$0xff]  }
 0x2f6   :  { %4222 = vmatprep.mubr.msk.bf16.mxu0 %vm663_vm3, %v2536_v38  ;;  %v4858_v38 = vld [vmem:[%s7138_s9 + $0xb8] sm:$0xff]  }
 0x2f7   :  { %2888 = vmatmul.mubr.bf16.vlgmr.msra.gmra.mxu0 %v2535_v53  ;;  %v4862_v53 = vld [vmem:[%s7138_s9 + $0xb0] sm:$0xff]  }
 0x2f8   :  { %3111 = vmatpush1.bf16.msra.mxu0 %v4812_v21  ;;  %v4860_v21 = vld [vmem:[%s7138_s9 + $0xf0] sm:$0xff]  }
 0x2f9   :  { %3112 = vmatprep.subr.bf16.mxu0 %v7485_v55 }
 0x2fc   :  { %3113 = vmatpush1.bf16.msra.mxu0 %v4813_v56 }
 0x2fd   :  { %3114 = vmatprep.subr.bf16.mxu0 %v7485_v55 }
 0x300   :  { %3115 = vmatpush1.bf16.msra.mxu0 %v4814_v57  ;;  %v4273_v57 = vld [vmem:[%s7135_s6] ss:$0 sm:$0xff] }
 0x301   :  { %3116 = vmatprep.subr.bf16.mxu0 %v7485_v55 }
 0x304   :  { %3117 = vmatpush1.bf16.msra.mxu0 %v4815_v58 }
 0x305   :  { %3118 = vmatprep.subr.bf16.mxu0 %v7485_v55 }
 0x308   :  { %3119 = vmatpush1.bf16.msra.mxu0 %v4816_v62 }
 0x309   :  { %3120 = vmatprep.subr.bf16.mxu0 %v7485_v55 }
 0x30c   :  { %3121 = vmatpush1.bf16.msra.mxu0 %v4817_v63 }
 0x30d   :  { %3122 = vmatprep.subr.bf16.mxu0 %v7485_v55 }
 0x310   :  { %3123 = vmatpush1.bf16.msra.mxu0 %v4818_v0 }
 0x311   :  { %3124 = vmatprep.subr.bf16.mxu0 %v7485_v55 }
 0x314   :  { %3125 = vmatpush1.bf16.msra.mxu0 %v4819_v3 }
 0x315   :  { %3134 = vmatprep.subr.bf16.mxu0 %v7485_v55 }
 0x318   :  { %3135 = vmatpush2.bf16.msra.mxu0 %v4820_v4 }
 0x319   :  { %3136 = vmatprep.subr.bf16.mxu0 %v7485_v55 }
 0x31c   :  { %3137 = vmatpush2.bf16.msra.mxu0 %v4821_v32  ;;  %v4836_v32 = vld [vmem:[%s7136_s7 + $0x68] ss:$16 sps:$4 sm:$0xff]  }
 0x31d   :  { %3138 = vmatprep.subr.bf16.mxu0 %v7485_v55 }
 0x320   :  { %3139 = vmatpush2.bf16.msra.mxu0 %v4822_v37 }
 0x321   :  { %3140 = vmatprep.subr.bf16.mxu0 %v7485_v55 }
 0x324   :  { %3141 = vmatpush2.bf16.msra.mxu0 %v4823_v30  ;;  %v4841_v30 = vld [vmem:[%s7136_s7 + $0x4c] ss:$16 sps:$4 sm:$0xff]  }
 0x325   :  { %4351 = vmatprep.subr.bf16.mxu0 %v4856_v43 }
 0x329   :  { %v2571_v36 = vpop.f32.mrf.mxu0 }
 0x32b   :  { %v2573_v1 = vpop.f32.mrf.mxu0  ;;  %v2612_v41 = vpop.f32.mrf.mxu1 }
 0x32c   :  { %v2613_v34 = vadd.f32 %v2612_v41, %v2571_v36  ;;  %v4839_v36 = vld [vmem:[%s7136_s7 + $0x48] ss:$16 sps:$4 sm:$0xff]  }
 0x32d   :  { %v2575_v52 = vpop.f32.mrf.mxu0  ;;  %v2614_v26 = vpop.f32.mrf.mxu1  ;;  %v4842_v41 = vld [vmem:[%s7136_s7 + $0x28] ss:$16 sps:$4 sm:$0xff]  }
 0x32e   :  { %v2615_v50 = vadd.f32 %v2614_v26, %v2573_v1  ;;  %v4844_v1 = vld [vmem:[%s7136_s7 + $0x2c] ss:$16 sps:$4 sm:$0xff]  }
 0x32f   :  { %v2576_v49 = vpop.f32.mrf.mxu0  ;;  %v2616_v42 = vpop.f32.mrf.mxu1  ;;  %v4847_v52 = vld [vmem:[%s7136_s7 + $0xc] ss:$16 sps:$4 sm:$0xff]  }
 0x330   :  { %v4848_v26 = vld [vmem:[%s7138_s9 + $0x78] sm:$0xff]   ;;  %v4850_v42 = vld [vmem:[%s7138_s9 + $0x70] sm:$0xff]  }
 0x331   :  { %v2617_v48 = vpop.f32.mrf.mxu1  ;;  %v4849_v49 = vld [vmem:[%s7138_s9 + $0x38] sm:$0xff]  }
 0x332   :  { %v4851_v48 = vld [vmem:[%s7138_s9 + $0x30] sm:$0xff]  }
 0x369   :  { %v2663_v31 = vpop.f32.mrf.mxu0 }
 0x36a   :  { %v2670_v40 = vadd.f32 %v2663_v31, %v2613_v34  ;;  %v4857_v34 = vld [vmem:[%s7138_s9 + $0x58] sm:$0xff]  }
 0x36b   :  { %v2665_v5 = vpop.f32.mrf.mxu0  ;;  %v2716_v6 = vpop.f32.mrf.mxu1  ;;  %v4859_v31 = vld [vmem:[%s7138_s9 + $0x18] sm:$0xff]  }
 0x36c   :  { %v2671_v7 = vadd.f32 %v2665_v5, %v2615_v50  ;;  %v2723_v8 = vadd.f32 %v2716_v6, %v2670_v40  ;;  %v4861_v50 = vld [vmem:[%s7138_s9 + $0x50] sm:$0xff]   ;;  %v4864_v5 = vld [vmem:[%s7138_s9 + $0xe8] sm:$0xff]  }
 0x36d   :  { %v2667_v11 = vpop.f32.mrf.mxu0  ;;  %v2718_v12 = vpop.f32.mrf.mxu1  ;;  %v4863_v40 = vld [vmem:[%s7138_s9 + $0x10] sm:$0xff]   ;;  %v4865_v6 = vld [vmem:[%s7138_s9 + $0x48] sm:$0xff]  }
 0x36e   :  { %v2725_v13 = vadd.f32 %v2723_v8, %v6886_v10  ;;  %v2724_v14 = vadd.f32 %v2718_v12, %v2671_v7  ;;  %v4866_v7 = vld [vmem:[%s7138_s9 + $0xa8] sm:$0xff]   ;;  %v4868_v11 = vld [vmem:[%s7138_s9 + $0xe0] sm:$0xff]  }
 0x36f   :  { %v2668_v15 = vpop.f32.mrf.mxu0  ;;  %v2720_v16 = vpop.f32.mrf.mxu1  ;;  %v4867_v8 = vld [vmem:[%s7138_s9 + $0x8] sm:$0xff]   ;;  %v4869_v12 = vld [vmem:[%s7138_s9 + $0x40] sm:$0xff]  }
 0x370   :  { %v2726_v2 = vadd.f32 %v2724_v14, %v6779_v45  ;;  %v2727_v19 = vmax.f32 %v2725_v13, 0.0  ;;  %v4830_v45 = vld [vmem:[%s7136_s7 + $0x20] ss:$16 sps:$4 sm:$0xff]   ;;  %v4872_v15 = vld [vmem:[%s7138_s9 + $0xd8] sm:$0xff]  }
 0x371   :  { %v2721_v35 = vpop.f32.mrf.mxu1  ;;  %3295 = vmatpush1.bf16.msra.mxu1 %v4830_v45  ;;  %v4870_v13 = vld [vmem:[%s7138_s9 + $0xa0] sm:$0xff]   ;;  %v4873_v16 = vld [vmem:[%s7138_s9 + $0x98] sm:$0xff]  }
 0x372   :  { %v2728_v28 = vmax.f32 %v2726_v2, 0.0  ;;  %v2729_v24 = vpack.c.bf16 %v2727_v19, %v2727_v19  ;;  %3296 = vmatprep.subr.bf16.mxu1 %v4835_v47  ;;  %v4871_v14 = vld [vmem:[%s7138_s9] sm:$0xff]   ;;  %v4874_v2 = vld [vmem:[%s7138_s9 + $0xd0] sm:$0xff]   ;;  %v4876_v35 = vld [vmem:[%s7138_s9 + $0xc8] sm:$0xff]  }
 0x373   :  { %v4875_v19 = vld [vmem:[%s7138_s9 + $0x90] sm:$0xff]  }
 0x374   :  { %v2730_v59 = vpack.c.bf16 %v2728_v28, %v2728_v28  ;;  %v4877_v28 = vld [vmem:[%s7138_s9 + $0x88] sm:$0xff]  }
 0x375   :  { %3297 = vmatpush1.bf16.msra.mxu1 %v4833_v51 }
 0x376   :  { %4272 = vmatprep.mubr.msk.bf16.mxu0 %vm663_vm3, %v2730_v59  ;;  %3331 = vmatprep.subr.bf16.mxu1 %v4838_v22  ;;  %v4878_v59 = vld [vmem:[%s7138_s9 + $0xc0] sm:$0xff]   ;;  %v7489_v22 = vld [vmem:[#allocation31_spill] sm:$0xff] }
 0x377   :  { %3143 = vmatmul.mubr.bf16.vlgmr.msra.gmra.mxu0 %v2729_v24  ;;  %v4879_v24 = vld [vmem:[%s7138_s9 + $0x80] sm:$0xff]   ;;  %v3189_v43 = vsub.s32 2, %v7489_v22 }
 0x378   :  { %4352 = vmatpush3.bf16.msra.mxu0 %v4858_v38  ;;  %v3193_v38 = vsub.s32 3, %v7489_v22 }
 0x379   :  { %4353 = vmatprep.subr.bf16.mxu0 %v4860_v21 }
 0x37c   :  { %4354 = vmatpush3.bf16.msra.mxu0 %v4862_v53 }
 0x37d   :  { %4355 = vmatprep.subr.bf16.mxu0 %v4864_v5 }
 0x380   :  { %4356 = vmatpush3.bf16.msra.mxu0 %v4866_v7 }
 0x381   :  { %4357 = vmatprep.subr.bf16.mxu0 %v4868_v11 }
 0x384   :  { %4358 = vmatpush3.bf16.msra.mxu0 %v4870_v13 }
 0x385   :  { %4359 = vmatprep.subr.bf16.mxu0 %v4872_v15 }
 0x388   :  { %4360 = vmatpush3.bf16.msra.mxu0 %v4873_v16 }
 0x389   :  { %4361 = vmatprep.subr.bf16.mxu0 %v4874_v2 }
 0x38c   :  { %4362 = vmatpush3.bf16.msra.mxu0 %v4875_v19 }
 0x38d   :  { %4363 = vmatprep.subr.bf16.mxu0 %v4876_v35 }
 0x390   :  { %4364 = vmatpush3.bf16.msra.mxu0 %v4877_v28 }
 0x391   :  { %4365 = vmatprep.subr.bf16.mxu0 %v4878_v59 }
 0x394   :  { %4366 = vmatpush3.bf16.msra.mxu0 %v4879_v24 }
 0x39b   :  { %v3004_v60 = vpop.f32.mrf.mxu1 }
 0x39d   :  { %v3006_v27 = vpop.f32.mrf.mxu1 }
 0x39f   :  { %v3007_v46 = vpop.f32.mrf.mxu1 }
 0x3a1   :  { %v3008_v18 = vpop.f32.mrf.mxu1 }
 0x3b7   :  { %v2889_v20 = vpop.f32.mrf.mxu0 }
 0x3b8   :  { %v3005_v54 = vadd.f32 %v3004_v60, %v2889_v20  ;;  %v3177_v60 = vld [vmem:[%s7137_s8] sm:$0xf] }
 0x3b9   :  { %v2891_v10 = vpop.f32.mrf.mxu0  ;;  %v3182_v27 = vrot.slane %v3177_v60, %v7488_v9  ;;  %v3186_v46 = vrot.slane %v3177_v60, %v7474_v44  ;;  %v3190_v21 = vrot.slane %v3177_v60, %v3189_v43  ;;  %v3194_v9 = vrot.slane %v3177_v60, %v3193_v38 }
 0x3bb   :  { %v2892_v25 = vpop.f32.mrf.mxu0 }
 0x3bd   :  { %v2893_v17 = vpop.f32.mrf.mxu0 }
 0x437   :  { %v3144_v56 = vpop.f32.mrf.mxu0 }
 0x438   :  { %v3150_v58 = vadd.f32 %v3144_v56, %v3005_v54 }
 0x439   :  { %v3146_v62 = vpop.f32.mrf.mxu0 }
 0x43a   :  { %v3158_v63 = vadd.f32 %v4273_v57, %v3150_v58 }
 0x43b   :  { %v3147_v0 = vpop.f32.mrf.mxu0 }
 0x43c   :  { %v3159_v3 = vmax.f32 %v3158_v63, 0.0 }
 0x43d   :  { %v3148_v4 = vpop.f32.mrf.mxu0 }
 0x43e   :  { %v3160_v37 = vpack.c.bf16 %v3159_v3, %v3159_v3 }
 0x440   :  { %4290 = vmatmul.mubr.msk.bf16.vlgmr.msra.gmra.mxu1 %vm663_vm3, %v3160_v37 }
 0x441   :  { %3332 = vmatpush1.bf16.msra.mxu1 %v4836_v32  ;;  %3355 = vmatprep.mubr.bf16.mxu1 %v7485_v55  ;;  %v4845_v55 = vld [vmem:[%s7136_s7 + $0x8] ss:$16 sps:$4 sm:$0xff]  }
 0x442   :  { %3333 = vmatprep.subr.bf16.mxu1 %v4841_v30 }
 0x445   :  { %3334 = vmatpush1.bf16.msra.mxu1 %v4839_v36 }
 0x446   :  { %3335 = vmatprep.subr.bf16.mxu1 %v4844_v1 }
 0x449   :  { %3336 = vmatpush1.bf16.msra.mxu1 %v4842_v41  ;;  %v4292_v41 = vld [vmem:[%s7139_s10] ss:$0 sm:$0xff] }
 0x44a   :  { %3337 = vmatprep.subr.bf16.mxu1 %v4847_v52 }
 0x44d   :  { %3338 = vmatpush1.bf16.msra.mxu1 %v4845_v55 }
 0x44e   :  { %4329 = vmatprep.subr.bf16.mxu1 %v4848_v26 }
 0x450   :  { %4291 = vmatmul.mubr.msk.bf16.vlgmr.msra.gmra.mxu1 %vm663_vm3, %v3160_v37 }
 0x451   :  { %4330 = vmatpush3.bf16.msra.mxu1 %v4849_v49 }
 0x452   :  { %4331 = vmatprep.subr.bf16.mxu1 %v4850_v42 }
 0x455   :  { %4332 = vmatpush3.bf16.msra.mxu1 %v4851_v48 }
 0x456   :  { %4333 = vmatprep.subr.bf16.mxu1 %v4852_v29 }
 0x459   :  { %4334 = vmatpush3.bf16.msra.mxu1 %v4853_v61 }
 0x45a   :  { %4335 = vmatprep.subr.bf16.mxu1 %v4854_v23 }
 0x45d   :  { %4336 = vmatpush3.bf16.msra.mxu1 %v4855_v39 }
 0x45e   :  { %4337 = vmatprep.subr.bf16.mxu1 %v4857_v34 }
 0x461   :  { %4338 = vmatpush3.bf16.msra.mxu1 %v4859_v31 }
 0x462   :  { %4339 = vmatprep.subr.bf16.mxu1 %v4861_v50 }
 0x465   :  { %4340 = vmatpush3.bf16.msra.mxu1 %v4863_v40 }
 0x466   :  { %4341 = vmatprep.subr.bf16.mxu1 %v4865_v6 }
 0x469   :  { %4342 = vmatpush3.bf16.msra.mxu1 %v4867_v8 }
 0x46a   :  { %4343 = vmatprep.subr.bf16.mxu1 %v4869_v12 }
 0x46d   :  { %4344 = vmatpush3.bf16.msra.mxu1 %v4871_v14 }
 0x500   :  { %v3316_v18 = vpop.f32.mrf.mxu1 }
 0x501   :  { %v3317_v20 = vadd.f32 %v3316_v18, %v3182_v27 }
 0x502   :  { %v3318_v54 = vpop.f32.mrf.mxu1 }
 0x503   :  { %v3319_v10 = vadd.f32 %v3318_v54, %v3186_v46  ;;  %v3364_v25 = vmax.f32 %v3317_v20, 0.0 }
 0x504   :  { %v3320_v17 = vpop.f32.mrf.mxu1 }
 0x505   :  { %v3365_v45 = vmax.f32 %v3319_v10, 0.0  ;;  %v3368_v51 = vpack.c.bf16 %v3364_v25, %v3364_v25 }
 0x506   :  { %v3321_v33 = vpop.f32.mrf.mxu1 }
 0x507   :  { %v3369_v47 = vpack.c.bf16 %v3365_v45, %v3365_v45 }
 0x509   :  { %3667 = vmatprep.mubr.bf16.mxu1 %v3369_v47 }
 0x50a   :  { %3668 = vmatmul.mubr.bf16.vlgmr.msra.gmra.mxu1 %v3368_v51 }
 0x510   :  { %v3357_v53 = vpop.f32.mrf.mxu1 }
 0x511   :  { %v3358_v44 = vadd.f32 %v3357_v53, %v3190_v21 }
 0x512   :  { %v3359_v56 = vpop.f32.mrf.mxu1 }
 0x513   :  { %v3360_v57 = vadd.f32 %v3359_v56, %v3194_v9  ;;  %v3366_v58 = vmax.f32 %v3358_v44, 0.0 }
 0x514   :  { %v3361_v62 = vpop.f32.mrf.mxu1 }
 0x515   :  { %v3367_v63 = vmax.f32 %v3360_v57, 0.0  ;;  %v3370_v4 = vpack.c.bf16 %v3366_v58, %v3366_v58 }
 0x516   :  { %v3362_v0 = vpop.f32.mrf.mxu1 }
 0x517   :  { %v3371_v3 = vpack.c.bf16 %v3367_v63, %v3367_v63 }
 0x519   :  { %3707 = vmatprep.mubr.bf16.mxu0 %v3371_v3 }
 0x51a   :  { %3708 = vmatmul.mubr.bf16.vlgmr.msra.gmra.mxu0 %v3370_v4 }
 0x5ca   :  { %v4345_v32 = vpop.f32.mrf.mxu1 }
 0x5cc   :  { %v4346_v37 = vpop.f32.mrf.mxu1 }
 0x5cd   :  { %v4347_v1 = vadd.f32 %v4346_v37, %v4345_v32 }
 0x5ce   :  { %v4348_v30 = vpop.f32.mrf.mxu1 }
 0x5cf   :  { %v3670_v26 = vadd.f32 %v4347_v1, %v4292_v41 }
 0x5d0   :  { %v4349_v36 = vpop.f32.mrf.mxu1 }
 0x5da   :  { %v4367_v52 = vpop.f32.mrf.mxu0 }
 0x5dc   :  { %v4368_v55 = vpop.f32.mrf.mxu0 }
 0x5dd   :  { %v4369_v49 = vadd.f32 %v4368_v55, %v4367_v52 }
 0x5de   :  { %v4370_v42 = vpop.f32.mrf.mxu0 }
 0x5df   :  { %v3710_v48 = vadd.f32 %v4369_v49, %v3670_v26 }
 0x5e0   :  { %v4371_v29 = vpop.f32.mrf.mxu0 }
 0x5e1   :  { %3715 = vst [vmem:[#allocation2] sm:$0x3] %v3710_v48 }
 0x5e2   :  { %4933 = shalt.err (!%p4930_p4)
}
 0x5e3   :  { %3725 = dma.vmem_to_hbm [thread:$0]  %s3723_s12, 32, %s7140_s11, [#allocation3]  }
 0x5e4   :  { %4942 = dma.done.wait [#allocation3], 32  }
 0x5e5   :  { %4943 = vsyncadd [#allocation3], 4294967264 }
 0x5e6   :  { %3729 = vsyncpa [#allocation3], 1 }

</bundles_post_ra>
